<compile_context>
chip_gen: v7x
topology: tpu7x:2x2x1
jax: 0.10.0
libtpu: 0.0.40
codegen_flags: <defaults>
</compile_context>

<pallas_src>
import jax
import jax.numpy as jnp
from jax.experimental import pallas as pl
from jax.experimental.pallas import tpu as pltpu


# ----------------------------- Pallas kernel --------------------------------

def _conv3x3_accum(src_ref, w_ref, H, W):
    """3x3 stride-1 conv over a spatially padded (H+2, W+2, C) ref, computed
    as 9 MXU matmuls accumulated in f32. Weights: (9, Cin, Cout), channels
    lane-dense (padded to a multiple of 128)."""
    Cin = src_ref.shape[-1]
    Cout = w_ref.shape[-1]
    acc = jnp.zeros((H * W, Cout), jnp.float32)
    for kh in range(3):
        for kw in range(3):
            # H*W on sublanes, C on lanes -> tap shifts are sublane-only.
            patch = src_ref[kh:kh + H, kw:kw + W, :].reshape(H * W, Cin)
            acc = acc + jnp.dot(patch, w_ref[kh * 3 + kw],
                                preferred_element_type=jnp.float32)
    return acc


def basic_block_kernel(x_ref, res_ref, w1_ref, b1_ref, w2_ref, b2_ref,
                       o_ref, mid_ref):
    # x_ref:   (H+2, W+2, Cp)  spatially padded, channel-padded input (bf16/f32)
    # res_ref: (H*W, Cp)       exact f32 residual (identity), lane-dense
    # w*_ref:  (9, Cp, Cp)     BN-scale-folded weights
    # b*_ref:  (1, Cp)         folded BN bias (f32)
    # o_ref:   (H*W, Cp)       lane-dense flat output (f32)
    # mid_ref: (H+2, W+2, Cp)  VMEM scratch: conv1 output + zero halo
    Hp, Wp, Cp = x_ref.shape
    H, W = Hp - 2, Wp - 2

    # ---- conv1 (+ folded bn1) + bias + ReLU  -> VMEM scratch (no HBM trip)
    acc1 = _conv3x3_accum(x_ref, w1_ref, H, W)
    out1 = jnp.maximum(acc1 + b1_ref[...], 0.0)

    mid_ref[...] = jnp.zeros_like(mid_ref)                 # zero halo ring
    mid_ref[1:1 + H, 1:1 + W, :] = out1.reshape(H, W, Cp).astype(mid_ref.dtype)

    # ---- conv2 (+ folded bn2) + bias + residual + ReLU
    acc2 = _conv3x3_accum(mid_ref, w2_ref, H, W)
    out2 = jnp.maximum(acc2 + b2_ref[...] + res_ref[...], 0.0)
    o_ref[...] = out2.astype(o_ref.dtype)                  # unmasked lane-dense vst


# ------------------------------- wrappers ------------------------------------

def _round_up(x, m):
    return (x + m - 1) // m * m


def fold_bn(gamma, beta, running_mean, running_var, eps=1e-5):
    scale = gamma / jnp.sqrt(running_var + eps)
    bias = beta - running_mean * scale
    return scale.astype(jnp.float32), bias.astype(jnp.float32)


def _prep_weight(w_oihw, scale, cp_in, cp_out, dtype):
    """PyTorch (Co,Ci,3,3) -> (9, Cp_in, Cp_out) with BN scale folded in."""
    co, ci, kh, kw = w_oihw.shape
    w = jnp.transpose(w_oihw, (2, 3, 1, 0)) * scale.reshape(1, 1, 1, co)
    w = w.reshape(kh * kw, ci, co)
    w = jnp.pad(w, ((0, 0), (0, cp_in - ci), (0, cp_out - co)))
    return w.astype(dtype)


def _prep_bias(bias, cp):
    return jnp.pad(bias, (0, cp - bias.shape[0])).reshape(1, cp).astype(jnp.float32)


def basic_block_forward(x_nchw, params, use_bf16=True):
    """BasicBlock.forward (stride=1, downsample=None, groups=1, eval-mode BN)."""
    # TODO(synk): training-mode BN (batch statistics) not computed in-kernel.
    # TODO(synk): stride>1 / downsample path not implemented (module defaults).
    N, C, H, W = x_nchw.shape
    planes = params["conv1_w"].shape[0]
    assert planes == C, "BasicBlock residual path requires inplanes == planes"
    Cp = _round_up(C, 128)                 # lane-dense channel padding
    Hp, Wp = H + 2, W + 2
    cdt = jnp.bfloat16 if use_bf16 else jnp.float32

    # NCHW -> NHWC; channel-pad to Cp.
    x_nhwc = jnp.transpose(x_nchw, (0, 2, 3, 1))
    x_nhwc = jnp.pad(x_nhwc, ((0, 0), (0, 0), (0, 0), (0, Cp - C)))

    # Conv input: +1 spatial halo, cast to matmul dtype.
    x = jnp.pad(x_nhwc, ((0, 0), (1, 1), (1, 1), (0, 0))).astype(cdt)
    # Residual: exact f32, flat lane-dense (N, H*W, Cp).
    res = x_nhwc.reshape(N, H * W, Cp).astype(jnp.float32)

    s1, b1 = fold_bn(params["bn1_gamma"], params["bn1_beta"],
                     params["bn1_mean"], params["bn1_var"])
    s2, b2 = fold_bn(params["bn2_gamma"], params["bn2_beta"],
                     params["bn2_mean"], params["bn2_var"])
    w1 = _prep_weight(params["conv1_w"], s1, Cp, Cp, cdt)    # (9, Cp, Cp)
    w2 = _prep_weight(params["conv2_w"], s2, Cp, Cp, cdt)
    b1 = _prep_bias(b1, Cp)
    b2 = _prep_bias(b2, Cp)

    out = pl.pallas_call(
        basic_block_kernel,
        out_shape=jax.ShapeDtypeStruct((N, H * W, Cp), jnp.float32),
        grid=(N,),
        in_specs=[
            pl.BlockSpec((None, Hp, Wp, Cp), lambda n: (n, 0, 0, 0)),   # x (padded)
            pl.BlockSpec((None, H * W, Cp), lambda n: (n, 0, 0)),       # residual
            pl.BlockSpec((9, Cp, Cp), lambda n: (0, 0, 0)),             # w1 (resident)
            pl.BlockSpec((1, Cp), lambda n: (0, 0)),                    # bias1
            pl.BlockSpec((9, Cp, Cp), lambda n: (0, 0, 0)),             # w2 (resident)
            pl.BlockSpec((1, Cp), lambda n: (0, 0)),                    # bias2
        ],
        out_specs=pl.BlockSpec((None, H * W, Cp), lambda n: (n, 0, 0)),
        scratch_shapes=[pltpu.VMEM((Hp, Wp, Cp), cdt)],
        compiler_params=pltpu.CompilerParams(
            dimension_semantics=("parallel",)),
    )(x, res, w1, b1, w2, b2)

    # TODO(synk): for real ResNet shapes (56x56x64 ... 7x7x512) add an H-row
    # grid axis (with halo handling) and set vmem_limit_bytes for v7x (64 MiB).
    out = out.reshape(N, H, W, Cp)[:, :, :, :C]
    return jnp.transpose(out, (0, 3, 1, 2))   # NHWC -> NCHW


# ------------------------ plain-JAX reference (check) ------------------------

def _reference(x_nchw, params):
    x = jnp.transpose(x_nchw, (0, 2, 3, 1))

    def conv(inp, w_oihw):
        w = jnp.transpose(w_oihw, (2, 3, 1, 0))
        return jax.lax.conv_general_dilated(
            inp, w, window_strides=(1, 1), padding=((1, 1), (1, 1)),
            dimension_numbers=("NHWC", "HWIO", "NHWC"))

    s1, b1 = fold_bn(params["bn1_gamma"], params["bn1_beta"],
                     params["bn1_mean"], params["bn1_var"])
    s2, b2 = fold_bn(params["bn2_gamma"], params["bn2_beta"],
                     params["bn2_mean"], params["bn2_var"])
    out = jnp.maximum(conv(x, params["conv1_w"]) * s1 + b1, 0.0)
    out = jnp.maximum(conv(out, params["conv2_w"]) * s2 + b2 + x, 0.0)
    return jnp.transpose(out, (0, 3, 1, 2))


# ---------------------------------- main -------------------------------------

if __name__ == "__main__":
    key = jax.random.PRNGKey(0)
    N, C, H, W = 2, 4, 16, 16           # inplanes = planes = 4, stride = 1
    inplanes = planes = C

    ks = jax.random.split(key, 8)
    x = jax.random.normal(ks[0], (N, C, H, W), jnp.float32)

    params = {
        "conv1_w": jax.random.normal(ks[1], (planes, inplanes, 3, 3), jnp.float32) * 0.1,
        "conv2_w": jax.random.normal(ks[2], (planes, planes, 3, 3), jnp.float32) * 0.1,
        "bn1_gamma": 1.0 + 0.1 * jax.random.normal(ks[3], (planes,), jnp.float32),
        "bn1_beta": 0.1 * jax.random.normal(ks[4], (planes,), jnp.float32),
        "bn1_mean": 0.05 * jax.random.normal(ks[5], (planes,), jnp.float32),
        "bn1_var": jnp.abs(1.0 + 0.1 * jax.random.normal(ks[6], (planes,), jnp.float32)),
        "bn2_gamma": 1.0 + 0.1 * jax.random.normal(ks[7], (planes,), jnp.float32),
        "bn2_beta": jnp.zeros((planes,), jnp.float32),
        "bn2_mean": jnp.zeros((planes,), jnp.float32),
        "bn2_var": jnp.ones((planes,), jnp.float32),
    }

    ref = jax.block_until_ready(_reference(x, params))

    # exact-path check (f32 matmul inputs)
    out_f32 = jax.block_until_ready(basic_block_forward(x, params, use_bf16=False))
    assert out_f32.shape == (N, C, H, W), out_f32.shape
    assert jnp.allclose(out_f32, ref, atol=1e-4, rtol=1e-4), "f32 path mismatch"

    # perf-path check (bf16 matmul inputs, f32 accumulation, exact f32 residual)
    out_bf16 = jax.block_until_ready(basic_block_forward(x, params, use_bf16=True))
    assert out_bf16.shape == (N, C, H, W), out_bf16.shape
    assert jnp.allclose(out_bf16, ref, atol=5e-2, rtol=5e-2), "bf16 path mismatch"

    print("KERNEL_OK")
</pallas_src>

<mosaic_0001>
module attributes {stable_mosaic.version = 11 : i64} {
  func.func @basic_block_kernel(%arg0: i32, %arg1: memref<1x18x18x128xf32, #tpu.memory_space<vmem>>, %arg2: memref<1x256x128xf32, #tpu.memory_space<vmem>>, %arg3: memref<9x128x128xf32, #tpu.memory_space<vmem>>, %arg4: memref<1x128xf32, #tpu.memory_space<vmem>>, %arg5: memref<9x128x128xf32, #tpu.memory_space<vmem>>, %arg6: memref<1x128xf32, #tpu.memory_space<vmem>>, %arg7: memref<1x256x128xf32, #tpu.memory_space<vmem>>, %arg8: memref<18x18x128xf32, #tpu.memory_space<vmem>>) attributes {dimension_semantics = [#tpu.dimension_semantics<parallel>], iteration_bounds = array<i64: 2>, scalar_prefetch = 0 : i64, scratch_operands = 1 : i64, tpu.core_type = #tpu.core_type<tc>, window_params = [{transform_indices = @transform_0, window_bounds = array<i64: 1, 18, 18, 128>}, {transform_indices = @transform_1, window_bounds = array<i64: 1, 256, 128>}, {pipeline_mode = #tpu.pipeline_mode<synchronous>, transform_indices = @transform_2, window_bounds = array<i64: 9, 128, 128>}, {pipeline_mode = #tpu.pipeline_mode<synchronous>, transform_indices = @transform_3, window_bounds = array<i64: 1, 128>}, {pipeline_mode = #tpu.pipeline_mode<synchronous>, transform_indices = @transform_4, window_bounds = array<i64: 9, 128, 128>}, {pipeline_mode = #tpu.pipeline_mode<synchronous>, transform_indices = @transform_5, window_bounds = array<i64: 1, 128>}, {transform_indices = @transform_6, window_bounds = array<i64: 1, 256, 128>}]} {
    %cst = arith.constant 0.000000e+00 : f32
    %0 = vector.broadcast %cst : f32 to vector<256x128xf32>
    %c0 = arith.constant 0 : index
    %c0_0 = arith.constant 0 : index
    %c0_1 = arith.constant 0 : index
    %c0_2 = arith.constant 0 : index
    %1 = vector.load %arg1[%c0, %c0_0, %c0_1, %c0_2] : memref<1x18x18x128xf32, #tpu.memory_space<vmem>>, vector<1x16x16x128xf32>
    %2 = vector.shape_cast %1 : vector<1x16x16x128xf32> to vector<16x16x128xf32>
    %3 = vector.shape_cast %2 : vector<16x16x128xf32> to vector<256x128xf32>
    %c0_3 = arith.constant 0 : index
    %c0_4 = arith.constant 0 : index
    %c0_5 = arith.constant 0 : index
    %4 = vector.load %arg3[%c0_3, %c0_4, %c0_5] : memref<9x128x128xf32, #tpu.memory_space<vmem>>, vector<1x128x128xf32>
    %5 = vector.shape_cast %4 : vector<1x128x128xf32> to vector<128x128xf32>
    %cst_6 = arith.constant dense<0.000000e+00> : vector<256x128xf32>
    %6 = tpu.matmul %3, %5, %cst_6 {dimension_numbers = #tpu.dot_dimension_numbers<[1], [0], [0], [1], [0, 0, 1, 1], [], []>} : vector<256x128xf32>, vector<128x128xf32>, vector<256x128xf32> -> vector<256x128xf32>
    %7 = arith.addf %0, %6 : vector<256x128xf32>
    %c0_7 = arith.constant 0 : index
    %c0_8 = arith.constant 0 : index
    %c1 = arith.constant 1 : index
    %c0_9 = arith.constant 0 : index
    %8 = vector.load %arg1[%c0_7, %c0_8, %c1, %c0_9] : memref<1x18x18x128xf32, #tpu.memory_space<vmem>>, vector<1x16x16x128xf32>
    %9 = vector.shape_cast %8 : vector<1x16x16x128xf32> to vector<16x16x128xf32>
    %10 = vector.shape_cast %9 : vector<16x16x128xf32> to vector<256x128xf32>
    %c1_10 = arith.constant 1 : index
    %c0_11 = arith.constant 0 : index
    %c0_12 = arith.constant 0 : index
    %11 = vector.load %arg3[%c1_10, %c0_11, %c0_12] : memref<9x128x128xf32, #tpu.memory_space<vmem>>, vector<1x128x128xf32>
    %12 = vector.shape_cast %11 : vector<1x128x128xf32> to vector<128x128xf32>
    %cst_13 = arith.constant dense<0.000000e+00> : vector<256x128xf32>
    %13 = tpu.matmul %10, %12, %cst_13 {dimension_numbers = #tpu.dot_dimension_numbers<[1], [0], [0], [1], [0, 0, 1, 1], [], []>} : vector<256x128xf32>, vector<128x128xf32>, vector<256x128xf32> -> vector<256x128xf32>
    %14 = arith.addf %7, %13 : vector<256x128xf32>
    %c0_14 = arith.constant 0 : index
    %c0_15 = arith.constant 0 : index
    %c2 = arith.constant 2 : index
    %c0_16 = arith.constant 0 : index
    %15 = vector.load %arg1[%c0_14, %c0_15, %c2, %c0_16] : memref<1x18x18x128xf32, #tpu.memory_space<vmem>>, vector<1x16x16x128xf32>
    %16 = vector.shape_cast %15 : vector<1x16x16x128xf32> to vector<16x16x128xf32>
    %17 = vector.shape_cast %16 : vector<16x16x128xf32> to vector<256x128xf32>
    %c2_17 = arith.constant 2 : index
    %c0_18 = arith.constant 0 : index
    %c0_19 = arith.constant 0 : index
    %18 = vector.load %arg3[%c2_17, %c0_18, %c0_19] : memref<9x128x128xf32, #tpu.memory_space<vmem>>, vector<1x128x128xf32>
    %19 = vector.shape_cast %18 : vector<1x128x128xf32> to vector<128x128xf32>
    %cst_20 = arith.constant dense<0.000000e+00> : vector<256x128xf32>
    %20 = tpu.matmul %17, %19, %cst_20 {dimension_numbers = #tpu.dot_dimension_numbers<[1], [0], [0], [1], [0, 0, 1, 1], [], []>} : vector<256x128xf32>, vector<128x128xf32>, vector<256x128xf32> -> vector<256x128xf32>
    %21 = arith.addf %14, %20 : vector<256x128xf32>
    %c0_21 = arith.constant 0 : index
    %c1_22 = arith.constant 1 : index
    %c0_23 = arith.constant 0 : index
    %c0_24 = arith.constant 0 : index
    %22 = vector.load %arg1[%c0_21, %c1_22, %c0_23, %c0_24] : memref<1x18x18x128xf32, #tpu.memory_space<vmem>>, vector<1x16x16x128xf32>
    %23 = vector.shape_cast %22 : vector<1x16x16x128xf32> to vector<16x16x128xf32>
    %24 = vector.shape_cast %23 : vector<16x16x128xf32> to vector<256x128xf32>
    %c3 = arith.constant 3 : index
    %c0_25 = arith.constant 0 : index
    %c0_26 = arith.constant 0 : index
    %25 = vector.load %arg3[%c3, %c0_25, %c0_26] : memref<9x128x128xf32, #tpu.memory_space<vmem>>, vector<1x128x128xf32>
    %26 = vector.shape_cast %25 : vector<1x128x128xf32> to vector<128x128xf32>
    %cst_27 = arith.constant dense<0.000000e+00> : vector<256x128xf32>
    %27 = tpu.matmul %24, %26, %cst_27 {dimension_numbers = #tpu.dot_dimension_numbers<[1], [0], [0], [1], [0, 0, 1, 1], [], []>} : vector<256x128xf32>, vector<128x128xf32>, vector<256x128xf32> -> vector<256x128xf32>
    %28 = arith.addf %21, %27 : vector<256x128xf32>
    %c0_28 = arith.constant 0 : index
    %c1_29 = arith.constant 1 : index
    %c1_30 = arith.constant 1 : index
    %c0_31 = arith.constant 0 : index
    %29 = vector.load %arg1[%c0_28, %c1_29, %c1_30, %c0_31] : memref<1x18x18x128xf32, #tpu.memory_space<vmem>>, vector<1x16x16x128xf32>
    %30 = vector.shape_cast %29 : vector<1x16x16x128xf32> to vector<16x16x128xf32>
    %31 = vector.shape_cast %30 : vector<16x16x128xf32> to vector<256x128xf32>
    %c4 = arith.constant 4 : index
    %c0_32 = arith.constant 0 : index
    %c0_33 = arith.constant 0 : index
    %32 = vector.load %arg3[%c4, %c0_32, %c0_33] : memref<9x128x128xf32, #tpu.memory_space<vmem>>, vector<1x128x128xf32>
    %33 = vector.shape_cast %32 : vector<1x128x128xf32> to vector<128x128xf32>
    %cst_34 = arith.constant dense<0.000000e+00> : vector<256x128xf32>
    %34 = tpu.matmul %31, %33, %cst_34 {dimension_numbers = #tpu.dot_dimension_numbers<[1], [0], [0], [1], [0, 0, 1, 1], [], []>} : vector<256x128xf32>, vector<128x128xf32>, vector<256x128xf32> -> vector<256x128xf32>
    %35 = arith.addf %28, %34 : vector<256x128xf32>
    %c0_35 = arith.constant 0 : index
    %c1_36 = arith.constant 1 : index
    %c2_37 = arith.constant 2 : index
    %c0_38 = arith.constant 0 : index
    %36 = vector.load %arg1[%c0_35, %c1_36, %c2_37, %c0_38] : memref<1x18x18x128xf32, #tpu.memory_space<vmem>>, vector<1x16x16x128xf32>
    %37 = vector.shape_cast %36 : vector<1x16x16x128xf32> to vector<16x16x128xf32>
    %38 = vector.shape_cast %37 : vector<16x16x128xf32> to vector<256x128xf32>
    %c5 = arith.constant 5 : index
    %c0_39 = arith.constant 0 : index
    %c0_40 = arith.constant 0 : index
    %39 = vector.load %arg3[%c5, %c0_39, %c0_40] : memref<9x128x128xf32, #tpu.memory_space<vmem>>, vector<1x128x128xf32>
    %40 = vector.shape_cast %39 : vector<1x128x128xf32> to vector<128x128xf32>
    %cst_41 = arith.constant dense<0.000000e+00> : vector<256x128xf32>
    %41 = tpu.matmul %38, %40, %cst_41 {dimension_numbers = #tpu.dot_dimension_numbers<[1], [0], [0], [1], [0, 0, 1, 1], [], []>} : vector<256x128xf32>, vector<128x128xf32>, vector<256x128xf32> -> vector<256x128xf32>
    %42 = arith.addf %35, %41 : vector<256x128xf32>
    %c0_42 = arith.constant 0 : index
    %c2_43 = arith.constant 2 : index
    %c0_44 = arith.constant 0 : index
    %c0_45 = arith.constant 0 : index
    %43 = vector.load %arg1[%c0_42, %c2_43, %c0_44, %c0_45] : memref<1x18x18x128xf32, #tpu.memory_space<vmem>>, vector<1x16x16x128xf32>
    %44 = vector.shape_cast %43 : vector<1x16x16x128xf32> to vector<16x16x128xf32>
    %45 = vector.shape_cast %44 : vector<16x16x128xf32> to vector<256x128xf32>
    %c6 = arith.constant 6 : index
    %c0_46 = arith.constant 0 : index
    %c0_47 = arith.constant 0 : index
    %46 = vector.load %arg3[%c6, %c0_46, %c0_47] : memref<9x128x128xf32, #tpu.memory_space<vmem>>, vector<1x128x128xf32>
    %47 = vector.shape_cast %46 : vector<1x128x128xf32> to vector<128x128xf32>
    %cst_48 = arith.constant dense<0.000000e+00> : vector<256x128xf32>
    %48 = tpu.matmul %45, %47, %cst_48 {dimension_numbers = #tpu.dot_dimension_numbers<[1], [0], [0], [1], [0, 0, 1, 1], [], []>} : vector<256x128xf32>, vector<128x128xf32>, vector<256x128xf32> -> vector<256x128xf32>
    %49 = arith.addf %42, %48 : vector<256x128xf32>
    %c0_49 = arith.constant 0 : index
    %c2_50 = arith.constant 2 : index
    %c1_51 = arith.constant 1 : index
    %c0_52 = arith.constant 0 : index
    %50 = vector.load %arg1[%c0_49, %c2_50, %c1_51, %c0_52] : memref<1x18x18x128xf32, #tpu.memory_space<vmem>>, vector<1x16x16x128xf32>
    %51 = vector.shape_cast %50 : vector<1x16x16x128xf32> to vector<16x16x128xf32>
    %52 = vector.shape_cast %51 : vector<16x16x128xf32> to vector<256x128xf32>
    %c7 = arith.constant 7 : index
    %c0_53 = arith.constant 0 : index
    %c0_54 = arith.constant 0 : index
    %53 = vector.load %arg3[%c7, %c0_53, %c0_54] : memref<9x128x128xf32, #tpu.memory_space<vmem>>, vector<1x128x128xf32>
    %54 = vector.shape_cast %53 : vector<1x128x128xf32> to vector<128x128xf32>
    %cst_55 = arith.constant dense<0.000000e+00> : vector<256x128xf32>
    %55 = tpu.matmul %52, %54, %cst_55 {dimension_numbers = #tpu.dot_dimension_numbers<[1], [0], [0], [1], [0, 0, 1, 1], [], []>} : vector<256x128xf32>, vector<128x128xf32>, vector<256x128xf32> -> vector<256x128xf32>
    %56 = arith.addf %49, %55 : vector<256x128xf32>
    %c0_56 = arith.constant 0 : index
    %c2_57 = arith.constant 2 : index
    %c2_58 = arith.constant 2 : index
    %c0_59 = arith.constant 0 : index
    %57 = vector.load %arg1[%c0_56, %c2_57, %c2_58, %c0_59] : memref<1x18x18x128xf32, #tpu.memory_space<vmem>>, vector<1x16x16x128xf32>
    %58 = vector.shape_cast %57 : vector<1x16x16x128xf32> to vector<16x16x128xf32>
    %59 = vector.shape_cast %58 : vector<16x16x128xf32> to vector<256x128xf32>
    %c8 = arith.constant 8 : index
    %c0_60 = arith.constant 0 : index
    %c0_61 = arith.constant 0 : index
    %60 = vector.load %arg3[%c8, %c0_60, %c0_61] : memref<9x128x128xf32, #tpu.memory_space<vmem>>, vector<1x128x128xf32>
    %61 = vector.shape_cast %60 : vector<1x128x128xf32> to vector<128x128xf32>
    %cst_62 = arith.constant dense<0.000000e+00> : vector<256x128xf32>
    %62 = tpu.matmul %59, %61, %cst_62 {dimension_numbers = #tpu.dot_dimension_numbers<[1], [0], [0], [1], [0, 0, 1, 1], [], []>} : vector<256x128xf32>, vector<128x128xf32>, vector<256x128xf32> -> vector<256x128xf32>
    %63 = arith.addf %56, %62 : vector<256x128xf32>
    %c0_63 = arith.constant 0 : index
    %c0_64 = arith.constant 0 : index
    %64 = vector.load %arg4[%c0_63, %c0_64] : memref<1x128xf32, #tpu.memory_space<vmem>>, vector<1x128xf32>
    %65 = vector.broadcast %64 : vector<1x128xf32> to vector<256x128xf32>
    %66 = arith.addf %63, %65 : vector<256x128xf32>
    %cst_65 = arith.constant 0.000000e+00 : f32
    %67 = vector.broadcast %cst_65 : f32 to vector<256x128xf32>
    %68 = arith.maximumf %66, %67 : vector<256x128xf32>
    %cst_66 = arith.constant 0.000000e+00 : f32
    %69 = vector.broadcast %cst_66 : f32 to vector<18x18x128xf32>
    %c0_67 = arith.constant 0 : index
    %c0_68 = arith.constant 0 : index
    %c0_69 = arith.constant 0 : index
    %70 = vector.load %arg8[%c0_67, %c0_68, %c0_69] : memref<18x18x128xf32, #tpu.memory_space<vmem>>, vector<18x18x128xf32>
    tpu.vector_store %arg8[%c0_67, %c0_68, %c0_69], %69 {strides = array<i32>} : memref<18x18x128xf32, #tpu.memory_space<vmem>>, vector<18x18x128xf32>,
    %71 = vector.shape_cast %68 : vector<256x128xf32> to vector<16x16x128xf32>
    %c1_70 = arith.constant 1 : index
    %c1_71 = arith.constant 1 : index
    %c0_72 = arith.constant 0 : index
    %72 = vector.load %arg8[%c1_70, %c1_71, %c0_72] : memref<18x18x128xf32, #tpu.memory_space<vmem>>, vector<16x16x128xf32>
    tpu.vector_store %arg8[%c1_70, %c1_71, %c0_72], %71 {strides = array<i32>} : memref<18x18x128xf32, #tpu.memory_space<vmem>>, vector<16x16x128xf32>,
    %cst_73 = arith.constant 0.000000e+00 : f32
    %73 = vector.broadcast %cst_73 : f32 to vector<256x128xf32>
    %c0_74 = arith.constant 0 : index
    %c0_75 = arith.constant 0 : index
    %c0_76 = arith.constant 0 : index
    %74 = vector.load %arg8[%c0_74, %c0_75, %c0_76] : memref<18x18x128xf32, #tpu.memory_space<vmem>>, vector<16x16x128xf32>
    %75 = vector.shape_cast %74 : vector<16x16x128xf32> to vector<256x128xf32>
    %c0_77 = arith.constant 0 : index
    %c0_78 = arith.constant 0 : index
    %c0_79 = arith.constant 0 : index
    %76 = vector.load %arg5[%c0_77, %c0_78, %c0_79] : memref<9x128x128xf32, #tpu.memory_space<vmem>>, vector<1x128x128xf32>
    %77 = vector.shape_cast %76 : vector<1x128x128xf32> to vector<128x128xf32>
    %cst_80 = arith.constant dense<0.000000e+00> : vector<256x128xf32>
    %78 = tpu.matmul %75, %77, %cst_80 {dimension_numbers = #tpu.dot_dimension_numbers<[1], [0], [0], [1], [0, 0, 1, 1], [], []>} : vector<256x128xf32>, vector<128x128xf32>, vector<256x128xf32> -> vector<256x128xf32>
    %79 = arith.addf %73, %78 : vector<256x128xf32>
    %c0_81 = arith.constant 0 : index
    %c1_82 = arith.constant 1 : index
    %c0_83 = arith.constant 0 : index
    %80 = vector.load %arg8[%c0_81, %c1_82, %c0_83] : memref<18x18x128xf32, #tpu.memory_space<vmem>>, vector<16x16x128xf32>
    %81 = vector.shape_cast %80 : vector<16x16x128xf32> to vector<256x128xf32>
    %c1_84 = arith.constant 1 : index
    %c0_85 = arith.constant 0 : index
    %c0_86 = arith.constant 0 : index
    %82 = vector.load %arg5[%c1_84, %c0_85, %c0_86] : memref<9x128x128xf32, #tpu.memory_space<vmem>>, vector<1x128x128xf32>
    %83 = vector.shape_cast %82 : vector<1x128x128xf32> to vector<128x128xf32>
    %cst_87 = arith.constant dense<0.000000e+00> : vector<256x128xf32>
    %84 = tpu.matmul %81, %83, %cst_87 {dimension_numbers = #tpu.dot_dimension_numbers<[1], [0], [0], [1], [0, 0, 1, 1], [], []>} : vector<256x128xf32>, vector<128x128xf32>, vector<256x128xf32> -> vector<256x128xf32>
    %85 = arith.addf %79, %84 : vector<256x128xf32>
    %c0_88 = arith.constant 0 : index
    %c2_89 = arith.constant 2 : index
    %c0_90 = arith.constant 0 : index
    %86 = vector.load %arg8[%c0_88, %c2_89, %c0_90] : memref<18x18x128xf32, #tpu.memory_space<vmem>>, vector<16x16x128xf32>
    %87 = vector.shape_cast %86 : vector<16x16x128xf32> to vector<256x128xf32>
    %c2_91 = arith.constant 2 : index
    %c0_92 = arith.constant 0 : index
    %c0_93 = arith.constant 0 : index
    %88 = vector.load %arg5[%c2_91, %c0_92, %c0_93] : memref<9x128x128xf32, #tpu.memory_space<vmem>>, vector<1x128x128xf32>
    %89 = vector.shape_cast %88 : vector<1x128x128xf32> to vector<128x128xf32>
    %cst_94 = arith.constant dense<0.000000e+00> : vector<256x128xf32>
    %90 = tpu.matmul %87, %89, %cst_94 {dimension_numbers = #tpu.dot_dimension_numbers<[1], [0], [0], [1], [0, 0, 1, 1], [], []>} : vector<256x128xf32>, vector<128x128xf32>, vector<256x128xf32> -> vector<256x128xf32>
    %91 = arith.addf %85, %90 : vector<256x128xf32>
    %c1_95 = arith.constant 1 : index
    %c0_96 = arith.constant 0 : index
    %c0_97 = arith.constant 0 : index
    %92 = vector.load %arg8[%c1_95, %c0_96, %c0_97] : memref<18x18x128xf32, #tpu.memory_space<vmem>>, vector<16x16x128xf32>
    %93 = vector.shape_cast %92 : vector<16x16x128xf32> to vector<256x128xf32>
    %c3_98 = arith.constant 3 : index
    %c0_99 = arith.constant 0 : index
    %c0_100 = arith.constant 0 : index
    %94 = vector.load %arg5[%c3_98, %c0_99, %c0_100] : memref<9x128x128xf32, #tpu.memory_space<vmem>>, vector<1x128x128xf32>
    %95 = vector.shape_cast %94 : vector<1x128x128xf32> to vector<128x128xf32>
    %cst_101 = arith.constant dense<0.000000e+00> : vector<256x128xf32>
    %96 = tpu.matmul %93, %95, %cst_101 {dimension_numbers = #tpu.dot_dimension_numbers<[1], [0], [0], [1], [0, 0, 1, 1], [], []>} : vector<256x128xf32>, vector<128x128xf32>, vector<256x128xf32> -> vector<256x128xf32>
    %97 = arith.addf %91, %96 : vector<256x128xf32>
    %c1_102 = arith.constant 1 : index
    %c1_103 = arith.constant 1 : index
    %c0_104 = arith.constant 0 : index
    %98 = vector.load %arg8[%c1_102, %c1_103, %c0_104] : memref<18x18x128xf32, #tpu.memory_space<vmem>>, vector<16x16x128xf32>
    %99 = vector.shape_cast %98 : vector<16x16x128xf32> to vector<256x128xf32>
    %c4_105 = arith.constant 4 : index
    %c0_106 = arith.constant 0 : index
    %c0_107 = arith.constant 0 : index
    %100 = vector.load %arg5[%c4_105, %c0_106, %c0_107] : memref<9x128x128xf32, #tpu.memory_space<vmem>>, vector<1x128x128xf32>
    %101 = vector.shape_cast %100 : vector<1x128x128xf32> to vector<128x128xf32>
    %cst_108 = arith.constant dense<0.000000e+00> : vector<256x128xf32>
    %102 = tpu.matmul %99, %101, %cst_108 {dimension_numbers = #tpu.dot_dimension_numbers<[1], [0], [0], [1], [0, 0, 1, 1], [], []>} : vector<256x128xf32>, vector<128x128xf32>, vector<256x128xf32> -> vector<256x128xf32>
    %103 = arith.addf %97, %102 : vector<256x128xf32>
    %c1_109 = arith.constant 1 : index
    %c2_110 = arith.constant 2 : index
    %c0_111 = arith.constant 0 : index
    %104 = vector.load %arg8[%c1_109, %c2_110, %c0_111] : memref<18x18x128xf32, #tpu.memory_space<vmem>>, vector<16x16x128xf32>
    %105 = vector.shape_cast %104 : vector<16x16x128xf32> to vector<256x128xf32>
    %c5_112 = arith.constant 5 : index
    %c0_113 = arith.constant 0 : index
    %c0_114 = arith.constant 0 : index
    %106 = vector.load %arg5[%c5_112, %c0_113, %c0_114] : memref<9x128x128xf32, #tpu.memory_space<vmem>>, vector<1x128x128xf32>
    %107 = vector.shape_cast %106 : vector<1x128x128xf32> to vector<128x128xf32>
    %cst_115 = arith.constant dense<0.000000e+00> : vector<256x128xf32>
    %108 = tpu.matmul %105, %107, %cst_115 {dimension_numbers = #tpu.dot_dimension_numbers<[1], [0], [0], [1], [0, 0, 1, 1], [], []>} : vector<256x128xf32>, vector<128x128xf32>, vector<256x128xf32> -> vector<256x128xf32>
    %109 = arith.addf %103, %108 : vector<256x128xf32>
    %c2_116 = arith.constant 2 : index
    %c0_117 = arith.constant 0 : index
    %c0_118 = arith.constant 0 : index
    %110 = vector.load %arg8[%c2_116, %c0_117, %c0_118] : memref<18x18x128xf32, #tpu.memory_space<vmem>>, vector<16x16x128xf32>
    %111 = vector.shape_cast %110 : vector<16x16x128xf32> to vector<256x128xf32>
    %c6_119 = arith.constant 6 : index
    %c0_120 = arith.constant 0 : index
    %c0_121 = arith.constant 0 : index
    %112 = vector.load %arg5[%c6_119, %c0_120, %c0_121] : memref<9x128x128xf32, #tpu.memory_space<vmem>>, vector<1x128x128xf32>
    %113 = vector.shape_cast %112 : vector<1x128x128xf32> to vector<128x128xf32>
    %cst_122 = arith.constant dense<0.000000e+00> : vector<256x128xf32>
    %114 = tpu.matmul %111, %113, %cst_122 {dimension_numbers = #tpu.dot_dimension_numbers<[1], [0], [0], [1], [0, 0, 1, 1], [], []>} : vector<256x128xf32>, vector<128x128xf32>, vector<256x128xf32> -> vector<256x128xf32>
    %115 = arith.addf %109, %114 : vector<256x128xf32>
    %c2_123 = arith.constant 2 : index
    %c1_124 = arith.constant 1 : index
    %c0_125 = arith.constant 0 : index
    %116 = vector.load %arg8[%c2_123, %c1_124, %c0_125] : memref<18x18x128xf32, #tpu.memory_space<vmem>>, vector<16x16x128xf32>
    %117 = vector.shape_cast %116 : vector<16x16x128xf32> to vector<256x128xf32>
    %c7_126 = arith.constant 7 : index
    %c0_127 = arith.constant 0 : index
    %c0_128 = arith.constant 0 : index
    %118 = vector.load %arg5[%c7_126, %c0_127, %c0_128] : memref<9x128x128xf32, #tpu.memory_space<vmem>>, vector<1x128x128xf32>
    %119 = vector.shape_cast %118 : vector<1x128x128xf32> to vector<128x128xf32>
    %cst_129 = arith.constant dense<0.000000e+00> : vector<256x128xf32>
    %120 = tpu.matmul %117, %119, %cst_129 {dimension_numbers = #tpu.dot_dimension_numbers<[1], [0], [0], [1], [0, 0, 1, 1], [], []>} : vector<256x128xf32>, vector<128x128xf32>, vector<256x128xf32> -> vector<256x128xf32>
    %121 = arith.addf %115, %120 : vector<256x128xf32>
    %c2_130 = arith.constant 2 : index
    %c2_131 = arith.constant 2 : index
    %c0_132 = arith.constant 0 : index
    %122 = vector.load %arg8[%c2_130, %c2_131, %c0_132] : memref<18x18x128xf32, #tpu.memory_space<vmem>>, vector<16x16x128xf32>
    %123 = vector.shape_cast %122 : vector<16x16x128xf32> to vector<256x128xf32>
    %c8_133 = arith.constant 8 : index
    %c0_134 = arith.constant 0 : index
    %c0_135 = arith.constant 0 : index
    %124 = vector.load %arg5[%c8_133, %c0_134, %c0_135] : memref<9x128x128xf32, #tpu.memory_space<vmem>>, vector<1x128x128xf32>
    %125 = vector.shape_cast %124 : vector<1x128x128xf32> to vector<128x128xf32>
    %cst_136 = arith.constant dense<0.000000e+00> : vector<256x128xf32>
    %126 = tpu.matmul %123, %125, %cst_136 {dimension_numbers = #tpu.dot_dimension_numbers<[1], [0], [0], [1], [0, 0, 1, 1], [], []>} : vector<256x128xf32>, vector<128x128xf32>, vector<256x128xf32> -> vector<256x128xf32>
    %127 = arith.addf %121, %126 : vector<256x128xf32>
    %c0_137 = arith.constant 0 : index
    %c0_138 = arith.constant 0 : index
    %128 = vector.load %arg6[%c0_137, %c0_138] : memref<1x128xf32, #tpu.memory_space<vmem>>, vector<1x128xf32>
    %129 = vector.broadcast %128 : vector<1x128xf32> to vector<256x128xf32>
    %130 = arith.addf %127, %129 : vector<256x128xf32>
    %c0_139 = arith.constant 0 : index
    %c0_140 = arith.constant 0 : index
    %c0_141 = arith.constant 0 : index
    %131 = vector.load %arg2[%c0_139, %c0_140, %c0_141] : memref<1x256x128xf32, #tpu.memory_space<vmem>>, vector<1x256x128xf32>
    %132 = vector.shape_cast %131 : vector<1x256x128xf32> to vector<256x128xf32>
    %133 = arith.addf %130, %132 : vector<256x128xf32>
    %cst_142 = arith.constant 0.000000e+00 : f32
    %134 = vector.broadcast %cst_142 : f32 to vector<256x128xf32>
    %135 = arith.maximumf %133, %134 : vector<256x128xf32>
    %c0_143 = arith.constant 0 : index
    %c0_144 = arith.constant 0 : index
    %c0_145 = arith.constant 0 : index
    %136 = vector.load %arg7[%c0_143, %c0_144, %c0_145] : memref<1x256x128xf32, #tpu.memory_space<vmem>>, vector<1x256x128xf32>
    %137 = vector.shape_cast %136 : vector<1x256x128xf32> to vector<256x128xf32>
    %138 = vector.shape_cast %135 : vector<256x128xf32> to vector<1x256x128xf32>
    tpu.vector_store %arg7[%c0_143, %c0_144, %c0_145], %138 {strides = array<i32>} : memref<1x256x128xf32, #tpu.memory_space<vmem>>, vector<1x256x128xf32>,
    return
  }
  func.func @transform_0(%arg0: i32) -> (i32, i32, i32, i32) {
    %c0_i32 = arith.constant 0 : i32
    %c0_i32_0 = arith.constant 0 : i32
    %c0_i32_1 = arith.constant 0 : i32
    %c0_i32_2 = arith.constant 0 : i32
    return %arg0, %c0_i32, %c0_i32_0, %c0_i32_1 : i32, i32, i32, i32
  }
  func.func @transform_1(%arg0: i32) -> (i32, i32, i32) {
    %c0_i32 = arith.constant 0 : i32
    %c0_i32_0 = arith.constant 0 : i32
    %c0_i32_1 = arith.constant 0 : i32
    return %arg0, %c0_i32, %c0_i32_0 : i32, i32, i32
  }
  func.func @transform_2(%arg0: i32) -> (i32, i32, i32) {
    %c0_i32 = arith.constant 0 : i32
    %c0_i32_0 = arith.constant 0 : i32
    %c0_i32_1 = arith.constant 0 : i32
    %c0_i32_2 = arith.constant 0 : i32
    return %c0_i32, %c0_i32_0, %c0_i32_1 : i32, i32, i32
  }
  func.func @transform_3(%arg0: i32) -> (i32, i32) {
    %c0_i32 = arith.constant 0 : i32
    %c0_i32_0 = arith.constant 0 : i32
    %c0_i32_1 = arith.constant 0 : i32
    return %c0_i32, %c0_i32_0 : i32, i32
  }
  func.func @transform_4(%arg0: i32) -> (i32, i32, i32) {
    %c0_i32 = arith.constant 0 : i32
    %c0_i32_0 = arith.constant 0 : i32
    %c0_i32_1 = arith.constant 0 : i32
    %c0_i32_2 = arith.constant 0 : i32
    return %c0_i32, %c0_i32_0, %c0_i32_1 : i32, i32, i32
  }
  func.func @transform_5(%arg0: i32) -> (i32, i32) {
    %c0_i32 = arith.constant 0 : i32
    %c0_i32_0 = arith.constant 0 : i32
    %c0_i32_1 = arith.constant 0 : i32
    return %c0_i32, %c0_i32_0 : i32, i32
  }
  func.func @transform_6(%arg0: i32) -> (i32, i32, i32) {
    %c0_i32 = arith.constant 0 : i32
    %c0_i32_0 = arith.constant 0 : i32
    %c0_i32_1 = arith.constant 0 : i32
    return %arg0, %c0_i32, %c0_i32_0 : i32, i32, i32
  }
}

</mosaic_0001>

<bundles_post_ra>
// kernel: tpu_custom_call.1
= control target key start
LH: loop header
LB: loop body
LE: loop exit
PB: predicated region body
PF: predicated region fallthrough
CT: control target
= control target key end

     0   :  { %11 = vsyncpa [#allocation4], 0  ;;  %s11948_s0 = inlined_call_operand.vmem [shape: f32[2,18,18,128], index: 0, kind: input, shape index: {}]   ;;  %s11949_s1 = inlined_call_operand.hbm [shape: f32[2,256,128], index: 1, kind: input, shape index: {}]   ;;  %s11950_s2 = inlined_call_operand.vmem [shape: f32[9,128,128], index: 2, kind: input, shape index: {}]   ;;  %s11951_s3 = inlined_call_operand.vmem [shape: f32[1,128], index: 3, kind: input, shape index: {}]   ;;  %s11952_s4 = inlined_call_operand.hbm [shape: f32[9,128,128], index: 4, kind: input, shape index: {}]   ;;  %s11953_s5 = inlined_call_operand.vmem [shape: f32[1,128], index: 5, kind: input, shape index: {}]   ;;  %s11954_s6 = inlined_call_operand.hbm [shape: f32[2,256,128], index: 6, kind: output, shape index: {}]  }
   0x1   :  { %13 = vsyncpa [#allocation4 + $0x1], 0 }
   0x2   :  { %14 = vsyncpa [#allocation7], 0 }
   0x3   :  { %15 = vsyncpa [#allocation5], 0 }
   0x4   :  { %17 = vsyncpa [#allocation5 + $0x1], 0  ;;  %s10090_s21 = smov 0   ;;  %s10092_s22 = smov 0  }
   0x5   :  { %s10094_s23 = smov 0   ;;  %s10096_s24 = smov 0  }
   0x6 LB: > { %s10111_s25 = sadd.s32 4294967295, %s10045_s24   ;;  %s6120_s26 = sadd.s32 4294967294, %s10045_s24   ;;  %s10045_s24 = sphi %s10096_s24, %s12185_s24   ;;  %s10041_s23 = sphi %s10094_s23, %s12184_s23   ;;  %s10037_s22 = sphi %s10092_s22, %s12183_s22   ;;  %s10033_s21 = sphi %s10090_s21, %s12182_s21  }
   0x7   : > { %p69_p0 = scmp.ne.s32.totalorder %s10037_s22, %s10033_s21  ;;  %p11955_p1 = scmp.eq.s32.totalorder %s10111_s25, 0 }
   0x8   : > { %p183_p3 = scmp.eq.s32.totalorder %s6120_s26, 1  ;;  %p6121_p5 = scmp.ge.s32.totalorder %s10045_s24, 1 }
   0x9   : > { %p10120_p4 = por %p11955_p1, %p69_p0  ;;  %p190_p7 = scmp.lt.s32.totalorder %s10045_s24, 3 }
   0xa   : > { %p10125_p6 = por %p183_p3, %p69_p0  ;;  %s10047_s30 = smov [#allocation6]  }
   0xb   : > { %s12029_s27 = scalar_select %p10120_p4, 1, 0 }
   0xc   : > { %s12030_s28 = scalar_select %p10125_p6, 1, 0 }
   0xd   : > { %p10130_p8 = pnand %p6121_p5, %p190_p7  ;;  %s208_s7 = sshll.u32 %s10047_s30, 4  ;;  %s10134_s7 = int_to_ptr.vmem [resolvable:$true] %s208_s7 }
   0xe   : > { %s10146_s9 = sadd.s32 1, %s10045_s24   ;;  %s56_s10 = sadd.s32 1, %s10041_s23 }
   0xf   : > { %s12031_s29 = scalar_select %p10130_p8, 1, 0 }
  0x10   : > { %p9862_p9 = pneg %p10130_p8  ;;  %s53_s11 = ssub.s32 %s10045_s24, %s10146_s9 }
  0x11   : > { %s9917_s14 = scalar_lea.hbm %s11952_s4, 18432 }
  0x12   : > { %p10141_p11 = pnand %p9862_p9, %p11955_p1  ;;  %p9918_p12 = scmp.ne.s32.totalorder %s11952_s4, %s9917_s14 }
  0x13   : > { %p9924_p5 = scmp.lt.u32.totalorder %s9917_s14, %s11952_s4 }
  0x14   : > { %p9919_p13 = pneg %p10141_p11 }
  0x16   : > { %p9920_p0 = pnand %p9919_p13, %p9918_p12 }
  0x18   : > { %p9921_p3 = pneg %p9920_p0 }
  0x1a   : > { %p9926_p7 = pnand %p9924_p5, %p9921_p3 }
  0x1c   : > { %9929 = shalt.err (!%p9926_p7)
}
  0x1d   : > { %s9930_s19 = scalar_lea.vmem %s10134_s7, 18432  ;;  %p9938_p2 = scmp.lt.s32.totalorder %s10134_s7, %s10134_s7 }
  0x1e   : > { %p9931_p9 = scmp.ne.s32.totalorder %s10134_s7, %s9930_s19  ;;  %p9939_p6 = scmp.lt.s32.totalorder %s9930_s19, %s9930_s19 }
  0x20   : > { %p9933_p10 = pnand %p9931_p9, %p9919_p13  ;;  %p9940_p4 = por %p9939_p6, %p9938_p2 }
  0x22   : > { %p9934_p1 = pneg %p9933_p10 }
  0x24   : > { %p9941_p8 = pnand %p9940_p4, %p9934_p1 }
  0x26   : > { %9944 = shalt.err (!%p9941_p8)
}
  0x27   : > { %s10048_s20 = smov 128   ;;  %s10049_s26 = smov 8  }
  0x28   : > { %9865 = dma.hbm_to_vmem [thread:$0]  (!%p10141_p11), %s11952_s4, 18432, %s10134_s7, [#allocation7], %s10048_s20, %s10048_s20, %s10049_s26  }
  0x29   : > { %p54_p1 = scmp.eq.s32.totalorder %s53_s11, 0  ;;  %p63_p2 = scmp.ne.s32.totalorder %s10041_s23, %s10037_s22 }
  0x2a   : > { %p64_p4 = scmp.eq.s32.totalorder %s10045_s24, 0  ;;  %p9875_p6 = scmp.lt.s32.totalorder %s10045_s24, 2 }
  0x2b   : > { %s10180_s13 = scalar_select %p54_p1, %s10041_s23, %s56_s10  }
  0x2c   : > { %p65_p8 = por %p64_p4, %p63_p2  ;;  %p12033_p10 = scmp.eq.s32.totalorder %s10111_s25, 1 }
  0x2d   : > { %s233_s8 = sand.u32 1, %s10041_s23   ;;  %s6459_s15 = sshll.u32 %s10045_s24, 12 }
  0x2e   : > { %p10184_p12 = por %p12033_p10, %p63_p2  ;;  %s6124_s16 = sshll.u32 %s233_s8, 8 }
  0x2f   : > { %s10193_s19 = scalar_lea.hbm %s11949_s1, %s6459_s15  ;;  %s237_s7 = scalar_lea.vmem [#allocation3], %s6124_s16 }
  0x30   : > { %s244_s10 = sshll.u32 %s237_s7, 4  ;;  %p10195_p11 = pnand %p9875_p6, %p65_p8  ;;  %s10199_s10 = int_to_ptr.vmem [resolvable:$true] %s244_s10 }
  0x31   : > { %s10201_s30 = scalar_lea.sflag [#allocation4], %s233_s8  ;;  %s9945_s12 = scalar_lea.hbm %s10193_s19, 4096 }
  0x32   : > { %p9946_p13 = scmp.ne.s32.totalorder %s10193_s19, %s9945_s12  ;;  %p9947_p0 = pneg %p10195_p11 }
  0x33   : > { %s9950_s17 = scalar_lea.hbm %s11949_s1, 8192  ;;  %p9951_p7 = scmp.lt.u32.totalorder %s10193_s19, %s11949_s1 }
  0x34   : > { %p9948_p3 = pnand %p9947_p0, %p9946_p13  ;;  %p9952_p9 = scmp.lt.u32.totalorder %s9950_s17, %s9945_s12 }
  0x35   : > { %p9954_p2 = scmp.lt.u32.totalorder %s9945_s12, %s10193_s19 }
  0x36   : > { %p9949_p5 = pneg %p9948_p3  ;;  %p9953_p1 = por %p9952_p9, %p9951_p7 }
  0x38   : > { %p9955_p4 = por %p9954_p2, %p9953_p1 }
  0x3a   : > { %p9956_p6 = pnand %p9955_p4, %p9949_p5 }
  0x3c   : > { %9959 = shalt.err (!%p9956_p6)
}
  0x3d   : > { %s9960_s8 = scalar_lea.vmem %s10199_s10, 4096  ;;  %s10050_s15 = smov [#allocation3]  }
  0x3e   : > { %p9961_p8 = scmp.ne.s32.totalorder %s10199_s10, %s9960_s8  ;;  %s9965_s16 = sshll.u32 %s10050_s15, 4  ;;  %s9966_s16 = int_to_ptr.vmem [resolvable:$false] %s9965_s16 }
  0x3f   : > { %s9967_s18 = scalar_lea.vmem %s9966_s16, 8192  ;;  %p9968_p3 = scmp.lt.s32.totalorder %s10199_s10, %s9966_s16 }
  0x40   : > { %p9963_p10 = pnand %p9961_p8, %p9947_p0  ;;  %p9969_p7 = scmp.lt.s32.totalorder %s9967_s18, %s9960_s8 }
  0x42   : > { %p9964_p13 = pneg %p9963_p10  ;;  %p9970_p9 = por %p9969_p7, %p9968_p3 }
  0x44   : > { %p9971_p1 = pnand %p9970_p9, %p9964_p13 }
  0x46   : > { %9974 = shalt.err (!%p9971_p1)
}
  0x47   : > { %9869 = dma.hbm_to_vmem [thread:$0]  (!%p10195_p11), %s10193_s19, 4096, %s10199_s10, %s10201_s30, %s10048_s20, %s10048_s20, %s10049_s26  }
  0x48   : > { %p12036_p0 = scmp.ne.s32.totalorder %s12031_s29, 0 }
  0x4a   : > { %256 = sbr.rel (%p12036_p0) target bundleno = 1655 (0x677), region = 44 }
  0x51   : > { %s10235_s12 = sand.u32 1, %s10037_s22   ;;  %p12037_p5 = scmp.ne.s32.totalorder %s12029_s27, 0 }
  0x52   : > { %s6128_s17 = sshll.u32 %s10235_s12, 8  ;;  %s259_s7 = scalar_lea.sflag [#allocation4], %s10235_s12 }
  0x53   : > { %s10241_s11 = scalar_lea.vmem [#allocation3], %s6128_s17 }
  0x54   : > { %10020 = dma.done.wait (%p12037_p5), %s259_s7, 4096  }
  0x55   : > { %10022 = vsyncadd (%p12037_p5), %s259_s7, 4294963200  ;;  %p12038_p11 = scmp.eq.s32.totalorder %s10111_s25, 0 }
  0x57   : > { %10024 = dma.done.wait (%p12038_p11), [#allocation7], 18432   ;;  %p12039_p2 = pmov %p12038_p11 }
  0x58   : > { %p300_p4 = scmp.lt.s32.totalorder %s10111_s25, 1  ;;  %v6132_v0 = vld [vmem:[%s11950_s2 + $0x80] sm:$0xff]  ;;  %v6133_v1 = vld [vmem:[%s11950_s2 + $0x88] sm:$0xff]  ;;  %v6134_v2 = vld [vmem:[%s11950_s2 + $0x90] sm:$0xff]  ;;  %s10052_s19 = smov [#allocation8]  }
  0x59   : > { %10026 = vsyncadd (%p12039_p2), [#allocation7], 4294948864  ;;  %v8765_v3 = vpack.c.bf16 %v6133_v1, %v6132_v0  ;;  %v6135_v4 = vld [vmem:[%s11950_s2 + $0x98] sm:$0xff]  ;;  %v6136_v6 = vld [vmem:[%s11950_s2 + $0xa0] sm:$0xff]  ;;  %s9979_s10 = sshll.u32 %s10052_s19, 4  ;;  %s9980_s10 = int_to_ptr.vmem [resolvable:$false] %s9979_s10 }
  0x5a   : > { %s301_s29 = scalar_select %p300_p4, %s10111_s25, 1  ;;  %v8769_v5 = vpack.c.bf16 %v6135_v4, %v6134_v2  ;;  %v6137_v7 = vld [vmem:[%s11950_s2 + $0xa8] sm:$0xff]  ;;  %v6138_v10 = vld [vmem:[%s11950_s2 + $0xb0] sm:$0xff]  ;;  %v6139_v11 = vld [vmem:[%s11950_s2 + $0xb8] sm:$0xff] }
  0x5b   : > { %8766 = vmatprep.subr.bf16.mxu0 %v8765_v3  ;;  %v8773_v8 = vpack.c.bf16 %v6137_v7, %v6136_v6  ;;  %v8777_v12 = vpack.c.bf16 %v6139_v11, %v6138_v10  ;;  %v6140_v13 = vld [vmem:[%s11950_s2 + $0xc0] sm:$0xff]  ;;  %v6141_v14 = vld [vmem:[%s11950_s2 + $0xc8] sm:$0xff]  ;;  %v6142_v16 = vld [vmem:[%s11950_s2 + $0xd0] sm:$0xff]  ;;  %s9981_s27 = scalar_lea.vmem %s9980_s10, 8192 }
  0x5c   : > { %s9853_s20 = smul.u32 432, %s301_s29  ;;  %8768 = vmatpush3.bf16.msra.mxu0 %v8765_v3  ;;  %v8781_v15 = vpack.c.bf16 %v6141_v14, %v6140_v13  ;;  %v6143_v17 = vld [vmem:[%s11950_s2 + $0xd8] sm:$0xff]  ;;  %v6144_v19 = vld [vmem:[%s11950_s2 + $0xe0] sm:$0xff]  ;;  %v6145_v20 = vld [vmem:[%s11950_s2 + $0xe8] sm:$0xff] }
  0x5d   : > { %8770 = vmatprep.subr.bf16.mxu0 %v8769_v5  ;;  %v8785_v18 = vpack.c.bf16 %v6143_v17, %v6142_v16  ;;  %v8789_v21 = vpack.c.bf16 %v6145_v20, %v6144_v19  ;;  %v6146_v22 = vld [vmem:[%s11950_s2 + $0xf0] sm:$0xff]  ;;  %v6147_v23 = vld [vmem:[%s11950_s2 + $0xf8] sm:$0xff]  ;;  %v337_v25 = vld [vmem:[%s11950_s2] sm:$0xff] }
  0x5e   : > { %s10274_s30 = scalar_lea.vmem %s11948_s0, %s9853_s20  ;;  %v8793_v24 = vpack.c.bf16 %v6147_v23, %v6146_v22  ;;  %v338_v26 = vld [vmem:[%s11950_s2 + $0x8] sm:$0xff]  ;;  %v339_v28 = vld [vmem:[%s11950_s2 + $0x10] sm:$0xff]  ;;  %v340_v29 = vld [vmem:[%s11950_s2 + $0x18] sm:$0xff]  ;;  %s11807_s20 = scalar_lea.vmem [#allocation8], %s6128_s17 }
  0x5f   : > { %v353_v9 = vld [vmem:[%s10274_s30 + $0x1] sm:$0xff]  ;;  %v8797_v27 = vpack.c.bf16 %v338_v26, %v337_v25  ;;  %v354_v30 = vld [vmem:[%s10274_s30 + $0x9] sm:$0xff]  ;;  %v10321_v31 = vld [vmem:[%s10274_s30 + $0x19] sm:$0xff]  ;;  %v8801_v32 = vpack.c.bf16 %v340_v29, %v339_v28  ;;  %s6460_s17 = sshll.u32 %s10111_s25, 12  ;;  %s6025_s18 = sshll.u32 %s11807_s20, 4  ;;  %s11902_s18 = int_to_ptr.vmem [resolvable:$true] %s6025_s18 }
  0x60   : > { %7357 = vmatprep.mubr.f32.mxu0 %v353_v9  ;;  %8772 = vmatpush3.bf16.msra.mxu0 %v8769_v5  ;;  %v341_v33 = vld [vmem:[%s11950_s2 + $0x20] sm:$0xff]  ;;  %v342_v34 = vld [vmem:[%s11950_s2 + $0x28] sm:$0xff]  ;;  %v10334_v36 = vld [vmem:[%s10274_s30 + $0x31] sm:$0xff]  ;;  %s11900_s26 = scalar_lea.hbm %s11954_s6, %s6460_s17  ;;  %s6012_s25 = scalar_lea.sflag [#allocation5], %s10235_s12 }
  0x61   : > { %8774 = vmatprep.subr.bf16.mxu0 %v8773_v8  ;;  %v10331_v35 = vld [vmem:[%s10274_s30 + $0x21] sm:$0xff]  ;;  %v8805_v37 = vpack.c.bf16 %v342_v34, %v341_v33  ;;  %v343_v38 = vld [vmem:[%s11950_s2 + $0x30] sm:$0xff]  ;;  %v344_v39 = vld [vmem:[%s11950_s2 + $0x38] sm:$0xff]  ;;  %p9982_p13 = scmp.lt.s32.totalorder %s11902_s18, %s9980_s10 }
  0x62   : > { %v10345_v40 = vld [vmem:[%s10274_s30 + $0x39] sm:$0xff]  ;;  %v10348_v41 = vld [vmem:[%s10274_s30 + $0x49] sm:$0xff]  ;;  %v8809_v42 = vpack.c.bf16 %v344_v39, %v343_v38  ;;  %v10359_v45 = vld [vmem:[%s10274_s30 + $0x51] sm:$0xff] }
  0x63   : > { %v345_v43 = vld [vmem:[%s11950_s2 + $0x40] sm:$0xff]  ;;  %v346_v44 = vld [vmem:[%s11950_s2 + $0x48] sm:$0xff]  ;;  %v347_v48 = vld [vmem:[%s11950_s2 + $0x50] sm:$0xff] }
  0x64   : > { %8776 = vmatpush3.bf16.msra.mxu0 %v8773_v8  ;;  %v10362_v46 = vld [vmem:[%s10274_s30 + $0x61] sm:$0xff]  ;;  %v8813_v47 = vpack.c.bf16 %v346_v44, %v345_v43  ;;  %v348_v49 = vld [vmem:[%s11950_s2 + $0x58] sm:$0xff]  ;;  %v10373_v50 = vld [vmem:[%s10274_s30 + $0x69] sm:$0xff] }
  0x65   : > { %8778 = vmatprep.subr.bf16.mxu0 %v8777_v12  ;;  %v10376_v51 = vld [vmem:[%s10274_s30 + $0x79] sm:$0xff]  ;;  %v8817_v52 = vpack.c.bf16 %v348_v49, %v347_v48  ;;  %v350_v54 = vld [vmem:[%s11950_s2 + $0x68] sm:$0xff]  ;;  %v10390_v56 = vld [vmem:[%s10274_s30 + $0x91] sm:$0xff] }
  0x66   : > { %v349_v53 = vld [vmem:[%s11950_s2 + $0x60] sm:$0xff]  ;;  %v351_v58 = vld [vmem:[%s11950_s2 + $0x70] sm:$0xff]  ;;  %v352_v59 = vld [vmem:[%s11950_s2 + $0x78] sm:$0xff] }
  0x67   : > { %v10387_v55 = vld [vmem:[%s10274_s30 + $0x81] sm:$0xff]  ;;  %v8821_v57 = vpack.c.bf16 %v350_v54, %v349_v53  ;;  %v10401_v60 = vld [vmem:[%s10274_s30 + $0x99] sm:$0xff]  ;;  %v10404_v61 = vld [vmem:[%s10274_s30 + $0xa9] sm:$0xff]  ;;  %v8825_v62 = vpack.c.bf16 %v352_v59, %v351_v58 }
  0x68   : > { %8780 = vmatpush3.bf16.msra.mxu0 %v8777_v12  ;;  %v6148_v63 = vld [vmem:[%s11950_s2 + $0x100] sm:$0xff]  ;;  %v6149_v0 = vld [vmem:[%s11950_s2 + $0x108] sm:$0xff]  ;;  %v10415_v1 = vld [vmem:[%s10274_s30 + $0xb1] sm:$0xff] }
  0x69   : > { %8782 = vmatprep.subr.bf16.mxu0 %v8781_v15  ;;  %v10418_v2 = vld [vmem:[%s10274_s30 + $0xc1] sm:$0xff]  ;;  %v8829_v3 = vpack.c.bf16 %v6149_v0, %v6148_v63  ;;  %v10423_v4 = vld [vmem:[%s10274_s30 + $0xc9] sm:$0xff]  ;;  %v10426_v5 = vld [vmem:[%s10274_s30 + $0xd9] sm:$0xff] }
  0x6a   : > { %v10431_v6 = vld [vmem:[%s10274_s30 + $0xe1] sm:$0xff]  ;;  %v10434_v7 = vld [vmem:[%s10274_s30 + $0xf1] sm:$0xff]  ;;  %v10439_v8 = vld [vmem:[%s10274_s30 + $0xf9] sm:$0xff] }
  0x6b   : > { %v10442_v9 = vld [vmem:[%s10274_s30 + $0x109] sm:$0xff]  ;;  %v10447_v10 = vld [vmem:[%s10274_s30 + $0x111] sm:$0xff]  ;;  %v10450_v11 = vld [vmem:[%s10274_s30 + $0x121] sm:$0xff] }
  0x6c   : > { %8784 = vmatpush3.bf16.msra.mxu0 %v8781_v15  ;;  %v10455_v12 = vld [vmem:[%s10274_s30 + $0x129] sm:$0xff]  ;;  %v10458_v13 = vld [vmem:[%s10274_s30 + $0x139] sm:$0xff]  ;;  %v10463_v14 = vld [vmem:[%s10274_s30 + $0x141] sm:$0xff] }
  0x6d   : > { %8786 = vmatprep.subr.bf16.mxu0 %v8785_v18  ;;  %12040 = vst [vmem:[#allocation12_spill] sm:$0xff] %v10455_v12  ;;  %12041 = vst [vmem:[#allocation13_spill] sm:$0xff] %v10458_v13  ;;  %v10466_v15 = vld [vmem:[%s10274_s30 + $0x151] sm:$0xff]  ;;  %v10471_v16 = vld [vmem:[%s10274_s30 + $0x159] sm:$0xff] }
  0x6e   : > { %12042 = vst [vmem:[#allocation14_spill] sm:$0xff] %v10463_v14  ;;  %12043 = vst [vmem:[#allocation15_spill] sm:$0xff] %v10466_v15  ;;  %v10474_v17 = vld [vmem:[%s10274_s30 + $0x169] sm:$0xff]  ;;  %v305_v19 = vld [vmem:[%s10274_s30] sm:$0xff] }
  0x6f   : > { %12044 = vst [vmem:[#allocation16_spill] sm:$0xff] %v10471_v16  ;;  %12045 = vst [vmem:[#allocation17_spill] sm:$0xff] %v10474_v17  ;;  %v6150_v20 = vld [vmem:[%s11950_s2 + $0x110] sm:$0xff]  ;;  %v306_v22 = vld [vmem:[%s10274_s30 + $0x8] sm:$0xff] }
  0x70   : > { %8788 = vmatpush3.bf16.msra.mxu0 %v8785_v18  ;;  %v10479_v18 = vld [vmem:[%s10274_s30 + $0x171] sm:$0xff]  ;;  %v6152_v25 = vld [vmem:[%s11950_s2 + $0x120] sm:$0xff]  ;;  %v6153_v26 = vld [vmem:[%s11950_s2 + $0x128] sm:$0xff] }
  0x71   : > { %8790 = vmatprep.subr.bf16.mxu0 %v8789_v21  ;;  %12046 = vst [vmem:[#allocation18_spill] sm:$0xff] %v10479_v18  ;;  %v10491_v23 = vld [vmem:[%s10274_s30 + $0x18] sm:$0xff]  ;;  %v10504_v28 = vld [vmem:[%s10274_s30 + $0x30] sm:$0xff]  ;;  %v8837_v29 = vpack.c.bf16 %v6153_v26, %v6152_v25  ;;  %v10518_v34 = vld [vmem:[%s10274_s30 + $0x48] sm:$0xff] }
  0x72   : > { %v10515_v33 = vld [vmem:[%s10274_s30 + $0x38] sm:$0xff]  ;;  %v6156_v38 = vld [vmem:[%s11950_s2 + $0x140] sm:$0xff]  ;;  %v6157_v39 = vld [vmem:[%s11950_s2 + $0x148] sm:$0xff] }
  0x73   : > { %v10532_v43 = vld [vmem:[%s10274_s30 + $0x60] sm:$0xff]  ;;  %v8845_v44 = vpack.c.bf16 %v6157_v39, %v6156_v38  ;;  %v6159_v48 = vld [vmem:[%s11950_s2 + $0x158] sm:$0xff]  ;;  %v10543_v49 = vld [vmem:[%s10274_s30 + $0x68] sm:$0xff] }
  0x74   : > { %8792 = vmatpush3.bf16.msra.mxu0 %v8789_v21  ;;  %v6151_v21 = vld [vmem:[%s11950_s2 + $0x118] sm:$0xff]  ;;  %v6160_v54 = vld [vmem:[%s11950_s2 + $0x160] sm:$0xff]  ;;  %v10560_v59 = vld [vmem:[%s10274_s30 + $0x90] sm:$0xff] }
  0x75   : > { %8794 = vmatprep.subr.bf16.mxu0 %v8793_v24  ;;  %v10557_v58 = vld [vmem:[%s10274_s30 + $0x80] sm:$0xff]  ;;  %v6162_v63 = vld [vmem:[%s11950_s2 + $0x170] sm:$0xff]  ;;  %v6163_v0 = vld [vmem:[%s11950_s2 + $0x178] sm:$0xff] }
  0x76   : > { %v10588_v25 = vld [vmem:[%s10274_s30 + $0xc0] sm:$0xff]  ;;  %v10609_v38 = vld [vmem:[%s10274_s30 + $0xf8] sm:$0xff]  ;;  %v10612_v39 = vld [vmem:[%s10274_s30 + $0x108] sm:$0xff] }
  0x78   : > { %8796 = vmatpush3.bf16.msra.mxu0 %v8793_v24  ;;  %v8833_v24 = vpack.c.bf16 %v6151_v21, %v6150_v20  ;;  %v8857_v20 = vpack.c.bf16 %v6163_v0, %v6162_v63  ;;  %v6196_v21 = vld [vmem:[%s11950_s2 + $0x180] sm:$0xff]  ;;  %v10644_v63 = vld [vmem:[%s10274_s30 + $0x168] sm:$0xff]  ;;  %v10649_v0 = vld [vmem:[%s10274_s30 + $0x170] sm:$0xff] }
  0x79   : > { %8798 = vmatprep.subr.bf16.mxu0 %v8797_v27 }
  0x7b   : > { %7358 = vmatmul.mubr.f32.vlgmr.msra.gmra.mrb[0].mxu0 %v354_v30  ;;  %v6154_v30 = vld [vmem:[%s11950_s2 + $0x130] sm:$0xff] }
  0x7c   : > { %8800 = vmatpush3.bf16.msra.mxu0 %v8797_v27  ;;  %7360 = vmatprep.mubr.f32.mxu0 %v10321_v31  ;;  %v10501_v27 = vld [vmem:[%s10274_s30 + $0x20] sm:$0xff] }
  0x7d   : > { %8802 = vmatprep.subr.bf16.mxu0 %v8801_v32 }
  0x7f   : > { %7361 = vmatmul.mubr.f32.gmra.mrb[2].mxu0 %v10331_v35 }
  0x80   : > { %7363 = vmatprep.mubr.f32.mxu0 %v10334_v36  ;;  %8804 = vmatpush3.bf16.msra.mxu0 %v8801_v32  ;;  %v6155_v32 = vld [vmem:[%s11950_s2 + $0x138] sm:$0xff] }
  0x81   : > { %8806 = vmatprep.subr.bf16.mxu0 %v8805_v37 }
  0x83   : > { %7364 = vmatmul.mubr.f32.gmra.mrb[4].mxu0 %v10345_v40 }
  0x84   : > { %7366 = vmatprep.mubr.f32.mxu0 %v10348_v41  ;;  %8808 = vmatpush3.bf16.msra.mxu0 %v8805_v37  ;;  %v8841_v37 = vpack.c.bf16 %v6155_v32, %v6154_v30  ;;  %v10596_v30 = vld [vmem:[%s10274_s30 + $0xd8] sm:$0xff]  ;;  %v10601_v32 = vld [vmem:[%s10274_s30 + $0xe0] sm:$0xff] }
  0x85   : > { %8810 = vmatprep.subr.bf16.mxu0 %v8809_v42 }
  0x87   : > { %7367 = vmatmul.mubr.f32.gmra.mrb[6].mxu0 %v10359_v45 }
  0x88   : > { %7369 = vmatprep.mubr.f32.mxu0 %v10362_v46  ;;  %8812 = vmatpush3.bf16.msra.mxu0 %v8809_v42  ;;  %v10529_v42 = vld [vmem:[%s10274_s30 + $0x50] sm:$0xff] }
  0x89   : > { %8814 = vmatprep.subr.bf16.mxu0 %v8813_v47 }
  0x8b   : > { %7370 = vmatmul.mubr.f32.gmra.mrb[8].mxu0 %v10373_v50 }
  0x8c   : > { %7372 = vmatprep.mubr.f32.mxu0 %v10376_v51  ;;  %8816 = vmatpush3.bf16.msra.mxu0 %v8813_v47  ;;  %v6158_v47 = vld [vmem:[%s11950_s2 + $0x150] sm:$0xff] }
  0x8d   : > { %8818 = vmatprep.subr.bf16.mxu0 %v8817_v52  ;;  %v8849_v53 = vpack.c.bf16 %v6159_v48, %v6158_v47  ;;  %v10620_v47 = vld [vmem:[%s10274_s30 + $0x120] sm:$0xff]  ;;  %v10625_v48 = vld [vmem:[%s10274_s30 + $0x128] sm:$0xff] }
  0x8f   : > { %7373 = vmatmul.mubr.f32.gmra.mrb[10].mxu0 %v10387_v55 }
  0x90   : > { %7375 = vmatprep.mubr.f32.mxu0 %v10390_v56  ;;  %8820 = vmatpush3.bf16.msra.mxu0 %v8817_v52  ;;  %v10546_v52 = vld [vmem:[%s10274_s30 + $0x78] sm:$0xff] }
  0x91   : > { %8822 = vmatprep.subr.bf16.mxu0 %v8821_v57 }
  0x93   : > { %7376 = vmatmul.mubr.f32.gmra.mrb[12].mxu0 %v10401_v60 }
  0x94   : > { %7378 = vmatprep.mubr.f32.mxu0 %v10404_v61  ;;  %8824 = vmatpush3.bf16.msra.mxu0 %v8821_v57  ;;  %v6161_v57 = vld [vmem:[%s11950_s2 + $0x168] sm:$0xff] }
  0x95   : > { %8826 = vmatprep.subr.bf16.mxu0 %v8825_v62 }
  0x97   : > { %7379 = vmatmul.mubr.f32.gmra.mrb[14].mxu0 %v10415_v1 }
  0x98   : > { %7381 = vmatprep.mubr.f32.mxu0 %v10418_v2  ;;  %8828 = vmatpush3.bf16.msra.mxu0 %v8825_v62  ;;  %v8853_v62 = vpack.c.bf16 %v6161_v57, %v6160_v54  ;;  %v10633_v54 = vld [vmem:[%s10274_s30 + $0x140] sm:$0xff]  ;;  %v10636_v57 = vld [vmem:[%s10274_s30 + $0x150] sm:$0xff] }
  0x99   : > { %8830 = vmatprep.subr.bf16.mxu0 %v8829_v3 }
  0x9b   : > { %7382 = vmatmul.mubr.f32.gmra.mrb[16].mxu0 %v10423_v4 }
  0x9c   : > { %7384 = vmatprep.mubr.f32.mxu0 %v10426_v5 }
  0x9f   : > { %7385 = vmatmul.mubr.f32.gmra.mrb[18].mxu0 %v10431_v6 }
  0xa0   : > { %7387 = vmatprep.mubr.f32.mxu0 %v10434_v7 }
  0xa3   : > { %7388 = vmatmul.mubr.f32.gmra.mrb[20].mxu0 %v10439_v8 }
  0xa4   : > { %7390 = vmatprep.mubr.f32.mxu0 %v10442_v9 }
  0xa7   : > { %7391 = vmatmul.mubr.f32.gmra.mrb[22].mxu0 %v10447_v10 }
  0xa8   : > { %7393 = vmatprep.mubr.f32.mxu0 %v10450_v11 }
  0xab   : > { %7394 = vmatmul.mubr.f32.gmra.mrb[24].mxu0 %v10455_v12  ;;  %v6203_v12 = vld [vmem:[%s11950_s2 + $0x1b8] sm:$0xff] }
  0xac   : > { %7396 = vmatprep.mubr.f32.mxu0 %v10458_v13  ;;  %v10671_v13 = vld [vmem:[%s10274_s30 + $0x22] sm:$0xff] }
  0xad   : > { %12048 = vst [vmem:[#allocation20_spill] sm:$0xff] %v10671_v13 }
  0xaf   : > { %7397 = vmatmul.mubr.f32.gmra.mrb[26].mxu0 %v10463_v14  ;;  %v6201_v14 = vld [vmem:[%s11950_s2 + $0x1a8] sm:$0xff] }
  0xb0   : > { %7399 = vmatprep.mubr.f32.mxu0 %v10466_v15  ;;  %v6200_v15 = vld [vmem:[%s11950_s2 + $0x1a0] sm:$0xff] }
  0xb3   : > { %7400 = vmatmul.mubr.f32.gmra.mrb[28].mxu0 %v10471_v16 }
  0xb4   : > { %7402 = vmatprep.mubr.f32.mxu0 %v10474_v17  ;;  %v10661_v17 = vld [vmem:[%s10274_s30 + $0x1a] sm:$0xff] }
  0xb5   : > { %12047 = vst [vmem:[#allocation19_spill] sm:$0xff] %v10661_v17 }
  0xb7   : > { %7403 = vmatmul.mubr.f32.gmra.mrb[30].mxu0 %v10479_v18  ;;  %v853_v18 = vld [vmem:[%s10274_s30 + $0xa] sm:$0xff] }
  0xb8   : > { %7437 = vmatprep.mubr.f32.mxu0 %v305_v19  ;;  %v10574_v19 = vld [vmem:[%s10274_s30 + $0xa8] sm:$0xff] }
  0xbb   : > { %7438 = vmatmul.mubr.f32.vlgmr.msra.gmra.mrb[0].mxu0 %v306_v22  ;;  %v6197_v22 = vld [vmem:[%s11950_s2 + $0x188] sm:$0xff] }
  0xbc   : > { %8832 = vmatpush3.bf16.msra.mxu0 %v8829_v3  ;;  %7440 = vmatprep.mubr.f32.mxu0 %v10491_v23  ;;  %v10571_v3 = vld [vmem:[%s10274_s30 + $0x98] sm:$0xff]  ;;  %v8861_v26 = vpack.c.bf16 %v6197_v22, %v6196_v21  ;;  %v6198_v21 = vld [vmem:[%s11950_s2 + $0x190] sm:$0xff] }
  0xbd   : > { %8834 = vmatprep.subr.bf16.mxu0 %v8833_v24  ;;  %v6199_v22 = vld [vmem:[%s11950_s2 + $0x198] sm:$0xff] }
  0xbe   : > { %v8865_v16 = vpack.c.bf16 %v6199_v22, %v6198_v21  ;;  %v8869_v21 = vpack.c.bf16 %v6201_v14, %v6200_v15  ;;  %v6202_v22 = vld [vmem:[%s11950_s2 + $0x1b0] sm:$0xff]  ;;  %v6204_v15 = vld [vmem:[%s11950_s2 + $0x1c0] sm:$0xff] }
  0xbf   : > { %7441 = vmatmul.mubr.f32.gmra.mrb[2].mxu0 %v10501_v27  ;;  %v8873_v14 = vpack.c.bf16 %v6203_v12, %v6202_v22  ;;  %v6206_v22 = vld [vmem:[%s11950_s2 + $0x1d0] sm:$0xff] }
  0xc0   : > { %7443 = vmatprep.mubr.f32.mxu0 %v10504_v28  ;;  %8836 = vmatpush3.bf16.msra.mxu0 %v8833_v24  ;;  %v10585_v24 = vld [vmem:[%s10274_s30 + $0xb0] sm:$0xff] }
  0xc1   : > { %8838 = vmatprep.subr.bf16.mxu0 %v8837_v29 }
  0xc3   : > { %7444 = vmatmul.mubr.f32.gmra.mrb[4].mxu0 %v10515_v33 }
  0xc4   : > { %7446 = vmatprep.mubr.f32.mxu0 %v10518_v34  ;;  %8840 = vmatpush3.bf16.msra.mxu0 %v8837_v29  ;;  %v10593_v29 = vld [vmem:[%s10274_s30 + $0xc8] sm:$0xff] }
  0xc5   : > { %8842 = vmatprep.subr.bf16.mxu0 %v8841_v37 }
  0xc7   : > { %7447 = vmatmul.mubr.f32.gmra.mrb[6].mxu0 %v10529_v42 }
  0xc8   : > { %7449 = vmatprep.mubr.f32.mxu0 %v10532_v43  ;;  %8844 = vmatpush3.bf16.msra.mxu0 %v8841_v37  ;;  %v10604_v37 = vld [vmem:[%s10274_s30 + $0xf0] sm:$0xff] }
  0xc9   : > { %8846 = vmatprep.subr.bf16.mxu0 %v8845_v44 }
  0xcb   : > { %7450 = vmatmul.mubr.f32.gmra.mrb[8].mxu0 %v10543_v49 }
  0xcc   : > { %7452 = vmatprep.mubr.f32.mxu0 %v10546_v52  ;;  %8848 = vmatpush3.bf16.msra.mxu0 %v8845_v44  ;;  %v10617_v44 = vld [vmem:[%s10274_s30 + $0x110] sm:$0xff] }
  0xcd   : > { %8850 = vmatprep.subr.bf16.mxu0 %v8849_v53 }
  0xcf   : > { %7453 = vmatmul.mubr.f32.gmra.mrb[10].mxu0 %v10557_v58 }
  0xd0   : > { %7455 = vmatprep.mubr.f32.mxu0 %v10560_v59  ;;  %8852 = vmatpush3.bf16.msra.mxu0 %v8849_v53  ;;  %v10628_v53 = vld [vmem:[%s10274_s30 + $0x138] sm:$0xff] }
  0xd1   : > { %8854 = vmatprep.subr.bf16.mxu0 %v8853_v62 }
  0xd3   : > { %7456 = vmatmul.mubr.f32.gmra.mrb[12].mxu0 %v10571_v3 }
  0xd4   : > { %7458 = vmatprep.mubr.f32.mxu0 %v10574_v19  ;;  %8856 = vmatpush3.bf16.msra.mxu0 %v8853_v62  ;;  %v10641_v62 = vld [vmem:[%s10274_s30 + $0x158] sm:$0xff] }
  0xd5   : > { %8858 = vmatprep.subr.bf16.mxu0 %v8857_v20 }
  0xd7   : > { %7459 = vmatmul.mubr.f32.gmra.mrb[14].mxu0 %v10585_v24 }
  0xd8   : > { %7461 = vmatprep.mubr.f32.mxu0 %v10588_v25  ;;  %8860 = vmatpush3.bf16.msra.mxu0 %v8857_v20  ;;  %v852_v20 = vld [vmem:[%s10274_s30 + $0x2] sm:$0xff] }
  0xd9   : > { %8862 = vmatprep.subr.bf16.mxu0 %v8861_v26 }
  0xdb   : > { %7462 = vmatmul.mubr.f32.gmra.mrb[16].mxu0 %v10593_v29 }
  0xdc   : > { %7464 = vmatprep.mubr.f32.mxu0 %v10596_v30 }
  0xdf   : > { %7465 = vmatmul.mubr.f32.gmra.mrb[18].mxu0 %v10601_v32 }
  0xe0   : > { %7467 = vmatprep.mubr.f32.mxu0 %v10604_v37 }
  0xe3   : > { %7468 = vmatmul.mubr.f32.gmra.mrb[20].mxu0 %v10609_v38 }
  0xe4   : > { %7470 = vmatprep.mubr.f32.mxu0 %v10612_v39 }
  0xe7   : > { %7471 = vmatmul.mubr.f32.gmra.mrb[22].mxu0 %v10617_v44 }
  0xe8   : > { %7473 = vmatprep.mubr.f32.mxu0 %v10620_v47 }
  0xeb   : > { %7474 = vmatmul.mubr.f32.gmra.mrb[24].mxu0 %v10625_v48 }
  0xec   : > { %7476 = vmatprep.mubr.f32.mxu0 %v10628_v53 }
  0xef   : > { %7477 = vmatmul.mubr.f32.gmra.mrb[26].mxu0 %v10633_v54 }
  0xf0   : > { %7479 = vmatprep.mubr.f32.mxu0 %v10636_v57 }
  0xf3   : > { %7480 = vmatmul.mubr.f32.gmra.mrb[28].mxu0 %v10641_v62 }
  0xf4   : > { %7482 = vmatprep.mubr.f32.mxu0 %v10644_v63 }
  0xf7   : > { %7483 = vmatmul.mubr.f32.gmra.mrb[30].mxu0 %v10649_v0 }
  0xf8   : > { %7517 = vmatprep.mubr.f32.mxu0 %v852_v20  ;;  %v10674_v20 = vld [vmem:[%s10274_s30 + $0x32] sm:$0xff] }
  0xf9   : > { %12049 = vst [vmem:[#allocation21_spill] sm:$0xff] %v10674_v20 }
  0xfb   : > { %7518 = vmatmul.mubr.f32.vlgmr.msra.gmra.mrb[0].mxu0 %v853_v18  ;;  %v10685_v18 = vld [vmem:[%s10274_s30 + $0x3a] sm:$0xff] }
  0xfc   : > { %8864 = vmatpush3.bf16.msra.mxu0 %v8861_v26  ;;  %7520 = vmatprep.mubr.f32.mxu0 %v10661_v17  ;;  %12050 = vst [vmem:[#allocation22_spill] sm:$0xff] %v10685_v18  ;;  %v10688_v26 = vld [vmem:[%s10274_s30 + $0x4a] sm:$0xff] }
  0xfd   : > { %8866 = vmatprep.subr.bf16.mxu0 %v8865_v16  ;;  %12051 = vst [vmem:[#allocation23_spill] sm:$0xff] %v10688_v26  ;;  %v6205_v17 = vld [vmem:[%s11950_s2 + $0x1c8] sm:$0xff] }
  0xfe   : > { %v8877_v12 = vpack.c.bf16 %v6205_v17, %v6204_v15  ;;  %v6208_v15 = vld [vmem:[%s11950_s2 + $0x1e0] sm:$0xff] }
  0xff   : > { %7521 = vmatmul.mubr.f32.gmra.mrb[2].mxu0 %v10671_v13  ;;  %v6207_v13 = vld [vmem:[%s11950_s2 + $0x1d8] sm:$0xff] }
 0x100   : > { %7523 = vmatprep.mubr.f32.mxu0 %v10674_v20  ;;  %8868 = vmatpush3.bf16.msra.mxu0 %v8865_v16  ;;  %v10699_v20 = vld [vmem:[%s10274_s30 + $0x52] sm:$0xff]  ;;  %v10702_v16 = vld [vmem:[%s10274_s30 + $0x62] sm:$0xff]  ;;  %v8881_v17 = vpack.c.bf16 %v6207_v13, %v6206_v22 }
 0x101   : > { %8870 = vmatprep.subr.bf16.mxu0 %v8869_v21  ;;  %12052 = vst [vmem:[#allocation24_spill] sm:$0xff] %v10699_v20  ;;  %12053 = vst [vmem:[#allocation25_spill] sm:$0xff] %v10702_v16  ;;  %v6210_v22 = vld [vmem:[%s11950_s2 + $0x1f0] sm:$0xff] }
 0x103   : > { %7524 = vmatmul.mubr.f32.gmra.mrb[4].mxu0 %v10685_v18  ;;  %v6209_v18 = vld [vmem:[%s11950_s2 + $0x1e8] sm:$0xff] }
 0x104   : > { %7526 = vmatprep.mubr.f32.mxu0 %v10688_v26  ;;  %8872 = vmatpush3.bf16.msra.mxu0 %v8869_v21  ;;  %v10713_v26 = vld [vmem:[%s10274_s30 + $0x6a] sm:$0xff]  ;;  %v10716_v21 = vld [vmem:[%s10274_s30 + $0x7a] sm:$0xff]  ;;  %v8885_v13 = vpack.c.bf16 %v6209_v18, %v6208_v15 }
 0x105   : > { %8874 = vmatprep.subr.bf16.mxu0 %v8873_v14  ;;  %12054 = vst [vmem:[#allocation26_spill] sm:$0xff] %v10713_v26  ;;  %12055 = vst [vmem:[#allocation27_spill] sm:$0xff] %v10716_v21  ;;  %v6244_v15 = vld [vmem:[%s11950_s2 + $0x200] sm:$0xff] }
 0x107   : > { %7527 = vmatmul.mubr.f32.gmra.mrb[6].mxu0 %v10699_v20  ;;  %v6211_v20 = vld [vmem:[%s11950_s2 + $0x1f8] sm:$0xff] }
 0x108   : > { %7529 = vmatprep.mubr.f32.mxu0 %v10702_v16  ;;  %8876 = vmatpush3.bf16.msra.mxu0 %v8873_v14  ;;  %v10727_v16 = vld [vmem:[%s10274_s30 + $0x82] sm:$0xff]  ;;  %v10730_v14 = vld [vmem:[%s10274_s30 + $0x92] sm:$0xff]  ;;  %v8889_v18 = vpack.c.bf16 %v6211_v20, %v6210_v22  ;;  %v10763_v22 = vld [vmem:[%s10274_s30 + $0xca] sm:$0xff] }
 0x109   : > { %8878 = vmatprep.subr.bf16.mxu0 %v8877_v12  ;;  %12056 = vst [vmem:[#allocation28_spill] sm:$0xff] %v10730_v14  ;;  %12059 = vst [vmem:[#allocation31_spill] sm:$0xff] %v10763_v22 }
 0x10b   : > { %7530 = vmatmul.mubr.f32.gmra.mrb[8].mxu0 %v10713_v26  ;;  %v6245_v26 = vld [vmem:[%s11950_s2 + $0x208] sm:$0xff] }
 0x10c   : > { %7532 = vmatprep.mubr.f32.mxu0 %v10716_v21  ;;  %8880 = vmatpush3.bf16.msra.mxu0 %v8877_v12  ;;  %v10741_v21 = vld [vmem:[%s10274_s30 + $0x9a] sm:$0xff]  ;;  %v10744_v12 = vld [vmem:[%s10274_s30 + $0xaa] sm:$0xff]  ;;  %v8893_v20 = vpack.c.bf16 %v6245_v26, %v6244_v15  ;;  %v10774_v26 = vld [vmem:[%s10274_s30 + $0xf2] sm:$0xff] }
 0x10d   : > { %8882 = vmatprep.subr.bf16.mxu0 %v8881_v17  ;;  %12057 = vst [vmem:[#allocation29_spill] sm:$0xff] %v10741_v21  ;;  %12062 = vst [vmem:[#allocation34_spill] sm:$0xff] %v10774_v26  ;;  %v10782_v15 = vld [vmem:[%s10274_s30 + $0x10a] sm:$0xff] }
 0x10e   : > { %12064 = vst [vmem:[#allocation36_spill] sm:$0xff] %v10782_v15 }
 0x10f   : > { %7533 = vmatmul.mubr.f32.gmra.mrb[10].mxu0 %v10727_v16 }
 0x110   : > { %7535 = vmatprep.mubr.f32.mxu0 %v10730_v14  ;;  %8884 = vmatpush3.bf16.msra.mxu0 %v8881_v17  ;;  %v10755_v17 = vld [vmem:[%s10274_s30 + $0xb2] sm:$0xff]  ;;  %v10758_v14 = vld [vmem:[%s10274_s30 + $0xc2] sm:$0xff] }
 0x111   : > { %8886 = vmatprep.subr.bf16.mxu0 %v8885_v13  ;;  %12058 = vst [vmem:[#allocation30_spill] sm:$0xff] %v10758_v14 }
 0x113   : > { %7536 = vmatmul.mubr.f32.gmra.mrb[12].mxu0 %v10741_v21  ;;  %v10766_v21 = vld [vmem:[%s10274_s30 + $0xda] sm:$0xff] }
 0x114   : > { %7538 = vmatprep.mubr.f32.mxu0 %v10744_v12  ;;  %8888 = vmatpush3.bf16.msra.mxu0 %v8885_v13  ;;  %12060 = vst [vmem:[#allocation32_spill] sm:$0xff] %v10766_v21  ;;  %v10771_v13 = vld [vmem:[%s10274_s30 + $0xe2] sm:$0xff] }
 0x115   : > { %8890 = vmatprep.subr.bf16.mxu0 %v8889_v18  ;;  %12061 = vst [vmem:[#allocation33_spill] sm:$0xff] %v10771_v13 }
 0x117   : > { %7539 = vmatmul.mubr.f32.gmra.mrb[14].mxu0 %v10755_v17 }
 0x118   : > { %7541 = vmatprep.mubr.f32.mxu0 %v10758_v14  ;;  %8892 = vmatpush3.bf16.msra.mxu0 %v8889_v18  ;;  %v10779_v18 = vld [vmem:[%s10274_s30 + $0xfa] sm:$0xff] }
 0x119   : > { %8894 = vmatprep.subr.bf16.mxu0 %v8893_v20  ;;  %12063 = vst [vmem:[#allocation35_spill] sm:$0xff] %v10779_v18  ;;  %v10811_v14 = vld [vmem:[%s10274_s30 + $0x15a] sm:$0xff] }
 0x11a   : > { %12071 = vst [vmem:[#allocation43_spill] sm:$0xff] %v10811_v14 }
 0x11b   : > { %7542 = vmatmul.mubr.f32.gmra.mrb[16].mxu0 %v10763_v22  ;;  %v10790_v22 = vld [vmem:[%s10274_s30 + $0x122] sm:$0xff] }
 0x11c   : > { %7544 = vmatprep.mubr.f32.mxu0 %v10766_v21  ;;  %v10787_v21 = vld [vmem:[%s10274_s30 + $0x112] sm:$0xff]  ;;  %12066 = vst [vmem:[#allocation38_spill] sm:$0xff] %v10790_v22 }
 0x11d   : > { %12065 = vst [vmem:[#allocation37_spill] sm:$0xff] %v10787_v21 }
 0x11f   : > { %7545 = vmatmul.mubr.f32.gmra.mrb[18].mxu0 %v10771_v13  ;;  %v10798_v13 = vld [vmem:[%s10274_s30 + $0x13a] sm:$0xff] }
 0x120   : > { %7547 = vmatprep.mubr.f32.mxu0 %v10774_v26  ;;  %v10795_v26 = vld [vmem:[%s10274_s30 + $0x12a] sm:$0xff]  ;;  %12068 = vst [vmem:[#allocation40_spill] sm:$0xff] %v10798_v13 }
 0x121   : > { %12067 = vst [vmem:[#allocation39_spill] sm:$0xff] %v10795_v26 }
 0x123   : > { %7548 = vmatmul.mubr.f32.gmra.mrb[20].mxu0 %v10779_v18  ;;  %v10803_v18 = vld [vmem:[%s10274_s30 + $0x142] sm:$0xff] }
 0x124   : > { %7550 = vmatprep.mubr.f32.mxu0 %v10782_v15  ;;  %12069 = vst [vmem:[#allocation41_spill] sm:$0xff] %v10803_v18  ;;  %v10806_v15 = vld [vmem:[%s10274_s30 + $0x152] sm:$0xff] }
 0x125   : > { %12070 = vst [vmem:[#allocation42_spill] sm:$0xff] %v10806_v15 }
 0x127   : > { %7551 = vmatmul.mubr.f32.gmra.mrb[22].mxu0 %v10787_v21  ;;  %v10814_v21 = vld [vmem:[%s10274_s30 + $0x16a] sm:$0xff] }
 0x128   : > { %7553 = vmatprep.mubr.f32.mxu0 %v10790_v22  ;;  %12072 = vst [vmem:[#allocation44_spill] sm:$0xff] %v10814_v21  ;;  %v10819_v22 = vld [vmem:[%s10274_s30 + $0x172] sm:$0xff] }
 0x12b   : > { %7554 = vmatmul.mubr.f32.gmra.mrb[24].mxu0 %v10795_v26 }
 0x12c   : > { %7556 = vmatprep.mubr.f32.mxu0 %v10798_v13  ;;  %v6246_v13 = vld [vmem:[%s11950_s2 + $0x210] sm:$0xff] }
 0x12f   : > { %7557 = vmatmul.mubr.f32.gmra.mrb[26].mxu0 %v10803_v18  ;;  %v6247_v18 = vld [vmem:[%s11950_s2 + $0x218] sm:$0xff] }
 0x130   : > { %7559 = vmatprep.mubr.f32.mxu0 %v10806_v15  ;;  %v8897_v15 = vpack.c.bf16 %v6247_v18, %v6246_v13  ;;  %v6251_v13 = vld [vmem:[%s11950_s2 + $0x238] sm:$0xff]  ;;  %v6254_v18 = vld [vmem:[%s11950_s2 + $0x250] sm:$0xff] }
 0x133   : > { %7560 = vmatmul.mubr.f32.gmra.mrb[28].mxu0 %v10811_v14  ;;  %v6248_v14 = vld [vmem:[%s11950_s2 + $0x220] sm:$0xff] }
 0x134   : > { %7562 = vmatprep.mubr.f32.mxu0 %v10814_v21  ;;  %v6249_v21 = vld [vmem:[%s11950_s2 + $0x228] sm:$0xff] }
 0x135   : > { %v8901_v26 = vpack.c.bf16 %v6249_v21, %v6248_v14  ;;  %v6253_v21 = vld [vmem:[%s11950_s2 + $0x248] sm:$0xff] }
 0x137   : > { %7563 = vmatmul.mubr.f32.gmra.mrb[30].mxu0 %v10819_v22 }
 0x138   : > { %7597 = vmatprep.mubr.f32.mxu0 %v10491_v23  ;;  %v6250_v23 = vld [vmem:[%s11950_s2 + $0x230] sm:$0xff] }
 0x13b   : > { %7598 = vmatmul.mubr.f32.vlgmr.msra.gmra.mrb[0].mxu0 %v10501_v27  ;;  %v8905_v27 = vpack.c.bf16 %v6251_v13, %v6250_v23  ;;  %v6257_v13 = vld [vmem:[%s11950_s2 + $0x268] sm:$0xff] }
 0x13c   : > { %8896 = vmatpush3.bf16.msra.mxu0 %v8893_v20  ;;  %7600 = vmatprep.mubr.f32.mxu0 %v10504_v28  ;;  %v6252_v20 = vld [vmem:[%s11950_s2 + $0x240] sm:$0xff] }
 0x13d   : > { %8898 = vmatprep.subr.bf16.mxu0 %v8897_v15  ;;  %v8909_v14 = vpack.c.bf16 %v6253_v21, %v6252_v20  ;;  %v6259_v21 = vld [vmem:[%s11950_s2 + $0x278] sm:$0xff] }
 0x13f   : > { %7601 = vmatmul.mubr.f32.gmra.mrb[2].mxu0 %v10515_v33 }
 0x140   : > { %7603 = vmatprep.mubr.f32.mxu0 %v10518_v34  ;;  %8900 = vmatpush3.bf16.msra.mxu0 %v8897_v15  ;;  %v6255_v15 = vld [vmem:[%s11950_s2 + $0x258] sm:$0xff] }
 0x141   : > { %8902 = vmatprep.subr.bf16.mxu0 %v8901_v26  ;;  %v8913_v23 = vpack.c.bf16 %v6255_v15, %v6254_v18  ;;  %v6293_v15 = vld [vmem:[%s11950_s2 + $0x288] sm:$0xff] }
 0x143   : > { %7604 = vmatmul.mubr.f32.gmra.mrb[4].mxu0 %v10529_v42 }
 0x144   : > { %7606 = vmatprep.mubr.f32.mxu0 %v10532_v43  ;;  %8904 = vmatpush3.bf16.msra.mxu0 %v8901_v26  ;;  %v6256_v26 = vld [vmem:[%s11950_s2 + $0x260] sm:$0xff] }
 0x145   : > { %8906 = vmatprep.subr.bf16.mxu0 %v8905_v27  ;;  %v8917_v20 = vpack.c.bf16 %v6257_v13, %v6256_v26  ;;  %v10905_v13 = vld [vmem:[%s10274_s30 + $0x188] sm:$0xff] }
 0x147   : > { %7607 = vmatmul.mubr.f32.gmra.mrb[6].mxu0 %v10543_v49 }
 0x148   : > { %7609 = vmatprep.mubr.f32.mxu0 %v10546_v52  ;;  %8908 = vmatpush3.bf16.msra.mxu0 %v8905_v27  ;;  %v6258_v27 = vld [vmem:[%s11950_s2 + $0x270] sm:$0xff] }
 0x149   : > { %8910 = vmatprep.subr.bf16.mxu0 %v8909_v14  ;;  %v8921_v18 = vpack.c.bf16 %v6259_v21, %v6258_v27  ;;  %v6295_v27 = vld [vmem:[%s11950_s2 + $0x298] sm:$0xff] }
 0x14b   : > { %7610 = vmatmul.mubr.f32.gmra.mrb[8].mxu0 %v10557_v58 }
 0x14c   : > { %7612 = vmatprep.mubr.f32.mxu0 %v10560_v59  ;;  %8912 = vmatpush3.bf16.msra.mxu0 %v8909_v14  ;;  %v6292_v14 = vld [vmem:[%s11950_s2 + $0x280] sm:$0xff] }
 0x14d   : > { %8914 = vmatprep.subr.bf16.mxu0 %v8913_v23  ;;  %v8925_v26 = vpack.c.bf16 %v6293_v15, %v6292_v14  ;;  %v6297_v14 = vld [vmem:[%s11950_s2 + $0x2a8] sm:$0xff] }
 0x14f   : > { %7613 = vmatmul.mubr.f32.gmra.mrb[10].mxu0 %v10571_v3 }
 0x150   : > { %7615 = vmatprep.mubr.f32.mxu0 %v10574_v19  ;;  %8916 = vmatpush3.bf16.msra.mxu0 %v8913_v23  ;;  %v10900_v23 = vld [vmem:[%s10274_s30 + $0x180] sm:$0xff] }
 0x151   : > { %8918 = vmatprep.subr.bf16.mxu0 %v8917_v20 }
 0x153   : > { %7616 = vmatmul.mubr.f32.gmra.mrb[12].mxu0 %v10585_v24 }
 0x154   : > { %7618 = vmatprep.mubr.f32.mxu0 %v10588_v25  ;;  %8920 = vmatpush3.bf16.msra.mxu0 %v8917_v20  ;;  %v6294_v20 = vld [vmem:[%s11950_s2 + $0x290] sm:$0xff] }
 0x155   : > { %8922 = vmatprep.subr.bf16.mxu0 %v8921_v18  ;;  %v8929_v21 = vpack.c.bf16 %v6295_v27, %v6294_v20  ;;  %v6299_v20 = vld [vmem:[%s11950_s2 + $0x2b8] sm:$0xff] }
 0x156   : > { %v6303_v27 = vld [vmem:[%s11950_s2 + $0x2d8] sm:$0xff] }
 0x157   : > { %7619 = vmatmul.mubr.f32.gmra.mrb[14].mxu0 %v10593_v29 }
 0x158   : > { %7621 = vmatprep.mubr.f32.mxu0 %v10596_v30  ;;  %8924 = vmatpush3.bf16.msra.mxu0 %v8921_v18  ;;  %v6296_v18 = vld [vmem:[%s11950_s2 + $0x2a0] sm:$0xff] }
 0x159   : > { %8926 = vmatprep.subr.bf16.mxu0 %v8925_v26  ;;  %v8933_v15 = vpack.c.bf16 %v6297_v14, %v6296_v18  ;;  %v6307_v18 = vld [vmem:[%s11950_s2 + $0x2f8] sm:$0xff]  ;;  %v6341_v14 = vld [vmem:[%s11950_s2 + $0x308] sm:$0xff] }
 0x15b   : > { %7622 = vmatmul.mubr.f32.gmra.mrb[16].mxu0 %v10601_v32 }
 0x15c   : > { %7624 = vmatprep.mubr.f32.mxu0 %v10604_v37 }
 0x15f   : > { %7625 = vmatmul.mubr.f32.gmra.mrb[18].mxu0 %v10609_v38 }
 0x160   : > { %7627 = vmatprep.mubr.f32.mxu0 %v10612_v39 }
 0x163   : > { %7628 = vmatmul.mubr.f32.gmra.mrb[20].mxu0 %v10617_v44 }
 0x164   : > { %7630 = vmatprep.mubr.f32.mxu0 %v10620_v47 }
 0x167   : > { %7631 = vmatmul.mubr.f32.gmra.mrb[22].mxu0 %v10625_v48 }
 0x168   : > { %7633 = vmatprep.mubr.f32.mxu0 %v10628_v53 }
 0x16b   : > { %7634 = vmatmul.mubr.f32.gmra.mrb[24].mxu0 %v10633_v54 }
 0x16c   : > { %7636 = vmatprep.mubr.f32.mxu0 %v10636_v57 }
 0x16f   : > { %7637 = vmatmul.mubr.f32.gmra.mrb[26].mxu0 %v10641_v62 }
 0x170   : > { %7639 = vmatprep.mubr.f32.mxu0 %v10644_v63 }
 0x173   : > { %7640 = vmatmul.mubr.f32.gmra.mrb[28].mxu0 %v10649_v0 }
 0x174   : > { %7642 = vmatprep.mubr.f32.mxu0 %v10900_v23 }
 0x177   : > { %7643 = vmatmul.mubr.f32.gmra.mrb[30].mxu0 %v10905_v13 }
 0x178   : > { %7677 = vmatprep.mubr.f32.mxu0 %v10321_v31  ;;  %v6298_v31 = vld [vmem:[%s11950_s2 + $0x2b0] sm:$0xff] }
 0x17b   : > { %7678 = vmatmul.mubr.f32.vlgmr.msra.gmra.mrb[0].mxu0 %v10331_v35  ;;  %v8937_v35 = vpack.c.bf16 %v6299_v20, %v6298_v31  ;;  %v6344_v20 = vld [vmem:[%s11950_s2 + $0x320] sm:$0xff] }
 0x17c   : > { %8928 = vmatpush3.bf16.msra.mxu0 %v8925_v26  ;;  %7680 = vmatprep.mubr.f32.mxu0 %v10334_v36  ;;  %v6300_v36 = vld [vmem:[%s11950_s2 + $0x2c0] sm:$0xff]  ;;  %v6301_v26 = vld [vmem:[%s11950_s2 + $0x2c8] sm:$0xff] }
 0x17d   : > { %8930 = vmatprep.subr.bf16.mxu0 %v8929_v21 }
 0x17f   : > { %7681 = vmatmul.mubr.f32.gmra.mrb[2].mxu0 %v10345_v40  ;;  %v8941_v40 = vpack.c.bf16 %v6301_v26, %v6300_v36  ;;  %v12081_v36 = vld [vmem:[#allocation20_spill] sm:$0xff]  ;;  %v12082_v26 = vld [vmem:[#allocation21_spill] sm:$0xff] }
 0x180   : > { %7683 = vmatprep.mubr.f32.mxu0 %v10348_v41  ;;  %8932 = vmatpush3.bf16.msra.mxu0 %v8929_v21  ;;  %v6302_v41 = vld [vmem:[%s11950_s2 + $0x2d0] sm:$0xff]  ;;  %v6305_v21 = vld [vmem:[%s11950_s2 + $0x2e8] sm:$0xff] }
 0x181   : > { %8934 = vmatprep.subr.bf16.mxu0 %v8933_v15 }
 0x183   : > { %7684 = vmatmul.mubr.f32.gmra.mrb[4].mxu0 %v10359_v45  ;;  %v8945_v45 = vpack.c.bf16 %v6303_v27, %v6302_v41  ;;  %v6346_v41 = vld [vmem:[%s11950_s2 + $0x330] sm:$0xff]  ;;  %v6347_v27 = vld [vmem:[%s11950_s2 + $0x338] sm:$0xff] }
 0x184   : > { %7686 = vmatprep.mubr.f32.mxu0 %v10362_v46  ;;  %8936 = vmatpush3.bf16.msra.mxu0 %v8933_v15  ;;  %v6304_v46 = vld [vmem:[%s11950_s2 + $0x2e0] sm:$0xff]  ;;  %v12080_v15 = vld [vmem:[#allocation19_spill] sm:$0xff] }
 0x185   : > { %8938 = vmatprep.subr.bf16.mxu0 %v8937_v35 }
 0x187   : > { %7687 = vmatmul.mubr.f32.gmra.mrb[6].mxu0 %v10373_v50  ;;  %v8949_v50 = vpack.c.bf16 %v6305_v21, %v6304_v46  ;;  %v12084_v46 = vld [vmem:[#allocation23_spill] sm:$0xff]  ;;  %v8969_v21 = vpack.c.bf16 %v6347_v27, %v6346_v41  ;;  %v12095_v41 = vld [vmem:[#allocation34_spill] sm:$0xff] }
 0x188   : > { %7689 = vmatprep.mubr.f32.mxu0 %v10376_v51  ;;  %8940 = vmatpush3.bf16.msra.mxu0 %v8937_v35  ;;  %v6306_v51 = vld [vmem:[%s11950_s2 + $0x2f0] sm:$0xff]  ;;  %v6345_v35 = vld [vmem:[%s11950_s2 + $0x328] sm:$0xff] }
 0x189   : > { %8942 = vmatprep.subr.bf16.mxu0 %v8941_v40  ;;  %v12096_v27 = vld [vmem:[#allocation35_spill] sm:$0xff] }
 0x18b   : > { %7690 = vmatmul.mubr.f32.gmra.mrb[8].mxu0 %v10387_v55  ;;  %v8953_v55 = vpack.c.bf16 %v6307_v18, %v6306_v51  ;;  %v6349_v51 = vld [vmem:[%s11950_s2 + $0x348] sm:$0xff]  ;;  %v12085_v18 = vld [vmem:[#allocation24_spill] sm:$0xff] }
 0x18c   : > { %7692 = vmatprep.mubr.f32.mxu0 %v10390_v56  ;;  %8944 = vmatpush3.bf16.msra.mxu0 %v8941_v40  ;;  %v6340_v56 = vld [vmem:[%s11950_s2 + $0x300] sm:$0xff]  ;;  %v8965_v40 = vpack.c.bf16 %v6345_v35, %v6344_v20  ;;  %v6389_v20 = vld [vmem:[%s11950_s2 + $0x388] sm:$0xff] }
 0x18d   : > { %8946 = vmatprep.subr.bf16.mxu0 %v8945_v45  ;;  %v12091_v35 = vld [vmem:[#allocation30_spill] sm:$0xff] }
 0x18f   : > { %7693 = vmatmul.mubr.f32.gmra.mrb[10].mxu0 %v10401_v60  ;;  %v8957_v60 = vpack.c.bf16 %v6341_v14, %v6340_v56  ;;  %v6350_v14 = vld [vmem:[%s11950_s2 + $0x350] sm:$0xff] }
 0x190   : > { %7695 = vmatprep.mubr.f32.mxu0 %v10404_v61  ;;  %8948 = vmatpush3.bf16.msra.mxu0 %v8945_v45  ;;  %v12073_v61 = vld [vmem:[#allocation12_spill] sm:$0xff]  ;;  %v12083_v45 = vld [vmem:[#allocation22_spill] sm:$0xff] }
 0x191   : > { %8950 = vmatprep.subr.bf16.mxu0 %v8949_v50 }
 0x193   : > { %7696 = vmatmul.mubr.f32.gmra.mrb[12].mxu0 %v10415_v1  ;;  %v12074_v1 = vld [vmem:[#allocation13_spill] sm:$0xff] }
 0x194   : > { %7698 = vmatprep.mubr.f32.mxu0 %v10418_v2  ;;  %8952 = vmatpush3.bf16.msra.mxu0 %v8949_v50  ;;  %v12075_v2 = vld [vmem:[#allocation14_spill] sm:$0xff] }
 0x195   : > { %8954 = vmatprep.subr.bf16.mxu0 %v8953_v55  ;;  %v6348_v50 = vld [vmem:[%s11950_s2 + $0x340] sm:$0xff] }
 0x196   : > { %v8973_v56 = vpack.c.bf16 %v6349_v51, %v6348_v50  ;;  %v12101_v50 = vld [vmem:[#allocation40_spill] sm:$0xff]  ;;  %v12102_v51 = vld [vmem:[#allocation41_spill] sm:$0xff] }
 0x197   : > { %7699 = vmatmul.mubr.f32.gmra.mrb[14].mxu0 %v10423_v4  ;;  %v12076_v4 = vld [vmem:[#allocation15_spill] sm:$0xff] }
 0x198   : > { %7701 = vmatprep.mubr.f32.mxu0 %v10426_v5  ;;  %8956 = vmatpush3.bf16.msra.mxu0 %v8953_v55  ;;  %v12077_v5 = vld [vmem:[#allocation16_spill] sm:$0xff]  ;;  %v12086_v55 = vld [vmem:[#allocation25_spill] sm:$0xff] }
 0x199   : > { %8958 = vmatprep.subr.bf16.mxu0 %v8957_v60 }
 0x19b   : > { %7702 = vmatmul.mubr.f32.gmra.mrb[16].mxu0 %v10431_v6  ;;  %v12078_v6 = vld [vmem:[#allocation17_spill] sm:$0xff] }
 0x19c   : > { %7704 = vmatprep.mubr.f32.mxu0 %v10434_v7  ;;  %v10986_v7 = vld [vmem:[%s10274_s30 + $0x181] sm:$0xff] }
 0x19f   : > { %7705 = vmatmul.mubr.f32.gmra.mrb[18].mxu0 %v10439_v8  ;;  %v12079_v8 = vld [vmem:[#allocation18_spill] sm:$0xff] }
 0x1a0   : > { %7707 = vmatprep.mubr.f32.mxu0 %v10442_v9  ;;  %v10991_v9 = vld [vmem:[%s10274_s30 + $0x189] sm:$0xff] }
 0x1a3   : > { %7708 = vmatmul.mubr.f32.gmra.mrb[20].mxu0 %v10447_v10  ;;  %v6342_v10 = vld [vmem:[%s11950_s2 + $0x310] sm:$0xff] }
 0x1a4   : > { %7710 = vmatprep.mubr.f32.mxu0 %v10450_v11  ;;  %v6343_v11 = vld [vmem:[%s11950_s2 + $0x318] sm:$0xff] }
 0x1a5   : > { %v8961_v31 = vpack.c.bf16 %v6343_v11, %v6342_v10  ;;  %v6354_v10 = vld [vmem:[%s11950_s2 + $0x370] sm:$0xff]  ;;  %v6355_v11 = vld [vmem:[%s11950_s2 + $0x378] sm:$0xff] }
 0x1a7   : > { %7711 = vmatmul.mubr.f32.gmra.mrb[22].mxu0 %v12073_v61  ;;  %v12087_v61 = vld [vmem:[#allocation26_spill] sm:$0xff] }
 0x1a8   : > { %7713 = vmatprep.mubr.f32.mxu0 %v12074_v1  ;;  %v12088_v1 = vld [vmem:[#allocation27_spill] sm:$0xff] }
 0x1ab   : > { %7714 = vmatmul.mubr.f32.gmra.mrb[24].mxu0 %v12075_v2 }
 0x1ac   : > { %7716 = vmatprep.mubr.f32.mxu0 %v12076_v4  ;;  %v6352_v4 = vld [vmem:[%s11950_s2 + $0x360] sm:$0xff] }
 0x1af   : > { %7717 = vmatmul.mubr.f32.gmra.mrb[26].mxu0 %v12077_v5  ;;  %v6353_v5 = vld [vmem:[%s11950_s2 + $0x368] sm:$0xff] }
 0x1b0   : > { %7719 = vmatprep.mubr.f32.mxu0 %v12078_v6  ;;  %v12089_v6 = vld [vmem:[#allocation28_spill] sm:$0xff] }
 0x1b3   : > { %7720 = vmatmul.mubr.f32.gmra.mrb[28].mxu0 %v12079_v8  ;;  %v8981_v8 = vpack.c.bf16 %v6353_v5, %v6352_v4  ;;  %v6393_v4 = vld [vmem:[%s11950_s2 + $0x3a8] sm:$0xff] }
 0x1b4   : > { %7722 = vmatprep.mubr.f32.mxu0 %v10986_v7 }
 0x1b7   : > { %7723 = vmatmul.mubr.f32.gmra.mrb[30].mxu0 %v10991_v9 }
 0x1b8   : > { %7757 = vmatprep.mubr.f32.mxu0 %v12080_v15  ;;  %v12090_v15 = vld [vmem:[#allocation29_spill] sm:$0xff] }
 0x1bb   : > { %7758 = vmatmul.mubr.f32.vlgmr.msra.gmra.mrb[0].mxu0 %v12081_v36 }
 0x1bc   : > { %8960 = vmatpush3.bf16.msra.mxu0 %v8957_v60  ;;  %7760 = vmatprep.mubr.f32.mxu0 %v12082_v26  ;;  %v6351_v60 = vld [vmem:[%s11950_s2 + $0x358] sm:$0xff]  ;;  %v12092_v26 = vld [vmem:[#allocation31_spill] sm:$0xff] }
 0x1bd   : > { %8962 = vmatprep.subr.bf16.mxu0 %v8961_v31  ;;  %v8977_v2 = vpack.c.bf16 %v6351_v60, %v6350_v14  ;;  %v11072_v14 = vld [vmem:[%s10274_s30 + $0x182] sm:$0xff]  ;;  %v11077_v60 = vld [vmem:[%s10274_s30 + $0x18a] sm:$0xff] }
 0x1bf   : > { %7761 = vmatmul.mubr.f32.gmra.mrb[2].mxu0 %v12083_v45  ;;  %v12098_v45 = vld [vmem:[#allocation37_spill] sm:$0xff] }
 0x1c0   : > { %7763 = vmatprep.mubr.f32.mxu0 %v12084_v46  ;;  %8964 = vmatpush3.bf16.msra.mxu0 %v8961_v31  ;;  %v6388_v31 = vld [vmem:[%s11950_s2 + $0x380] sm:$0xff] }
 0x1c1   : > { %8966 = vmatprep.subr.bf16.mxu0 %v8965_v40  ;;  %v8989_v36 = vpack.c.bf16 %v6389_v20, %v6388_v31  ;;  %v12099_v46 = vld [vmem:[#allocation38_spill] sm:$0xff]  ;;  %v6359_v31 = vld [vmem:[%s10274_s30 + $0x51] sm:$0xff] }
 0x1c2   : > { %v6360_v20 = vld [vmem:[%s10274_s30 + $0x61] sm:$0xff] }
 0x1c3   : > { %7764 = vmatmul.mubr.f32.gmra.mrb[4].mxu0 %v12085_v18  ;;  %v12103_v18 = vld [vmem:[#allocation42_spill] sm:$0xff] }
 0x1c4   : > { %7766 = vmatprep.mubr.f32.mxu0 %v12086_v55  ;;  %8968 = vmatpush3.bf16.msra.mxu0 %v8965_v40  ;;  %v12094_v40 = vld [vmem:[#allocation33_spill] sm:$0xff]  ;;  %v12104_v55 = vld [vmem:[#allocation43_spill] sm:$0xff] }
 0x1c5   : > { %8970 = vmatprep.subr.bf16.mxu0 %v8969_v21 }
 0x1c7   : > { %7767 = vmatmul.mubr.f32.gmra.mrb[6].mxu0 %v12087_v61  ;;  %v6390_v61 = vld [vmem:[%s11950_s2 + $0x390] sm:$0xff] }
 0x1c8   : > { %7769 = vmatprep.mubr.f32.mxu0 %v12088_v1  ;;  %8972 = vmatpush3.bf16.msra.mxu0 %v8969_v21  ;;  %v12100_v21 = vld [vmem:[#allocation39_spill] sm:$0xff]  ;;  %v6391_v1 = vld [vmem:[%s11950_s2 + $0x398] sm:$0xff] }
 0x1c9   : > { %8974 = vmatprep.subr.bf16.mxu0 %v8973_v56 }
 0x1cb   : > { %7770 = vmatmul.mubr.f32.gmra.mrb[8].mxu0 %v10727_v16  ;;  %v8985_v16 = vpack.c.bf16 %v6355_v11, %v6354_v10  ;;  %v6399_v10 = vld [vmem:[%s11950_s2 + $0x3d8] sm:$0xff]  ;;  %v6401_v11 = vld [vmem:[%s11950_s2 + $0x3e8] sm:$0xff] }
 0x1cc   : > { %7772 = vmatprep.mubr.f32.mxu0 %v12089_v6  ;;  %8976 = vmatpush3.bf16.msra.mxu0 %v8973_v56  ;;  %v12105_v56 = vld [vmem:[#allocation44_spill] sm:$0xff]  ;;  %v6395_v6 = vld [vmem:[%s11950_s2 + $0x3b8] sm:$0xff] }
 0x1cd   : > { %8978 = vmatprep.subr.bf16.mxu0 %v8977_v2 }
 0x1cf   : > { %7773 = vmatmul.mubr.f32.gmra.mrb[10].mxu0 %v12090_v15  ;;  %v6403_v15 = vld [vmem:[%s11950_s2 + $0x3f8] sm:$0xff] }
 0x1d0   : > { %7775 = vmatprep.mubr.f32.mxu0 %v10744_v12  ;;  %8980 = vmatpush3.bf16.msra.mxu0 %v8977_v2  ;;  %v12093_v12 = vld [vmem:[#allocation32_spill] sm:$0xff]  ;;  %v8993_v2 = vpack.c.bf16 %v6391_v1, %v6390_v61 }
 0x1d1   : > { %8982 = vmatprep.subr.bf16.mxu0 %v8981_v8  ;;  %v6446_v1 = vld [vmem:[%s11950_s2 + $0x450] sm:$0xff] }
 0x1d3   : > { %7776 = vmatmul.mubr.f32.gmra.mrb[12].mxu0 %v10755_v17  ;;  %v12097_v17 = vld [vmem:[#allocation36_spill] sm:$0xff] }
 0x1d4   : > { %7778 = vmatprep.mubr.f32.mxu0 %v12091_v35  ;;  %8984 = vmatpush3.bf16.msra.mxu0 %v8981_v8  ;;  %v6397_v8 = vld [vmem:[%s11950_s2 + $0x3c8] sm:$0xff] }
 0x1d5   : > { %8986 = vmatprep.subr.bf16.mxu0 %v8985_v16 }
 0x1d7   : > { %7779 = vmatmul.mubr.f32.gmra.mrb[14].mxu0 %v12092_v26 }
 0x1d8   : > { %7781 = vmatprep.mubr.f32.mxu0 %v12093_v12  ;;  %8988 = vmatpush3.bf16.msra.mxu0 %v8985_v16  ;;  %v6437_v16 = vld [vmem:[%s11950_s2 + $0x408] sm:$0xff]  ;;  %v6443_v12 = vld [vmem:[%s11950_s2 + $0x438] sm:$0xff] }
 0x1d9   : > { %8990 = vmatprep.subr.bf16.mxu0 %v8989_v36 }
 0x1db   : > { %7782 = vmatmul.mubr.f32.gmra.mrb[16].mxu0 %v12094_v40  ;;  %v3241_v40 = vld [vmem:[#allocation6 + $0xb0] sm:$0xff] }
 0x1dc   : > { %7784 = vmatprep.mubr.f32.mxu0 %v12095_v41  ;;  %v3242_v41 = vld [vmem:[#allocation6 + $0xb8] sm:$0xff] }
 0x1df   : > { %7785 = vmatmul.mubr.f32.gmra.mrb[18].mxu0 %v12096_v27  ;;  %v6361_v27 = vld [vmem:[%s10274_s30 + $0x69] sm:$0xff] }
 0x1e0   : > { %7787 = vmatprep.mubr.f32.mxu0 %v12097_v17  ;;  %v6362_v17 = vld [vmem:[%s10274_s30 + $0x79] sm:$0xff] }
 0x1e3   : > { %7788 = vmatmul.mubr.f32.gmra.mrb[20].mxu0 %v12098_v45 }
 0x1e4   : > { %7790 = vmatprep.mubr.f32.mxu0 %v12099_v46  ;;  %v6444_v46 = vld [vmem:[%s11950_s2 + $0x440] sm:$0xff] }
 0x1e7   : > { %7791 = vmatmul.mubr.f32.gmra.mrb[22].mxu0 %v12100_v21  ;;  %v9065_v21 = vpack.c.bf16 %v3242_v41, %v3241_v40  ;;  %v6419_v40 = vld [vmem:[%s10274_s30 + $0xe2] sm:$0xff]  ;;  %v6420_v41 = vld [vmem:[%s10274_s30 + $0xf2] sm:$0xff] }
 0x1e8   : > { %7793 = vmatprep.mubr.f32.mxu0 %v12101_v50  ;;  %v6445_v50 = vld [vmem:[%s11950_s2 + $0x448] sm:$0xff] }
 0x1e9   : > { %v9037_v61 = vpack.c.bf16 %v6445_v50, %v6444_v46  ;;  %v6424_v46 = vld [vmem:[%s10274_s30 + $0x122] sm:$0xff]  ;;  %v6426_v50 = vld [vmem:[%s10274_s30 + $0x13a] sm:$0xff] }
 0x1eb   : > { %7794 = vmatmul.mubr.f32.gmra.mrb[24].mxu0 %v12102_v51  ;;  %v3243_v51 = vld [vmem:[#allocation6 + $0xc0] sm:$0xff] }
 0x1ec   : > { %7796 = vmatprep.mubr.f32.mxu0 %v12103_v18  ;;  %v3244_v18 = vld [vmem:[#allocation6 + $0xc8] sm:$0xff] }
 0x1ef   : > { %7797 = vmatmul.mubr.f32.gmra.mrb[26].mxu0 %v12104_v55  ;;  %v6363_v55 = vld [vmem:[%s10274_s30 + $0x81] sm:$0xff] }
 0x1f0   : > { %7799 = vmatprep.mubr.f32.mxu0 %v12105_v56  ;;  %v6364_v56 = vld [vmem:[%s10274_s30 + $0x91] sm:$0xff] }
 0x1f3   : > { %7800 = vmatmul.mubr.f32.gmra.mrb[28].mxu0 %v10819_v22  ;;  %v6392_v22 = vld [vmem:[%s11950_s2 + $0x3a0] sm:$0xff] }
 0x1f4   : > { %7802 = vmatprep.mubr.f32.mxu0 %v11072_v14  ;;  %v8997_v5 = vpack.c.bf16 %v6393_v4, %v6392_v22  ;;  %v6447_v22 = vld [vmem:[%s11950_s2 + $0x458] sm:$0xff]  ;;  %v3245_v4 = vld [vmem:[#allocation6 + $0xd0] sm:$0xff] }
 0x1f7   : > { %7803 = vmatmul.mubr.f32.gmra.mrb[30].mxu0 %v11077_v60 }
 0x1f8   : > { %7837 = vmatprep.mubr.f32.mxu0 %v10504_v28  ;;  %v6394_v28 = vld [vmem:[%s11950_s2 + $0x3b0] sm:$0xff] }
 0x1fb   : > { %7838 = vmatmul.mubr.f32.vlgmr.msra.gmra.mrb[0].mxu0 %v10515_v33  ;;  %v9001_v33 = vpack.c.bf16 %v6395_v6, %v6394_v28  ;;  %v6365_v28 = vld [vmem:[%s10274_s30 + $0x99] sm:$0xff]  ;;  %v6366_v6 = vld [vmem:[%s10274_s30 + $0xa9] sm:$0xff] }
 0x1fc   : > { %8992 = vmatpush3.bf16.msra.mxu0 %v8989_v36  ;;  %7840 = vmatprep.mubr.f32.mxu0 %v10518_v34  ;;  %v6396_v34 = vld [vmem:[%s11950_s2 + $0x3c0] sm:$0xff]  ;;  %v6442_v36 = vld [vmem:[%s11950_s2 + $0x430] sm:$0xff] }
 0x1fd   : > { %8994 = vmatprep.subr.bf16.mxu0 %v8993_v2  ;;  %v9033_v45 = vpack.c.bf16 %v6443_v12, %v6442_v36  ;;  %v6416_v36 = vld [vmem:[%s10274_s30 + $0xc2] sm:$0xff]  ;;  %v6418_v12 = vld [vmem:[%s10274_s30 + $0xda] sm:$0xff] }
 0x1ff   : > { %7841 = vmatmul.mubr.f32.gmra.mrb[2].mxu0 %v10529_v42  ;;  %v9005_v42 = vpack.c.bf16 %v6397_v8, %v6396_v34  ;;  %v6448_v8 = vld [vmem:[%s11950_s2 + $0x460] sm:$0xff] }
 0x200   : > { %7843 = vmatprep.mubr.f32.mxu0 %v10532_v43  ;;  %8996 = vmatpush3.bf16.msra.mxu0 %v8993_v2  ;;  %v6398_v43 = vld [vmem:[%s11950_s2 + $0x3d0] sm:$0xff]  ;;  %v9069_v2 = vpack.c.bf16 %v3244_v18, %v3243_v51  ;;  %v6427_v51 = vld [vmem:[%s10274_s30 + $0x142] sm:$0xff] }
 0x201   : > { %8998 = vmatprep.subr.bf16.mxu0 %v8997_v5  ;;  %v6428_v18 = vld [vmem:[%s10274_s30 + $0x152] sm:$0xff] }
 0x203   : > { %7844 = vmatmul.mubr.f32.gmra.mrb[4].mxu0 %v10543_v49  ;;  %v9009_v49 = vpack.c.bf16 %v6399_v10, %v6398_v43  ;;  %v6367_v43 = vld [vmem:[%s10274_s30 + $0xb1] sm:$0xff]  ;;  %v6368_v10 = vld [vmem:[%s10274_s30 + $0xc1] sm:$0xff] }
 0x204   : > { %7846 = vmatprep.mubr.f32.mxu0 %v10546_v52  ;;  %9000 = vmatpush3.bf16.msra.mxu0 %v8997_v5  ;;  %v6400_v52 = vld [vmem:[%s11950_s2 + $0x3e0] sm:$0xff]  ;;  %v3246_v5 = vld [vmem:[#allocation6 + $0xd8] sm:$0xff] }
 0x205   : > { %9002 = vmatprep.subr.bf16.mxu0 %v9001_v33  ;;  %v9073_v34 = vpack.c.bf16 %v3246_v5, %v3245_v4  ;;  %v3248_v4 = vld [vmem:[#allocation6 + $0xe8] sm:$0xff] }
 0x207   : > { %7847 = vmatmul.mubr.f32.gmra.mrb[6].mxu0 %v10557_v58  ;;  %v9013_v58 = vpack.c.bf16 %v6401_v11, %v6400_v52  ;;  %v6450_v52 = vld [vmem:[%s11950_s2 + $0x470] sm:$0xff]  ;;  %v6451_v11 = vld [vmem:[%s11950_s2 + $0x478] sm:$0xff] }
 0x208   : > { %7849 = vmatprep.mubr.f32.mxu0 %v10560_v59  ;;  %9004 = vmatpush3.bf16.msra.mxu0 %v9001_v33  ;;  %v6402_v59 = vld [vmem:[%s11950_s2 + $0x3f0] sm:$0xff]  ;;  %v9041_v33 = vpack.c.bf16 %v6447_v22, %v6446_v1  ;;  %v6434_v1 = vld [vmem:[%s10274_s30 + $0x19a] sm:$0xff] }
 0x209   : > { %9006 = vmatprep.subr.bf16.mxu0 %v9005_v42  ;;  %v3247_v22 = vld [vmem:[#allocation6 + $0xe0] sm:$0xff] }
 0x20a   : > { %v9077_v5 = vpack.c.bf16 %v3248_v4, %v3247_v22 }
 0x20b   : > { %7850 = vmatmul.mubr.f32.gmra.mrb[8].mxu0 %v10571_v3  ;;  %v9017_v3 = vpack.c.bf16 %v6403_v15, %v6402_v59  ;;  %v6370_v59 = vld [vmem:[%s10274_s30 + $0xd9] sm:$0xff]  ;;  %v9049_v15 = vpack.c.bf16 %v6451_v11, %v6450_v52  ;;  %v3190_v11 = vld [vmem:[#allocation6 + $0x20] sm:$0xff] }
 0x20c   : > { %7852 = vmatprep.mubr.f32.mxu0 %v10574_v19  ;;  %9008 = vmatpush3.bf16.msra.mxu0 %v9005_v42  ;;  %v6436_v19 = vld [vmem:[%s11950_s2 + $0x400] sm:$0xff]  ;;  %v6449_v42 = vld [vmem:[%s11950_s2 + $0x468] sm:$0xff] }
 0x20d   : > { %9010 = vmatprep.subr.bf16.mxu0 %v9009_v49 }
 0x20f   : > { %7853 = vmatmul.mubr.f32.gmra.mrb[10].mxu0 %v10585_v24  ;;  %v9021_v24 = vpack.c.bf16 %v6437_v16, %v6436_v19  ;;  %v6372_v19 = vld [vmem:[%s10274_s30 + $0xf1] sm:$0xff]  ;;  %v6373_v16 = vld [vmem:[%s10274_s30 + $0xf9] sm:$0xff] }
 0x210   : > { %7855 = vmatprep.mubr.f32.mxu0 %v10588_v25  ;;  %9012 = vmatpush3.bf16.msra.mxu0 %v9009_v49  ;;  %v6338_v25 = vld [vmem:[%s10274_s30 + $0x198] sm:$0xff]  ;;  %v9045_v49 = vpack.c.bf16 %v6449_v42, %v6448_v8  ;;  %v3186_v8 = vld [vmem:[#allocation6] sm:$0xff] }
 0x211   : > { %9014 = vmatprep.subr.bf16.mxu0 %v9013_v58  ;;  %v3187_v42 = vld [vmem:[#allocation6 + $0x8] sm:$0xff] }
 0x213   : > { %7856 = vmatmul.mubr.f32.gmra.mrb[12].mxu0 %v10593_v29  ;;  %v6339_v29 = vld [vmem:[%s10274_s30 + $0x1a0] sm:$0xff] }
 0x214   : > { %7858 = vmatprep.mubr.f32.mxu0 %v10596_v30  ;;  %9016 = vmatpush3.bf16.msra.mxu0 %v9013_v58  ;;  %v6356_v30 = vld [vmem:[%s10274_s30 + $0x31] sm:$0xff]  ;;  %v6369_v58 = vld [vmem:[%s10274_s30 + $0xc9] sm:$0xff] }
 0x215   : > { %9018 = vmatprep.subr.bf16.mxu0 %v9017_v3 }
 0x217   : > { %7859 = vmatmul.mubr.f32.gmra.mrb[14].mxu0 %v10601_v32  ;;  %v6438_v32 = vld [vmem:[%s11950_s2 + $0x410] sm:$0xff] }
 0x218   : > { %7861 = vmatprep.mubr.f32.mxu0 %v10604_v37  ;;  %9020 = vmatpush3.bf16.msra.mxu0 %v9017_v3  ;;  %v6439_v37 = vld [vmem:[%s11950_s2 + $0x418] sm:$0xff]  ;;  %v6371_v3 = vld [vmem:[%s10274_s30 + $0xe1] sm:$0xff] }
 0x219   : > { %9022 = vmatprep.subr.bf16.mxu0 %v9021_v24 }
 0x21b   : > { %7862 = vmatmul.mubr.f32.gmra.mrb[16].mxu0 %v10609_v38  ;;  %v3235_v38 = vld [vmem:[#allocation6 + $0x80] sm:$0xff] }
 0x21c   : > { %7864 = vmatprep.mubr.f32.mxu0 %v10612_v39  ;;  %v3236_v39 = vld [vmem:[#allocation6 + $0x88] sm:$0xff] }
 0x21f   : > { %7865 = vmatmul.mubr.f32.gmra.mrb[18].mxu0 %v10617_v44  ;;  %v3237_v44 = vld [vmem:[#allocation6 + $0x90] sm:$0xff] }
 0x220   : > { %7867 = vmatprep.mubr.f32.mxu0 %v10620_v47  ;;  %v6357_v47 = vld [vmem:[%s10274_s30 + $0x39] sm:$0xff] }
 0x223   : > { %7868 = vmatmul.mubr.f32.gmra.mrb[20].mxu0 %v10625_v48  ;;  %v9053_v48 = vpack.c.bf16 %v3236_v39, %v3235_v38  ;;  %v6380_v38 = vld [vmem:[%s10274_s30 + $0x151] sm:$0xff]  ;;  %v6381_v39 = vld [vmem:[%s10274_s30 + $0x159] sm:$0xff] }
 0x224   : > { %7870 = vmatprep.mubr.f32.mxu0 %v10628_v53  ;;  %v3238_v53 = vld [vmem:[#allocation6 + $0x98] sm:$0xff] }
 0x225   : > { %9054 = vmatprep.subr.bf16.mxu1 %v9053_v48 }
 0x226   : > { %9056 = vmatpush3.bf16.msra.mxu1 %v9053_v48  ;;  %v6386_v48 = vld [vmem:[%s10274_s30 + $0x199] sm:$0xff] }
 0x227   : > { %7871 = vmatmul.mubr.f32.gmra.mrb[22].mxu0 %v10633_v54  ;;  %v6358_v54 = vld [vmem:[%s10274_s30 + $0x49] sm:$0xff] }
 0x228   : > { %7873 = vmatprep.mubr.f32.mxu0 %v10636_v57  ;;  %v9025_v57 = vpack.c.bf16 %v6439_v37, %v6438_v32  ;;  %v6378_v32 = vld [vmem:[%s10274_s30 + $0x139] sm:$0xff]  ;;  %v6379_v37 = vld [vmem:[%s10274_s30 + $0x141] sm:$0xff] }
 0x22b   : > { %7874 = vmatmul.mubr.f32.gmra.mrb[24].mxu0 %v10641_v62  ;;  %v6440_v62 = vld [vmem:[%s11950_s2 + $0x420] sm:$0xff] }
 0x22c   : > { %7876 = vmatprep.mubr.f32.mxu0 %v10644_v63  ;;  %v9057_v63 = vpack.c.bf16 %v3238_v53, %v3237_v44  ;;  %v6382_v44 = vld [vmem:[%s10274_s30 + $0x169] sm:$0xff]  ;;  %v6387_v53 = vld [vmem:[%s10274_s30 + $0x1a1] sm:$0xff] }
 0x22e   : > { %9058 = vmatprep.subr.bf16.mxu1 %v9057_v63 }
 0x22f   : > { %7877 = vmatmul.mubr.f32.gmra.mrb[26].mxu0 %v10649_v0  ;;  %v6441_v0 = vld [vmem:[%s11950_s2 + $0x428] sm:$0xff]  ;;  %9060 = vmatpush3.bf16.msra.mxu1 %v9057_v63  ;;  %v6407_v63 = vld [vmem:[%s10274_s30 + $0x52] sm:$0xff] }
 0x230   : > { %7879 = vmatprep.mubr.f32.mxu0 %v10900_v23  ;;  %v3239_v23 = vld [vmem:[#allocation6 + $0xa0] sm:$0xff]  ;;  %v9029_v35 = vpack.c.bf16 %v6441_v0, %v6440_v62  ;;  %v6410_v0 = vld [vmem:[%s10274_s30 + $0x7a] sm:$0xff] }
 0x231   : > { %v6406_v62 = vld [vmem:[%s10274_s30 + $0x4a] sm:$0xff] }
 0x233   : > { %7880 = vmatmul.mubr.f32.gmra.mrb[28].mxu0 %v10905_v13  ;;  %v3240_v13 = vld [vmem:[#allocation6 + $0xa8] sm:$0xff] }
 0x234   : > { %7882 = vmatprep.mubr.f32.mxu0 %v6338_v25  ;;  %v9061_v26 = vpack.c.bf16 %v3240_v13, %v3239_v23  ;;  %v6375_v25 = vld [vmem:[%s10274_s30 + $0x111] sm:$0xff]  ;;  %v6411_v23 = vld [vmem:[%s10274_s30 + $0x82] sm:$0xff] }
 0x235   : > { %v6412_v13 = vld [vmem:[%s10274_s30 + $0x92] sm:$0xff] }
 0x236   : > { %9062 = vmatprep.subr.bf16.mxu1 %v9061_v26 }
 0x237   : > { %7883 = vmatmul.mubr.f32.gmra.mrb[30].mxu0 %v6339_v29  ;;  %9064 = vmatpush3.bf16.msra.mxu1 %v9061_v26  ;;  %v6376_v29 = vld [vmem:[%s10274_s30 + $0x121] sm:$0xff]  ;;  %v6417_v26 = vld [vmem:[%s10274_s30 + $0xca] sm:$0xff] }
 0x238   : > { %7917 = vmatprep.mubr.f32.mxu0 %v6356_v30  ;;  %9066 = vmatprep.subr.bf16.mxu1 %v9065_v21  ;;  %v6377_v30 = vld [vmem:[%s10274_s30 + $0x129] sm:$0xff] }
 0x23b   : > { %7918 = vmatmul.mubr.f32.vlgmr.msra.gmra.mrb[0].mxu0 %v6357_v47  ;;  %9068 = vmatpush3.bf16.msra.mxu1 %v9065_v21  ;;  %v6383_v47 = vld [vmem:[%s10274_s30 + $0x171] sm:$0xff] }
 0x23c   : > { %9024 = vmatpush3.bf16.msra.mxu0 %v9021_v24  ;;  %7920 = vmatprep.mubr.f32.mxu0 %v6358_v54  ;;  %v6374_v24 = vld [vmem:[%s10274_s30 + $0x109] sm:$0xff]  ;;  %v6404_v54 = vld [vmem:[%s10274_s30 + $0x32] sm:$0xff] }
 0x23d   : > { %9026 = vmatprep.subr.bf16.mxu0 %v9025_v57  ;;  %9070 = vmatprep.subr.bf16.mxu1 %v9069_v2  ;;  %v6425_v21 = vld [vmem:[%s10274_s30 + $0x12a] sm:$0xff] }
 0x23f   : > { %7921 = vmatmul.mubr.f32.gmra.mrb[2].mxu0 %v6359_v31  ;;  %9072 = vmatpush3.bf16.msra.mxu1 %v9069_v2  ;;  %v6413_v31 = vld [vmem:[%s10274_s30 + $0x9a] sm:$0xff]  ;;  %v6435_v2 = vld [vmem:[%s10274_s30 + $0x1a2] sm:$0xff] }
 0x240   : > { %7923 = vmatprep.mubr.f32.mxu0 %v6360_v20  ;;  %9028 = vmatpush3.bf16.msra.mxu0 %v9025_v57  ;;  %v6405_v57 = vld [vmem:[%s10274_s30 + $0x3a] sm:$0xff]  ;;  %v6414_v20 = vld [vmem:[%s10274_s30 + $0xaa] sm:$0xff] }
 0x241   : > { %9030 = vmatprep.subr.bf16.mxu0 %v9029_v35  ;;  %9074 = vmatprep.subr.bf16.mxu1 %v9073_v34 }
 0x243   : > { %7924 = vmatmul.mubr.f32.gmra.mrb[4].mxu0 %v6361_v27  ;;  %9076 = vmatpush3.bf16.msra.mxu1 %v9073_v34  ;;  %v6421_v27 = vld [vmem:[%s10274_s30 + $0xfa] sm:$0xff] }
 0x244   : > { %7926 = vmatprep.mubr.f32.mxu0 %v6362_v17  ;;  %9032 = vmatpush3.bf16.msra.mxu0 %v9029_v35  ;;  %v6415_v35 = vld [vmem:[%s10274_s30 + $0xb2] sm:$0xff]  ;;  %v6422_v17 = vld [vmem:[%s10274_s30 + $0x10a] sm:$0xff] }
 0x245   : > { %9034 = vmatprep.subr.bf16.mxu0 %v9033_v45  ;;  %9078 = vmatprep.subr.bf16.mxu1 %v9077_v5 }
 0x247   : > { %7927 = vmatmul.mubr.f32.gmra.mrb[6].mxu0 %v6363_v55  ;;  %v6429_v55 = vld [vmem:[%s10274_s30 + $0x15a] sm:$0xff]  ;;  %9080 = vmatpush3.bf16.msra.mxu1 %v9077_v5 }
 0x248   : > { %7929 = vmatprep.mubr.f32.mxu0 %v6364_v56  ;;  %9036 = vmatpush3.bf16.msra.mxu0 %v9033_v45  ;;  %v6423_v45 = vld [vmem:[%s10274_s30 + $0x112] sm:$0xff]  ;;  %v6430_v56 = vld [vmem:[%s10274_s30 + $0x16a] sm:$0xff] }
 0x249   : > { %9038 = vmatprep.subr.bf16.mxu0 %v9037_v61 }
 0x24b   : > { %7930 = vmatmul.mubr.f32.gmra.mrb[8].mxu0 %v6365_v28  ;;  %v10051_v28 = vmov 0.0  }
 0x24c   : > { %7932 = vmatprep.mubr.f32.mxu0 %v6366_v6  ;;  %9040 = vmatpush3.bf16.msra.mxu0 %v9037_v61  ;;  %v6431_v61 = vld [vmem:[%s10274_s30 + $0x172] sm:$0xff]  ;;  %3071 = vst [vmem:[#allocation2 + $0x20] sm:$0xff] %v10051_v28  ;;  %3072 = vst [vmem:[#allocation2 + $0x28] sm:$0x3] %v10051_v28 }
 0x24d   : > { %9042 = vmatprep.subr.bf16.mxu0 %v9041_v33  ;;  %3067 = vst [vmem:[#allocation2] sm:$0xff] %v10051_v28  ;;  %3068 = vst [vmem:[#allocation2 + $0x8] sm:$0xff] %v10051_v28 }
 0x24e   : > { %3069 = vst [vmem:[#allocation2 + $0x10] sm:$0x3] %v10051_v28  ;;  %3070 = vst [vmem:[#allocation2 + $0x18] sm:$0xff] %v10051_v28 }
 0x24f   : > { %7933 = vmatmul.mubr.f32.gmra.mrb[10].mxu0 %v6367_v43  ;;  %3073 = vst [vmem:[#allocation2 + $0x30] sm:$0xff] %v10051_v28  ;;  %3074 = vst [vmem:[#allocation2 + $0x38] sm:$0xff] %v10051_v28  ;;  %v9085_v43 = vpack.c.bf16 %v3187_v42, %v3186_v8 }
 0x250   : > { %7935 = vmatprep.mubr.f32.mxu0 %v6368_v10  ;;  %9044 = vmatpush3.bf16.msra.mxu0 %v9041_v33  ;;  %3075 = vst [vmem:[#allocation2 + $0x40] sm:$0x3] %v10051_v28  ;;  %3076 = vst [vmem:[#allocation2 + $0x48] sm:$0xff] %v10051_v28  ;;  %v3188_v10 = vld [vmem:[#allocation6 + $0x10] sm:$0xff] }
 0x251   : > { %9046 = vmatprep.subr.bf16.mxu0 %v9045_v49  ;;  %3077 = vst [vmem:[#allocation2 + $0x50] sm:$0xff] %v10051_v28  ;;  %3078 = vst [vmem:[#allocation2 + $0x58] sm:$0x3] %v10051_v28 }
 0x252   : > { %3079 = vst [vmem:[#allocation2 + $0x60] sm:$0xff] %v10051_v28  ;;  %3080 = vst [vmem:[#allocation2 + $0x68] sm:$0xff] %v10051_v28 }
 0x253   : > { %7936 = vmatmul.mubr.f32.gmra.mrb[12].mxu0 %v6369_v58  ;;  %3081 = vst [vmem:[#allocation2 + $0x70] sm:$0x3] %v10051_v28  ;;  %3082 = vst [vmem:[#allocation2 + $0x78] sm:$0xff] %v10051_v28  ;;  %v3191_v58 = vld [vmem:[#allocation6 + $0x28] sm:$0xff] }
 0x254   : > { %7938 = vmatprep.mubr.f32.mxu0 %v6370_v59  ;;  %9048 = vmatpush3.bf16.msra.mxu0 %v9045_v49  ;;  %3083 = vst [vmem:[#allocation2 + $0x80] sm:$0xff] %v10051_v28  ;;  %3084 = vst [vmem:[#allocation2 + $0x88] sm:$0x3] %v10051_v28  ;;  %v3202_v33 = vld [vmem:[#allocation2 + $0x1] sm:$0xff]  ;;  %v9093_v59 = vpack.c.bf16 %v3191_v58, %v3190_v11 }
 0x255   : > { %9050 = vmatprep.subr.bf16.mxu0 %v9049_v15  ;;  %3085 = vst [vmem:[#allocation2 + $0x90] sm:$0xff] %v10051_v28  ;;  %3086 = vst [vmem:[#allocation2 + $0x98] sm:$0xff] %v10051_v28  ;;  %8077 = vmatprep.mubr.f32.mxu1 %v3202_v33  ;;  %v3203_v34 = vld [vmem:[#allocation2 + $0x9] sm:$0xff] }
 0x256   : > { %3087 = vst [vmem:[#allocation2 + $0xa0] sm:$0x3] %v10051_v28  ;;  %3088 = vst [vmem:[#allocation2 + $0xa8] sm:$0xff] %v10051_v28  ;;  %v3189_v49 = vld [vmem:[#allocation6 + $0x18] sm:$0xff] }
 0x257   : > { %7939 = vmatmul.mubr.f32.gmra.mrb[14].mxu0 %v6371_v3  ;;  %3089 = vst [vmem:[#allocation2 + $0xb0] sm:$0xff] %v10051_v28  ;;  %3090 = vst [vmem:[#allocation2 + $0xb8] sm:$0x3] %v10051_v28  ;;  %v9089_v52 = vpack.c.bf16 %v3189_v49, %v3188_v10  ;;  %v3193_v3 = vld [vmem:[#allocation6 + $0x38] sm:$0xff] }
 0x258   : > { %7941 = vmatprep.mubr.f32.mxu0 %v6372_v19  ;;  %9052 = vmatpush3.bf16.msra.mxu0 %v9049_v15  ;;  %3091 = vst [vmem:[#allocation2 + $0xc0] sm:$0xff] %v10051_v28  ;;  %3092 = vst [vmem:[#allocation2 + $0xc8] sm:$0xff] %v10051_v28  ;;  %v3192_v15 = vld [vmem:[#allocation6 + $0x30] sm:$0xff] }
 0x259   : > { %3093 = vst [vmem:[#allocation2 + $0xd0] sm:$0x3] %v10051_v28  ;;  %3094 = vst [vmem:[#allocation2 + $0xd8] sm:$0xff] %v10051_v28  ;;  %v9097_v19 = vpack.c.bf16 %v3193_v3, %v3192_v15 }
 0x25a   : > { %3095 = vst [vmem:[#allocation2 + $0xe0] sm:$0xff] %v10051_v28  ;;  %3096 = vst [vmem:[#allocation2 + $0xe8] sm:$0x3] %v10051_v28 }
 0x25b   : > { %7942 = vmatmul.mubr.f32.gmra.mrb[16].mxu0 %v6373_v16  ;;  %3097 = vst [vmem:[#allocation2 + $0xf0] sm:$0xff] %v10051_v28  ;;  %3098 = vst [vmem:[#allocation2 + $0xf8] sm:$0xff] %v10051_v28  ;;  %v3194_v16 = vld [vmem:[#allocation6 + $0x40] sm:$0xff] }
 0x25c   : > { %7944 = vmatprep.mubr.f32.mxu0 %v6374_v24  ;;  %3099 = vst [vmem:[#allocation2 + $0x100] sm:$0x3] %v10051_v28  ;;  %3100 = vst [vmem:[#allocation2 + $0x108] sm:$0xff] %v10051_v28  ;;  %v3195_v24 = vld [vmem:[#allocation6 + $0x48] sm:$0xff] }
 0x25d   : > { %3101 = vst [vmem:[#allocation2 + $0x110] sm:$0xff] %v10051_v28  ;;  %3102 = vst [vmem:[#allocation2 + $0x118] sm:$0x3] %v10051_v28 }
 0x25e   : > { %3103 = vst [vmem:[#allocation2 + $0x120] sm:$0xff] %v10051_v28  ;;  %3104 = vst [vmem:[#allocation2 + $0x128] sm:$0xff] %v10051_v28 }
 0x25f   : > { %7945 = vmatmul.mubr.f32.gmra.mrb[18].mxu0 %v6375_v25  ;;  %3105 = vst [vmem:[#allocation2 + $0x130] sm:$0x3] %v10051_v28  ;;  %3106 = vst [vmem:[#allocation2 + $0x138] sm:$0xff] %v10051_v28  ;;  %v9101_v25 = vpack.c.bf16 %v3195_v24, %v3194_v16 }
 0x260   : > { %7947 = vmatprep.mubr.f32.mxu0 %v6376_v29  ;;  %3107 = vst [vmem:[#allocation2 + $0x140] sm:$0xff] %v10051_v28  ;;  %3108 = vst [vmem:[#allocation2 + $0x148] sm:$0x3] %v10051_v28  ;;  %v3196_v29 = vld [vmem:[#allocation6 + $0x50] sm:$0xff] }
 0x261   : > { %3109 = vst [vmem:[#allocation2 + $0x150] sm:$0xff] %v10051_v28  ;;  %3110 = vst [vmem:[#allocation2 + $0x158] sm:$0xff] %v10051_v28 }
 0x262   : > { %3111 = vst [vmem:[#allocation2 + $0x160] sm:$0x3] %v10051_v28  ;;  %3112 = vst [vmem:[#allocation2 + $0x168] sm:$0xff] %v10051_v28 }
 0x263   : > { %7948 = vmatmul.mubr.f32.gmra.mrb[20].mxu0 %v6377_v30  ;;  %3113 = vst [vmem:[#allocation2 + $0x170] sm:$0xff] %v10051_v28  ;;  %3114 = vst [vmem:[#allocation2 + $0x178] sm:$0x3] %v10051_v28  ;;  %v3197_v30 = vld [vmem:[#allocation6 + $0x58] sm:$0xff] }
 0x264   : > { %7950 = vmatprep.mubr.f32.mxu0 %v6378_v32  ;;  %3115 = vst [vmem:[#allocation2 + $0x180] sm:$0xff] %v10051_v28  ;;  %3116 = vst [vmem:[#allocation2 + $0x188] sm:$0xff] %v10051_v28  ;;  %v9105_v32 = vpack.c.bf16 %v3197_v30, %v3196_v29 }
 0x265   : > { %3117 = vst [vmem:[#allocation2 + $0x190] sm:$0x3] %v10051_v28  ;;  %3118 = vst [vmem:[#allocation2 + $0x198] sm:$0xff] %v10051_v28 }
 0x266   : > { %3119 = vst [vmem:[#allocation2 + $0x1a0] sm:$0xff] %v10051_v28  ;;  %3120 = vst [vmem:[#allocation2 + $0x1a8] sm:$0x3] %v10051_v28 }
 0x267   : > { %7951 = vmatmul.mubr.f32.gmra.mrb[22].mxu0 %v6379_v37  ;;  %v3198_v37 = vld [vmem:[#allocation6 + $0x60] sm:$0xff] }
 0x268   : > { %7953 = vmatprep.mubr.f32.mxu0 %v6380_v38  ;;  %v3199_v38 = vld [vmem:[#allocation6 + $0x68] sm:$0xff] }
 0x26b   : > { %7954 = vmatmul.mubr.f32.gmra.mrb[24].mxu0 %v6381_v39  ;;  %v9109_v39 = vpack.c.bf16 %v3199_v38, %v3198_v37 }
 0x26c   : > { %7956 = vmatprep.mubr.f32.mxu0 %v6382_v44  ;;  %v3200_v44 = vld [vmem:[#allocation6 + $0x70] sm:$0xff] }
 0x26f   : > { %7957 = vmatmul.mubr.f32.gmra.mrb[26].mxu0 %v6383_v47  ;;  %v3201_v47 = vld [vmem:[#allocation6 + $0x78] sm:$0xff] }
 0x270   : > { %7959 = vmatprep.mubr.f32.mxu0 %v10986_v7  ;;  %v6408_v7 = vld [vmem:[%s10274_s30 + $0x62] sm:$0xff] }
 0x273   : > { %7960 = vmatmul.mubr.f32.gmra.mrb[28].mxu0 %v10991_v9  ;;  %v6409_v9 = vld [vmem:[%s10274_s30 + $0x6a] sm:$0xff] }
 0x274   : > { %7962 = vmatprep.mubr.f32.mxu0 %v6386_v48  ;;  %v9113_v48 = vpack.c.bf16 %v3201_v47, %v3200_v44 }
 0x277   : > { %7963 = vmatmul.mubr.f32.gmra.mrb[30].mxu0 %v6387_v53  ;;  %v3734_v53 = vld [vmem:[#allocation6 + $0x100] sm:$0xff] }
 0x278   : > { %7997 = vmatprep.mubr.f32.mxu0 %v6404_v54  ;;  %v3735_v54 = vld [vmem:[#allocation6 + $0x108] sm:$0xff] }
 0x27b   : > { %7998 = vmatmul.mubr.f32.vlgmr.msra.gmra.mrb[0].mxu0 %v6405_v57  ;;  %v11320_v57 = vpack.c.bf16 %v3735_v54, %v3734_v53 }
 0x27c   : > { %8000 = vmatprep.mubr.f32.mxu0 %v6406_v62  ;;  %v11326_v62 = vld [vmem:[%s11951_s3] ss:$0 sm:$0xff] }
 0x27f   : > { %8001 = vmatmul.mubr.f32.gmra.mrb[2].mxu0 %v6407_v63 }
 0x280   : > { %8003 = vmatprep.mubr.f32.mxu0 %v6408_v7 }
 0x283   : > { %8004 = vmatmul.mubr.f32.gmra.mrb[4].mxu0 %v6409_v9 }
 0x284   : > { %8006 = vmatprep.mubr.f32.mxu0 %v6410_v0 }
 0x287   : > { %8007 = vmatmul.mubr.f32.gmra.mrb[6].mxu0 %v6411_v23 }
 0x288   : > { %8009 = vmatprep.mubr.f32.mxu0 %v6412_v13 }
 0x28b   : > { %8010 = vmatmul.mubr.f32.gmra.mrb[8].mxu0 %v6413_v31 }
 0x28c   : > { %8012 = vmatprep.mubr.f32.mxu0 %v6414_v20 }
 0x28f   : > { %8013 = vmatmul.mubr.f32.gmra.mrb[10].mxu0 %v6415_v35 }
 0x290   : > { %8015 = vmatprep.mubr.f32.mxu0 %v6416_v36 }
 0x293   : > { %8016 = vmatmul.mubr.f32.gmra.mrb[12].mxu0 %v6417_v26 }
 0x294   : > { %8018 = vmatprep.mubr.f32.mxu0 %v6418_v12 }
 0x297   : > { %8019 = vmatmul.mubr.f32.gmra.mrb[14].mxu0 %v6419_v40 }
 0x298   : > { %8021 = vmatprep.mubr.f32.mxu0 %v6420_v41 }
 0x29b   : > { %8022 = vmatmul.mubr.f32.gmra.mrb[16].mxu0 %v6421_v27 }
 0x29c   : > { %8024 = vmatprep.mubr.f32.mxu0 %v6422_v17 }
 0x29f   : > { %8025 = vmatmul.mubr.f32.gmra.mrb[18].mxu0 %v6423_v45 }
 0x2a0   : > { %8027 = vmatprep.mubr.f32.mxu0 %v6424_v46 }
 0x2a3   : > { %8028 = vmatmul.mubr.f32.gmra.mrb[20].mxu0 %v6425_v21 }
 0x2a4   : > { %8030 = vmatprep.mubr.f32.mxu0 %v6426_v50 }
 0x2a7   : > { %8031 = vmatmul.mubr.f32.gmra.mrb[22].mxu0 %v6427_v51 }
 0x2a8   : > { %8033 = vmatprep.mubr.f32.mxu0 %v6428_v18 }
 0x2ab   : > { %8034 = vmatmul.mubr.f32.gmra.mrb[24].mxu0 %v6429_v55 }
 0x2ac   : > { %8036 = vmatprep.mubr.f32.mxu0 %v6430_v56 }
 0x2af   : > { %8037 = vmatmul.mubr.f32.gmra.mrb[26].mxu0 %v6431_v61 }
 0x2b0   : > { %8039 = vmatprep.mubr.f32.mxu0 %v11072_v14  ;;  %v3249_v14 = vld [vmem:[#allocation6 + $0xf0] sm:$0xff] }
 0x2b3   : > { %8040 = vmatmul.mubr.f32.gmra.mrb[28].mxu0 %v11077_v60  ;;  %v3250_v60 = vld [vmem:[#allocation6 + $0xf8] sm:$0xff] }
 0x2b4   : > { %8042 = vmatprep.mubr.f32.mxu0 %v6434_v1  ;;  %v9081_v6 = vpack.c.bf16 %v3250_v60, %v3249_v14 }
 0x2b6   : > { %9082 = vmatprep.subr.bf16.mxu1 %v9081_v6 }
 0x2b7   : > { %8043 = vmatmul.mubr.f32.gmra.mrb[30].mxu0 %v6435_v2  ;;  %9084 = vmatpush3.bf16.msra.mxu1 %v9081_v6 }
 0x2b8   : > { %9086 = vmatprep.subr.bf16.mxu1 %v9085_v43 }
 0x2ba   : > { %8078 = vmatmul.mubr.f32.vlgmr.msra.gmra.mrb[0].mxu1 %v3203_v34 }
 0x2bb   : > { %9088 = vmatpush3.bf16.msra.mxu1 %v9085_v43 }
 0x2bc   : > { %9090 = vmatprep.subr.bf16.mxu1 %v9089_v52 }
 0x2bf   : > { %9092 = vmatpush3.bf16.msra.mxu1 %v9089_v52 }
 0x2c0   : > { %9094 = vmatprep.subr.bf16.mxu1 %v9093_v59 }
 0x2c3   : > { %9096 = vmatpush3.bf16.msra.mxu1 %v9093_v59 }
 0x2c4   : > { %9098 = vmatprep.subr.bf16.mxu1 %v9097_v19 }
 0x2c7   : > { %9100 = vmatpush3.bf16.msra.mxu1 %v9097_v19 }
 0x2c8   : > { %9102 = vmatprep.subr.bf16.mxu1 %v9101_v25 }
 0x2cb   : > { %9104 = vmatpush3.bf16.msra.mxu1 %v9101_v25 }
 0x2cc   : > { %9106 = vmatprep.subr.bf16.mxu1 %v9105_v32 }
 0x2cf   : > { %9108 = vmatpush3.bf16.msra.mxu1 %v9105_v32 }
 0x2d0   : > { %9110 = vmatprep.subr.bf16.mxu1 %v9109_v39 }
 0x2d3   : > { %9112 = vmatpush3.bf16.msra.mxu1 %v9109_v39 }
 0x2d4   : > { %9114 = vmatprep.subr.bf16.mxu1 %v9113_v48 }
 0x2d7   : > { %9116 = vmatpush3.bf16.msra.mxu1 %v9113_v48 }
 0x2d8   : > { %9118 = vmatprep.subr.bf16.mxu1 %v11320_v57 }
 0x34e   : > { %v7999_v63 = vpop.f32.mrb[0].mxu0 }
 0x34f   : > { %v3004_v7 = vadd.f32 %v7999_v63, %v11326_v62  ;;  %v2805_v9 = vpop.f32.mrb[1].mxu0 }
 0x350   : > { %v3003_v0 = vadd.f32 %v11326_v62, %v2805_v9 }
 0x351   : > { %v3036_v23 = vmax.f32 %v3004_v7, 0.0 }
 0x352   : > { %v3035_v13 = vmax.f32 %v3003_v0, 0.0  ;;  %v8002_v31 = vpop.f32.mrb[2].mxu0 }
 0x353   : > { %3123 = vst [vmem:[#allocation2 + $0x21] sm:$0xff] %v3036_v23  ;;  %v3006_v20 = vadd.f32 %v8002_v31, %v11326_v62  ;;  %v2815_v35 = vpop.f32.mrb[3].mxu0 }
 0x354   : > { %3122 = vst [vmem:[#allocation2 + $0x19] sm:$0xff] %v3035_v13  ;;  %v3005_v36 = vadd.f32 %v11326_v62, %v2815_v35  ;;  %8080 = vmatprep.mubr.f32.mxu1 %v3035_v13 }
 0x355   : > { %v3038_v26 = vmax.f32 %v3006_v20, 0.0  ;;  %8081 = vmatmul.mubr.f32.gmra.mrb[2].mxu1 %v3036_v23 }
 0x356   : > { %v3037_v12 = vmax.f32 %v3005_v36, 0.0  ;;  %v8005_v40 = vpop.f32.mrb[4].mxu0 }
 0x357   : > { %3125 = vst [vmem:[#allocation2 + $0x39] sm:$0xff] %v3038_v26  ;;  %v3008_v41 = vadd.f32 %v8005_v40, %v11326_v62  ;;  %v2825_v27 = vpop.f32.mrb[5].mxu0 }
 0x358   : > { %3124 = vst [vmem:[#allocation2 + $0x31] sm:$0xff] %v3037_v12  ;;  %v3007_v17 = vadd.f32 %v11326_v62, %v2825_v27  ;;  %8083 = vmatprep.mubr.f32.mxu1 %v3037_v12 }
 0x359   : > { %v3040_v45 = vmax.f32 %v3008_v41, 0.0  ;;  %8084 = vmatmul.mubr.f32.gmra.mrb[4].mxu1 %v3038_v26 }
 0x35a   : > { %v3039_v46 = vmax.f32 %v3007_v17, 0.0  ;;  %v8008_v21 = vpop.f32.mrb[6].mxu0 }
 0x35b   : > { %3127 = vst [vmem:[#allocation2 + $0x51] sm:$0xff] %v3040_v45  ;;  %v3010_v50 = vadd.f32 %v8008_v21, %v11326_v62  ;;  %v2835_v51 = vpop.f32.mrb[7].mxu0 }
 0x35c   : > { %3126 = vst [vmem:[#allocation2 + $0x49] sm:$0xff] %v3039_v46  ;;  %v3009_v18 = vadd.f32 %v11326_v62, %v2835_v51  ;;  %8086 = vmatprep.mubr.f32.mxu1 %v3039_v46 }
 0x35d   : > { %v3042_v55 = vmax.f32 %v3010_v50, 0.0  ;;  %8087 = vmatmul.mubr.f32.gmra.mrb[6].mxu1 %v3040_v45 }
 0x35e   : > { %v3041_v56 = vmax.f32 %v3009_v18, 0.0  ;;  %v8011_v61 = vpop.f32.mrb[8].mxu0 }
 0x35f   : > { %3129 = vst [vmem:[#allocation2 + $0x69] sm:$0xff] %v3042_v55  ;;  %v3012_v1 = vadd.f32 %v8011_v61, %v11326_v62  ;;  %v2845_v2 = vpop.f32.mrb[9].mxu0 }
 0x360   : > { %3128 = vst [vmem:[#allocation2 + $0x61] sm:$0xff] %v3041_v56  ;;  %v3011_v22 = vadd.f32 %v11326_v62, %v2845_v2  ;;  %8089 = vmatprep.mubr.f32.mxu1 %v3041_v56 }
 0x361   : > { %v3044_v4 = vmax.f32 %v3012_v1, 0.0  ;;  %8090 = vmatmul.mubr.f32.gmra.mrb[8].mxu1 %v3042_v55 }
 0x362   : > { %v3043_v5 = vmax.f32 %v3011_v22, 0.0  ;;  %v8014_v14 = vpop.f32.mrb[10].mxu0 }
 0x363   : > { %3131 = vst [vmem:[#allocation2 + $0x81] sm:$0xff] %v3044_v4  ;;  %v3014_v60 = vadd.f32 %v8014_v14, %v11326_v62  ;;  %v2855_v6 = vpop.f32.mrb[11].mxu0 }
 0x364   : > { %3130 = vst [vmem:[#allocation2 + $0x79] sm:$0xff] %v3043_v5  ;;  %v3013_v33 = vadd.f32 %v11326_v62, %v2855_v6  ;;  %8092 = vmatprep.mubr.f32.mxu1 %v3043_v5 }
 0x365   : > { %v3046_v34 = vmax.f32 %v3014_v60, 0.0  ;;  %8093 = vmatmul.mubr.f32.gmra.mrb[10].mxu1 %v3044_v4 }
 0x366   : > { %v11340_v8 = vmax.f32 %v3013_v33, 0.0  ;;  %v8017_v42 = vpop.f32.mrb[12].mxu0  ;;  %v3736_v33 = vld [vmem:[#allocation6 + $0x110] sm:$0xff] }
 0x367   : > { %3133 = vst [vmem:[#allocation2 + $0x99] sm:$0xff] %v3046_v34  ;;  %v3016_v43 = vadd.f32 %v8017_v42, %v11326_v62  ;;  %v2865_v10 = vpop.f32.mrb[13].mxu0 }
 0x368   : > { %3132 = vst [vmem:[#allocation2 + $0x91] sm:$0xff] %v11340_v8  ;;  %v3015_v49 = vadd.f32 %v11326_v62, %v2865_v10  ;;  %8095 = vmatprep.mubr.f32.mxu1 %v11340_v8 }
 0x369   : > { %v11346_v52 = vmax.f32 %v3016_v43, 0.0  ;;  %8096 = vmatmul.mubr.f32.gmra.mrb[12].mxu1 %v3046_v34  ;;  %v3737_v34 = vld [vmem:[#allocation6 + $0x118] sm:$0xff] }
 0x36a   : > { %v11348_v11 = vmax.f32 %v3015_v49, 0.0  ;;  %v8020_v58 = vpop.f32.mrb[14].mxu0  ;;  %v9121_v10 = vpack.c.bf16 %v3737_v34, %v3736_v33  ;;  %v3739_v49 = vld [vmem:[#allocation6 + $0x128] sm:$0xff] }
 0x36b   : > { %3135 = vst [vmem:[#allocation2 + $0xb1] sm:$0xff] %v11346_v52  ;;  %v3018_v59 = vadd.f32 %v8020_v58, %v11326_v62  ;;  %v2875_v15 = vpop.f32.mrb[15].mxu0  ;;  %v11448_v58 = vld [vmem:[#allocation2 + $0x18] sm:$0xff] }
 0x36c   : > { %3134 = vst [vmem:[#allocation2 + $0xa9] sm:$0xff] %v11348_v11  ;;  %v3017_v3 = vadd.f32 %v11326_v62, %v2875_v15  ;;  %8098 = vmatprep.mubr.f32.mxu1 %v11348_v11  ;;  %v11452_v15 = vld [vmem:[#allocation2 + $0x20] sm:$0xff] }
 0x36d   : > { %v11355_v19 = vmax.f32 %v3018_v59, 0.0  ;;  %8099 = vmatmul.mubr.f32.gmra.mrb[14].mxu1 %v11346_v52 }
 0x36e   : > { %v11358_v16 = vmax.f32 %v3017_v3, 0.0  ;;  %v8023_v24 = vpop.f32.mrb[16].mxu0  ;;  %v3740_v3 = vld [vmem:[#allocation6 + $0x130] sm:$0xff] }
 0x36f   : > { %3137 = vst [vmem:[#allocation2 + $0xc9] sm:$0xff] %v11355_v19  ;;  %v3020_v25 = vadd.f32 %v8023_v24, %v11326_v62  ;;  %v2885_v29 = vpop.f32.mrb[17].mxu0  ;;  %v3741_v24 = vld [vmem:[#allocation6 + $0x138] sm:$0xff] }
 0x370   : > { %3136 = vst [vmem:[#allocation2 + $0xc1] sm:$0xff] %v11358_v16  ;;  %v3019_v30 = vadd.f32 %v11326_v62, %v2885_v29  ;;  %8101 = vmatprep.mubr.f32.mxu1 %v11358_v16  ;;  %v11458_v29 = vld [vmem:[#allocation2 + $0x38] sm:$0xff] }
 0x371   : > { %v11365_v32 = vmax.f32 %v3020_v25, 0.0  ;;  %8102 = vmatmul.mubr.f32.gmra.mrb[16].mxu1 %v11355_v19  ;;  %v11455_v25 = vld [vmem:[#allocation2 + $0x30] sm:$0xff] }
 0x372   : > { %v11368_v37 = vmax.f32 %v3019_v30, 0.0  ;;  %v8026_v38 = vpop.f32.mrb[18].mxu0  ;;  %v3742_v30 = vld [vmem:[#allocation6 + $0x140] sm:$0xff] }
 0x373   : > { %3139 = vst [vmem:[#allocation2 + $0xe1] sm:$0xff] %v11365_v32  ;;  %v3022_v39 = vadd.f32 %v8026_v38, %v11326_v62  ;;  %v2895_v44 = vpop.f32.mrb[19].mxu0  ;;  %v3743_v38 = vld [vmem:[#allocation6 + $0x148] sm:$0xff] }
 0x374   : > { %3138 = vst [vmem:[#allocation2 + $0xd9] sm:$0xff] %v11368_v37  ;;  %v3021_v47 = vadd.f32 %v11326_v62, %v2895_v44  ;;  %8104 = vmatprep.mubr.f32.mxu1 %v11368_v37  ;;  %v11464_v44 = vld [vmem:[#allocation2 + $0x50] sm:$0xff] }
 0x375   : > { %v11375_v48 = vmax.f32 %v3022_v39, 0.0  ;;  %8105 = vmatmul.mubr.f32.gmra.mrb[18].mxu1 %v11365_v32  ;;  %v9133_v39 = vpack.c.bf16 %v3743_v38, %v3742_v30 }
 0x376   : > { %v11378_v53 = vmax.f32 %v3021_v47, 0.0  ;;  %v8029_v54 = vpop.f32.mrb[20].mxu0  ;;  %v3744_v47 = vld [vmem:[#allocation6 + $0x150] sm:$0xff] }
 0x377   : > { %3141 = vst [vmem:[#allocation2 + $0xf9] sm:$0xff] %v11375_v48  ;;  %v3024_v63 = vadd.f32 %v8029_v54, %v11326_v62  ;;  %v2905_v7 = vpop.f32.mrb[21].mxu0  ;;  %v3745_v54 = vld [vmem:[#allocation6 + $0x158] sm:$0xff] }
 0x378   : > { %3140 = vst [vmem:[#allocation2 + $0xf1] sm:$0xff] %v11378_v53  ;;  %v3023_v9 = vadd.f32 %v11326_v62, %v2905_v7  ;;  %8107 = vmatprep.mubr.f32.mxu1 %v11378_v53  ;;  %v9137_v7 = vpack.c.bf16 %v3745_v54, %v3744_v47  ;;  %v3701_v47 = vld [vmem:[#allocation2 + $0x2] sm:$0xff] }
 0x379   : > { %v11385_v0 = vmax.f32 %v3024_v63, 0.0  ;;  %8108 = vmatmul.mubr.f32.gmra.mrb[20].mxu1 %v11375_v48  ;;  %v11467_v63 = vld [vmem:[#allocation2 + $0x60] sm:$0xff] }
 0x37a   : > { %v11388_v23 = vmax.f32 %v3023_v9, 0.0  ;;  %v8032_v13 = vpop.f32.mrb[22].mxu0  ;;  %v11470_v9 = vld [vmem:[#allocation2 + $0x68] sm:$0xff] }
 0x37b   : > { %3143 = vst [vmem:[#allocation2 + $0x111] sm:$0xff] %v11385_v0  ;;  %v3026_v31 = vadd.f32 %v8032_v13, %v11326_v62  ;;  %v2915_v20 = vpop.f32.mrb[23].mxu0  ;;  %v3746_v13 = vld [vmem:[#allocation6 + $0x160] sm:$0xff]  ;;  %v11500_v33 = vld [vmem:[#allocation2 + $0xe0] sm:$0xff] }
 0x37c   : > { %3142 = vst [vmem:[#allocation2 + $0x109] sm:$0xff] %v11388_v23  ;;  %v3025_v35 = vadd.f32 %v11326_v62, %v2915_v20  ;;  %8110 = vmatprep.mubr.f32.mxu1 %v11388_v23  ;;  %v11473_v20 = vld [vmem:[#allocation2 + $0x78] sm:$0xff] }
 0x37d   : > { %v11395_v36 = vmax.f32 %v3026_v31, 0.0  ;;  %8111 = vmatmul.mubr.f32.gmra.mrb[22].mxu1 %v11385_v0  ;;  %v3747_v31 = vld [vmem:[#allocation6 + $0x168] sm:$0xff] }
 0x37e   : > { %v11398_v26 = vmax.f32 %v3025_v35, 0.0  ;;  %v8035_v12 = vpop.f32.mrb[24].mxu0  ;;  %v9141_v35 = vpack.c.bf16 %v3747_v31, %v3746_v13  ;;  %v4043_v13 = vld [vmem:[#allocation6 + $0x198] sm:$0xff] }
 0x37f   : > { %3145 = vst [vmem:[#allocation2 + $0x129] sm:$0xff] %v11395_v36  ;;  %v3028_v40 = vadd.f32 %v8035_v12, %v11326_v62  ;;  %v2925_v41 = vpop.f32.mrb[25].mxu0  ;;  %v11476_v12 = vld [vmem:[#allocation2 + $0x80] sm:$0xff]  ;;  %v11503_v34 = vld [vmem:[#allocation2 + $0xf0] sm:$0xff] }
 0x380   : > { %3144 = vst [vmem:[#allocation2 + $0x121] sm:$0xff] %v11398_v26  ;;  %v3027_v27 = vadd.f32 %v11326_v62, %v2925_v41  ;;  %8113 = vmatprep.mubr.f32.mxu1 %v11398_v26  ;;  %v3749_v41 = vld [vmem:[#allocation6 + $0x178] sm:$0xff] }
 0x381   : > { %v11405_v17 = vmax.f32 %v3028_v40, 0.0  ;;  %8114 = vmatmul.mubr.f32.gmra.mrb[24].mxu1 %v11395_v36  ;;  %v3748_v40 = vld [vmem:[#allocation6 + $0x170] sm:$0xff]  ;;  %v3702_v31 = vld [vmem:[#allocation2 + $0xa] sm:$0xff] }
 0x382   : > { %v11408_v45 = vmax.f32 %v3027_v27, 0.0  ;;  %v8038_v46 = vpop.f32.mrb[26].mxu0  ;;  %v11479_v27 = vld [vmem:[#allocation2 + $0x90] sm:$0xff] }
 0x383   : > { %3147 = vst [vmem:[#allocation2 + $0x141] sm:$0xff] %v11405_v17  ;;  %v3030_v21 = vadd.f32 %v8038_v46, %v11326_v62  ;;  %v2935_v50 = vpop.f32.mrb[27].mxu0  ;;  %v9145_v46 = vpack.c.bf16 %v3749_v41, %v3748_v40  ;;  %v4044_v40 = vld [vmem:[#allocation6 + $0x1a0] sm:$0xff]  ;;  %v4045_v41 = vld [vmem:[#allocation6 + $0x1a8] sm:$0xff] }
 0x384   : > { %3146 = vst [vmem:[#allocation2 + $0x139] sm:$0xff] %v11408_v45  ;;  %v3029_v51 = vadd.f32 %v11326_v62, %v2935_v50  ;;  %8116 = vmatprep.mubr.f32.mxu1 %v11408_v45  ;;  %v4040_v50 = vld [vmem:[#allocation6 + $0x180] sm:$0xff] }
 0x385   : > { %v11415_v18 = vmax.f32 %v3030_v21, 0.0  ;;  %8117 = vmatmul.mubr.f32.gmra.mrb[26].mxu1 %v11405_v17  ;;  %v11482_v21 = vld [vmem:[#allocation2 + $0x98] sm:$0xff] }
 0x386   : > { %v11418_v55 = vmax.f32 %v3029_v51, 0.0  ;;  %v8041_v56 = vpop.f32.mrb[28].mxu0  ;;  %v4041_v51 = vld [vmem:[#allocation6 + $0x188] sm:$0xff] }
 0x387   : > { %3149 = vst [vmem:[#allocation2 + $0x159] sm:$0xff] %v11415_v18  ;;  %v3032_v61 = vadd.f32 %v8041_v56, %v11326_v62  ;;  %v2945_v1 = vpop.f32.mrb[29].mxu0  ;;  %v11485_v56 = vld [vmem:[#allocation2 + $0xa8] sm:$0xff] }
 0x388   : > { %3148 = vst [vmem:[#allocation2 + $0x151] sm:$0xff] %v11418_v55  ;;  %v3031_v2 = vadd.f32 %v11326_v62, %v2945_v1  ;;  %8119 = vmatprep.mubr.f32.mxu1 %v11418_v55  ;;  %v11488_v1 = vld [vmem:[#allocation2 + $0xb0] sm:$0xff] }
 0x389   : > { %v11425_v22 = vmax.f32 %v3032_v61, 0.0  ;;  %8120 = vmatmul.mubr.f32.gmra.mrb[28].mxu1 %v11415_v18  ;;  %v9149_v61 = vpack.c.bf16 %v4041_v51, %v4040_v50  ;;  %v9157_v50 = vpack.c.bf16 %v4045_v41, %v4044_v40  ;;  %v11542_v51 = vld [vmem:[#allocation2 + $0x22] sm:$0xff]  ;;  %v11554_v41 = vld [vmem:[#allocation2 + $0x52] sm:$0xff] }
 0x38a   : > { %v11428_v4 = vmax.f32 %v3031_v2, 0.0  ;;  %v8044_v5 = vpop.f32.mrb[30].mxu0  ;;  %v11491_v2 = vld [vmem:[#allocation2 + $0xc0] sm:$0xff]  ;;  %12109 = vst [vmem:[#allocation15_spill] sm:$0xff] %v11542_v51  ;;  %12113 = vst [vmem:[#allocation19_spill] sm:$0xff] %v11554_v41 }
 0x38b   : > { %3151 = vst [vmem:[#allocation2 + $0x171] sm:$0xff] %v11425_v22  ;;  %v11432_v14 = vadd.f32 %v8044_v5, %v11326_v62  ;;  %v2955_v60 = vpop.f32.mrb[31].mxu0  ;;  %v11494_v5 = vld [vmem:[#allocation2 + $0xc8] sm:$0xff] }
 0x38c   : > { %3150 = vst [vmem:[#allocation2 + $0x169] sm:$0xff] %v11428_v4  ;;  %v11436_v6 = vadd.f32 %v11326_v62, %v2955_v60  ;;  %8122 = vmatprep.mubr.f32.mxu1 %v11428_v4  ;;  %v3738_v62 = vld [vmem:[#allocation6 + $0x120] sm:$0xff]  ;;  %v11497_v60 = vld [vmem:[#allocation2 + $0xd8] sm:$0xff] }
 0x38d   : > { %12106 = vst [vmem:[#allocation12_spill] sm:$0xff] %v11432_v14  ;;  %v11991_v42 = vmax.f32 %v11432_v14, 0.0  ;;  %8123 = vmatmul.mubr.f32.gmra.mrb[30].mxu1 %v11425_v22  ;;  %v9125_v59 = vpack.c.bf16 %v3739_v49, %v3738_v62  ;;  %v11509_v62 = vld [vmem:[#allocation2 + $0x108] sm:$0xff]  ;;  %v11512_v49 = vld [vmem:[#allocation2 + $0x110] sm:$0xff] }
 0x38e   : > { %v11992_v43 = vmax.f32 %v11436_v6, 0.0  ;;  %8157 = vmatprep.mubr.f32.mxu1 %v10051_v28  ;;  %v11545_v14 = vld [vmem:[#allocation2 + $0x32] sm:$0xff] }
 0x38f   : > { %3153 = vst [vmem:[#allocation2 + $0x189] sm:$0xff] %v11991_v42  ;;  %v11527_v30 = vld [vmem:[#allocation2 + $0x150] sm:$0xff]  ;;  %v11530_v38 = vld [vmem:[#allocation2 + $0x158] sm:$0xff]  ;;  %v4046_v42 = vld [vmem:[#allocation6 + $0x1b0] sm:$0xff] }
 0x390   : > { %3152 = vst [vmem:[#allocation2 + $0x181] sm:$0xff] %v11992_v43  ;;  %v4047_v43 = vld [vmem:[#allocation6 + $0x1b8] sm:$0xff]  ;;  %12110 = vst [vmem:[#allocation16_spill] sm:$0xff] %v11545_v14 }
 0x391   : > { %8158 = vmatmul.mubr.f32.vlgmr.msra.gmra.mrb[0].mxu1 %v10051_v28  ;;  %v9129_v28 = vpack.c.bf16 %v3741_v24, %v3740_v3  ;;  %v11518_v3 = vld [vmem:[#allocation2 + $0x128] sm:$0xff]  ;;  %v11521_v24 = vld [vmem:[#allocation2 + $0x138] sm:$0xff] }
 0x392   : > { %8160 = vmatprep.mubr.f32.mxu1 %v11448_v58  ;;  %9120 = vmatpush3.bf16.msra.mxu1 %v11320_v57  ;;  %v11461_v57 = vld [vmem:[#allocation2 + $0x48] sm:$0xff] }
 0x393   : > { %9122 = vmatprep.subr.bf16.mxu1 %v9121_v10  ;;  %v11536_v54 = vld [vmem:[#allocation2 + $0x170] sm:$0xff] }
 0x394   : > { %12108 = vst [vmem:[#allocation14_spill] sm:$0xff] %v11536_v54 }
 0x395   : > { %8161 = vmatmul.mubr.f32.gmra.mrb[2].mxu1 %v11452_v15 }
 0x396   : > { %8163 = vmatprep.mubr.f32.mxu1 %v11455_v25  ;;  %9124 = vmatpush3.bf16.msra.mxu1 %v9121_v10  ;;  %v11506_v10 = vld [vmem:[#allocation2 + $0xf8] sm:$0xff] }
 0x397   : > { %9126 = vmatprep.subr.bf16.mxu1 %v9125_v59 }
 0x399   : > { %8164 = vmatmul.mubr.f32.gmra.mrb[4].mxu1 %v11458_v29 }
 0x39a   : > { %8166 = vmatprep.mubr.f32.mxu1 %v11461_v57  ;;  %9128 = vmatpush3.bf16.msra.mxu1 %v9125_v59  ;;  %v11515_v59 = vld [vmem:[#allocation2 + $0x120] sm:$0xff] }
 0x39b   : > { %9130 = vmatprep.subr.bf16.mxu1 %v9129_v28 }
 0x39d   : > { %8167 = vmatmul.mubr.f32.gmra.mrb[6].mxu1 %v11464_v44 }
 0x39e   : > { %8169 = vmatprep.mubr.f32.mxu1 %v11467_v63  ;;  %9132 = vmatpush3.bf16.msra.mxu1 %v9129_v28  ;;  %v11524_v28 = vld [vmem:[#allocation2 + $0x140] sm:$0xff] }
 0x39f   : > { %9134 = vmatprep.subr.bf16.mxu1 %v9133_v39 }
 0x3a1   : > { %8170 = vmatmul.mubr.f32.gmra.mrb[8].mxu1 %v11470_v9 }
 0x3a2   : > { %8172 = vmatprep.mubr.f32.mxu1 %v11473_v20  ;;  %9136 = vmatpush3.bf16.msra.mxu1 %v9133_v39  ;;  %v11533_v39 = vld [vmem:[#allocation2 + $0x168] sm:$0xff] }
 0x3a3   : > { %9138 = vmatprep.subr.bf16.mxu1 %v9137_v7  ;;  %12107 = vst [vmem:[#allocation13_spill] sm:$0xff] %v11533_v39 }
 0x3a5   : > { %8173 = vmatmul.mubr.f32.gmra.mrb[10].mxu1 %v11476_v12 }
 0x3a6   : > { %8175 = vmatprep.mubr.f32.mxu1 %v11479_v27  ;;  %9140 = vmatpush3.bf16.msra.mxu1 %v9137_v7  ;;  %v4042_v7 = vld [vmem:[#allocation6 + $0x190] sm:$0xff] }
 0x3a7   : > { %9142 = vmatprep.subr.bf16.mxu1 %v9141_v35 }
 0x3a9   : > { %8176 = vmatmul.mubr.f32.gmra.mrb[12].mxu1 %v11482_v21 }
 0x3aa   : > { %8178 = vmatprep.mubr.f32.mxu1 %v11485_v56  ;;  %9144 = vmatpush3.bf16.msra.mxu1 %v9141_v35  ;;  %v9153_v35 = vpack.c.bf16 %v4043_v13, %v4042_v7  ;;  %v11548_v7 = vld [vmem:[#allocation2 + $0x3a] sm:$0xff]  ;;  %v4048_v13 = vld [vmem:[#allocation6 + $0x1c0] sm:$0xff] }
 0x3ab   : > { %9146 = vmatprep.subr.bf16.mxu1 %v9145_v46  ;;  %12111 = vst [vmem:[#allocation17_spill] sm:$0xff] %v11548_v7 }
 0x3ad   : > { %8179 = vmatmul.mubr.f32.gmra.mrb[14].mxu1 %v11488_v1 }
 0x3ae   : > { %8181 = vmatprep.mubr.f32.mxu1 %v11491_v2  ;;  %9148 = vmatpush3.bf16.msra.mxu1 %v9145_v46  ;;  %v11539_v46 = vld [vmem:[#allocation2 + $0x1a] sm:$0xff] }
 0x3af   : > { %9150 = vmatprep.subr.bf16.mxu1 %v9149_v61 }
 0x3b1   : > { %8182 = vmatmul.mubr.f32.gmra.mrb[16].mxu1 %v11494_v5 }
 0x3b2   : > { %8184 = vmatprep.mubr.f32.mxu1 %v11497_v60 }
 0x3b5   : > { %8185 = vmatmul.mubr.f32.gmra.mrb[18].mxu1 %v11500_v33 }
 0x3b6   : > { %8187 = vmatprep.mubr.f32.mxu1 %v11503_v34 }
 0x3b9   : > { %8188 = vmatmul.mubr.f32.gmra.mrb[20].mxu1 %v11506_v10 }
 0x3ba   : > { %8190 = vmatprep.mubr.f32.mxu1 %v11509_v62 }
 0x3bd   : > { %8191 = vmatmul.mubr.f32.gmra.mrb[22].mxu1 %v11512_v49 }
 0x3be   : > { %8193 = vmatprep.mubr.f32.mxu1 %v11515_v59 }
 0x3c1   : > { %8194 = vmatmul.mubr.f32.gmra.mrb[24].mxu1 %v11518_v3 }
 0x3c2   : > { %8196 = vmatprep.mubr.f32.mxu1 %v11521_v24 }
 0x3c5   : > { %8197 = vmatmul.mubr.f32.gmra.mrb[26].mxu1 %v11524_v28 }
 0x3c6   : > { %8199 = vmatprep.mubr.f32.mxu1 %v11527_v30 }
 0x3c9   : > { %8200 = vmatmul.mubr.f32.gmra.mrb[28].mxu1 %v11530_v38 }
 0x3ca   : > { %8202 = vmatprep.mubr.f32.mxu1 %v11533_v39 }
 0x3cd   : > { %8203 = vmatmul.mubr.f32.gmra.mrb[30].mxu1 %v11536_v54 }
 0x3ce   : > { %8237 = vmatprep.mubr.f32.mxu1 %v3701_v47  ;;  %v9161_v47 = vpack.c.bf16 %v4047_v43, %v4046_v42  ;;  %v11557_v42 = vld [vmem:[#allocation2 + $0x62] sm:$0xff] }
 0x3cf   : > { %12114 = vst [vmem:[#allocation20_spill] sm:$0xff] %v11557_v42 }
 0x3d1   : > { %8238 = vmatmul.mubr.f32.vlgmr.msra.gmra.mrb[0].mxu1 %v3702_v31  ;;  %v4049_v31 = vld [vmem:[#allocation6 + $0x1c8] sm:$0xff] }
 0x3d2   : > { %8240 = vmatprep.mubr.f32.mxu1 %v11539_v46  ;;  %9152 = vmatpush3.bf16.msra.mxu1 %v9149_v61  ;;  %v11551_v61 = vld [vmem:[#allocation2 + $0x4a] sm:$0xff]  ;;  %v9165_v40 = vpack.c.bf16 %v4049_v31, %v4048_v13  ;;  %v11566_v31 = vld [vmem:[#allocation2 + $0x82] sm:$0xff] }
 0x3d3   : > { %9154 = vmatprep.subr.bf16.mxu1 %v9153_v35  ;;  %12112 = vst [vmem:[#allocation18_spill] sm:$0xff] %v11551_v61 }
 0x3d5   : > { %8241 = vmatmul.mubr.f32.gmra.mrb[2].mxu1 %v11542_v51  ;;  %v4050_v51 = vld [vmem:[#allocation6 + $0x1d0] sm:$0xff] }
 0x3d6   : > { %8243 = vmatprep.mubr.f32.mxu1 %v11545_v14  ;;  %9156 = vmatpush3.bf16.msra.mxu1 %v9153_v35  ;;  %v4051_v14 = vld [vmem:[#allocation6 + $0x1d8] sm:$0xff] }
 0x3d7   : > { %9158 = vmatprep.subr.bf16.mxu1 %v9157_v50  ;;  %v9169_v43 = vpack.c.bf16 %v4051_v14, %v4050_v51  ;;  %v11560_v35 = vld [vmem:[#allocation2 + $0x6a] sm:$0xff]  ;;  %v11569_v14 = vld [vmem:[#allocation2 + $0x92] sm:$0xff] }
 0x3d8   : > { %12115 = vst [vmem:[#allocation21_spill] sm:$0xff] %v11560_v35 }
 0x3d9   : > { %8244 = vmatmul.mubr.f32.gmra.mrb[4].mxu1 %v11548_v7  ;;  %v4052_v7 = vld [vmem:[#allocation6 + $0x1e0] sm:$0xff] }
 0x3da   : > { %8246 = vmatprep.mubr.f32.mxu1 %v11551_v61  ;;  %9160 = vmatpush3.bf16.msra.mxu1 %v9157_v50  ;;  %v4053_v61 = vld [vmem:[#allocation6 + $0x1e8] sm:$0xff] }
 0x3db   : > { %9162 = vmatprep.subr.bf16.mxu1 %v9161_v47  ;;  %v11563_v50 = vld [vmem:[#allocation2 + $0x7a] sm:$0xff]  ;;  %v9173_v13 = vpack.c.bf16 %v4053_v61, %v4052_v7  ;;  %v11575_v7 = vld [vmem:[#allocation2 + $0xaa] sm:$0xff] }
 0x3dc   : > { %12116 = vst [vmem:[#allocation22_spill] sm:$0xff] %v11563_v50  ;;  %12117 = vst [vmem:[#allocation23_spill] sm:$0xff] %v11575_v7 }
 0x3dd   : > { %8247 = vmatmul.mubr.f32.gmra.mrb[6].mxu1 %v11554_v41  ;;  %v4054_v41 = vld [vmem:[#allocation6 + $0x1f0] sm:$0xff] }
 0x3de   : > { %8249 = vmatprep.mubr.f32.mxu1 %v11557_v42  ;;  %9164 = vmatpush3.bf16.msra.mxu1 %v9161_v47  ;;  %v4055_v42 = vld [vmem:[#allocation6 + $0x1f8] sm:$0xff]  ;;  %v11572_v47 = vld [vmem:[#allocation2 + $0x9a] sm:$0xff] }
 0x3df   : > { %9166 = vmatprep.subr.bf16.mxu1 %v9165_v40  ;;  %v9177_v51 = vpack.c.bf16 %v4055_v42, %v4054_v41  ;;  %v11584_v41 = vld [vmem:[#allocation2 + $0xca] sm:$0xff]  ;;  %v11587_v42 = vld [vmem:[#allocation2 + $0xda] sm:$0xff] }
 0x3e0   : > { %12120 = vst [vmem:[#allocation26_spill] sm:$0xff] %v11584_v41  ;;  %12121 = vst [vmem:[#allocation27_spill] sm:$0xff] %v11587_v42 }
 0x3e1   : > { %8250 = vmatmul.mubr.f32.gmra.mrb[8].mxu1 %v11560_v35  ;;  %v4346_v35 = vld [vmem:[#allocation6 + $0x200] sm:$0xff] }
 0x3e2   : > { %8252 = vmatprep.mubr.f32.mxu1 %v11563_v50  ;;  %9168 = vmatpush3.bf16.msra.mxu1 %v9165_v40  ;;  %v4347_v50 = vld [vmem:[#allocation6 + $0x208] sm:$0xff] }
 0x3e3   : > { %9170 = vmatprep.subr.bf16.mxu1 %v9169_v43  ;;  %v9181_v61 = vpack.c.bf16 %v4347_v50, %v4346_v35  ;;  %v11578_v40 = vld [vmem:[#allocation2 + $0xb2] sm:$0xff]  ;;  %v11596_v50 = vld [vmem:[#allocation2 + $0xfa] sm:$0xff] }
 0x3e4   : > { %12118 = vst [vmem:[#allocation24_spill] sm:$0xff] %v11578_v40  ;;  %v11593_v35 = vld [vmem:[#allocation2 + $0xf2] sm:$0xff]  ;;  %12124 = vst [vmem:[#allocation30_spill] sm:$0xff] %v11596_v50 }
 0x3e5   : > { %8253 = vmatmul.mubr.f32.gmra.mrb[10].mxu1 %v11566_v31  ;;  %12123 = vst [vmem:[#allocation29_spill] sm:$0xff] %v11593_v35 }
 0x3e6   : > { %8255 = vmatprep.mubr.f32.mxu1 %v11569_v14  ;;  %9172 = vmatpush3.bf16.msra.mxu1 %v9169_v43  ;;  %v11581_v43 = vld [vmem:[#allocation2 + $0xc2] sm:$0xff] }
 0x3e7   : > { %9174 = vmatprep.subr.bf16.mxu1 %v9173_v13  ;;  %12119 = vst [vmem:[#allocation25_spill] sm:$0xff] %v11581_v43 }
 0x3e9   : > { %8256 = vmatmul.mubr.f32.gmra.mrb[12].mxu1 %v11572_v47 }
 0x3ea   : > { %8258 = vmatprep.mubr.f32.mxu1 %v11575_v7  ;;  %9176 = vmatpush3.bf16.msra.mxu1 %v9173_v13  ;;  %v11590_v13 = vld [vmem:[#allocation2 + $0xe2] sm:$0xff]  ;;  %v4351_v7 = vld [vmem:[#allocation6 + $0x228] sm:$0xff] }
 0x3eb   : > { %9178 = vmatprep.subr.bf16.mxu1 %v9177_v51  ;;  %12122 = vst [vmem:[#allocation28_spill] sm:$0xff] %v11590_v13 }
 0x3ed   : > { %8259 = vmatmul.mubr.f32.gmra.mrb[14].mxu1 %v11578_v40  ;;  %v4350_v40 = vld [vmem:[#allocation6 + $0x220] sm:$0xff] }
 0x3ee   : > { %8261 = vmatprep.mubr.f32.mxu1 %v11581_v43  ;;  %9180 = vmatpush3.bf16.msra.mxu1 %v9177_v51  ;;  %v11599_v51 = vld [vmem:[#allocation2 + $0x10a] sm:$0xff]  ;;  %v4348_v43 = vld [vmem:[#allocation6 + $0x210] sm:$0xff] }
 0x3ef   : > { %9182 = vmatprep.subr.bf16.mxu1 %v9181_v61  ;;  %12125 = vst [vmem:[#allocation31_spill] sm:$0xff] %v11599_v51 }
 0x3f1   : > { %8262 = vmatmul.mubr.f32.gmra.mrb[16].mxu1 %v11584_v41  ;;  %v11602_v41 = vld [vmem:[#allocation2 + $0x112] sm:$0xff] }
 0x3f2   : > { %8264 = vmatprep.mubr.f32.mxu1 %v11587_v42  ;;  %12126 = vst [vmem:[#allocation32_spill] sm:$0xff] %v11602_v41  ;;  %v11605_v42 = vld [vmem:[#allocation2 + $0x122] sm:$0xff] }
 0x3f3   : > { %12127 = vst [vmem:[#allocation33_spill] sm:$0xff] %v11605_v42 }
 0x3f5   : > { %8265 = vmatmul.mubr.f32.gmra.mrb[18].mxu1 %v11590_v13  ;;  %v11608_v13 = vld [vmem:[#allocation2 + $0x12a] sm:$0xff] }
 0x3f6   : > { %8267 = vmatprep.mubr.f32.mxu1 %v11593_v35  ;;  %12128 = vst [vmem:[#allocation34_spill] sm:$0xff] %v11608_v13  ;;  %v11611_v35 = vld [vmem:[#allocation2 + $0x13a] sm:$0xff] }
 0x3f7   : > { %12129 = vst [vmem:[#allocation35_spill] sm:$0xff] %v11611_v35 }
 0x3f9   : > { %8268 = vmatmul.mubr.f32.gmra.mrb[20].mxu1 %v11596_v50  ;;  %v11614_v50 = vld [vmem:[#allocation2 + $0x142] sm:$0xff] }
 0x3fa   : > { %8270 = vmatprep.mubr.f32.mxu1 %v11599_v51  ;;  %12130 = vst [vmem:[#allocation36_spill] sm:$0xff] %v11614_v50  ;;  %v11617_v51 = vld [vmem:[#allocation2 + $0x152] sm:$0xff] }
 0x3fb   : > { %12131 = vst [vmem:[#allocation37_spill] sm:$0xff] %v11617_v51 }
 0x3fd   : > { %8271 = vmatmul.mubr.f32.gmra.mrb[22].mxu1 %v11602_v41  ;;  %v11620_v41 = vld [vmem:[#allocation2 + $0x15a] sm:$0xff] }
 0x3fe   : > { %8273 = vmatprep.mubr.f32.mxu1 %v11605_v42  ;;  %12132 = vst [vmem:[#allocation38_spill] sm:$0xff] %v11620_v41  ;;  %v11623_v42 = vld [vmem:[#allocation2 + $0x16a] sm:$0xff] }
 0x3ff   : > { %12133 = vst [vmem:[#allocation39_spill] sm:$0xff] %v11623_v42 }
 0x401   : > { %8274 = vmatmul.mubr.f32.gmra.mrb[24].mxu1 %v11608_v13  ;;  %v11626_v13 = vld [vmem:[#allocation2 + $0x172] sm:$0xff] }
 0x402   : > { %8276 = vmatprep.mubr.f32.mxu1 %v11611_v35  ;;  %12134 = vst [vmem:[#allocation40_spill] sm:$0xff] %v11626_v13  ;;  %v4349_v35 = vld [vmem:[#allocation6 + $0x218] sm:$0xff] }
 0x405   : > { %8277 = vmatmul.mubr.f32.gmra.mrb[26].mxu1 %v11614_v50  ;;  %v9185_v50 = vpack.c.bf16 %v4349_v35, %v4348_v43  ;;  %v4355_v43 = vld [vmem:[#allocation6 + $0x248] sm:$0xff]  ;;  %v4358_v35 = vld [vmem:[#allocation6 + $0x260] sm:$0xff] }
 0x406   : > { %8279 = vmatprep.mubr.f32.mxu1 %v11617_v51  ;;  %v4352_v51 = vld [vmem:[#allocation6 + $0x230] sm:$0xff] }
 0x409   : > { %8280 = vmatmul.mubr.f32.gmra.mrb[28].mxu1 %v11620_v41  ;;  %v9189_v41 = vpack.c.bf16 %v4351_v7, %v4350_v40  ;;  %v4357_v7 = vld [vmem:[#allocation6 + $0x258] sm:$0xff] }
 0x40a   : > { %8282 = vmatprep.mubr.f32.mxu1 %v11623_v42  ;;  %v4353_v42 = vld [vmem:[#allocation6 + $0x238] sm:$0xff] }
 0x40d   : > { %8283 = vmatmul.mubr.f32.gmra.mrb[30].mxu1 %v11626_v13  ;;  %v9193_v13 = vpack.c.bf16 %v4353_v42, %v4352_v51  ;;  %v4359_v42 = vld [vmem:[#allocation6 + $0x268] sm:$0xff]  ;;  %v4361_v51 = vld [vmem:[#allocation6 + $0x278] sm:$0xff] }
 0x40e   : > { %8317 = vmatprep.mubr.f32.mxu1 %v11448_v58  ;;  %v4354_v58 = vld [vmem:[#allocation6 + $0x240] sm:$0xff] }
 0x411   : > { %8318 = vmatmul.mubr.f32.vlgmr.msra.gmra.mrb[0].mxu1 %v11452_v15  ;;  %v9197_v15 = vpack.c.bf16 %v4355_v43, %v4354_v58  ;;  %v4652_v58 = vld [vmem:[#allocation6 + $0x280] sm:$0xff]  ;;  %v4653_v43 = vld [vmem:[#allocation6 + $0x288] sm:$0xff] }
 0x412   : > { %8320 = vmatprep.mubr.f32.mxu1 %v11455_v25  ;;  %9184 = vmatpush3.bf16.msra.mxu1 %v9181_v61  ;;  %v4356_v61 = vld [vmem:[#allocation6 + $0x250] sm:$0xff] }
 0x413   : > { %9186 = vmatprep.subr.bf16.mxu1 %v9185_v50  ;;  %v9201_v40 = vpack.c.bf16 %v4357_v7, %v4356_v61  ;;  %v11659_v61 = vld [vmem:[#allocation2 + $0x180] sm:$0xff]  ;;  %v11662_v7 = vld [vmem:[#allocation2 + $0x188] sm:$0xff] }
 0x414   : > { %12135 = vst [vmem:[#allocation41_spill] sm:$0xff] %v11659_v61  ;;  %12136 = vst [vmem:[#allocation42_spill] sm:$0xff] %v11662_v7 }
 0x415   : > { %8321 = vmatmul.mubr.f32.gmra.mrb[2].mxu1 %v11458_v29 }
 0x416   : > { %8323 = vmatprep.mubr.f32.mxu1 %v11461_v57  ;;  %9188 = vmatpush3.bf16.msra.mxu1 %v9185_v50  ;;  %v4360_v50 = vld [vmem:[#allocation6 + $0x270] sm:$0xff] }
 0x417   : > { %9190 = vmatprep.subr.bf16.mxu1 %v9189_v41 }
 0x419   : > { %8324 = vmatmul.mubr.f32.gmra.mrb[4].mxu1 %v11464_v44 }
 0x41a   : > { %8326 = vmatprep.mubr.f32.mxu1 %v11467_v63  ;;  %9192 = vmatpush3.bf16.msra.mxu1 %v9189_v41  ;;  %v9205_v41 = vpack.c.bf16 %v4359_v42, %v4358_v35  ;;  %v4655_v35 = vld [vmem:[#allocation6 + $0x298] sm:$0xff]  ;;  %v4313_v42 = vld [vmem:[#allocation2 + $0x19] sm:$0xff] }
 0x41b   : > { %9194 = vmatprep.subr.bf16.mxu1 %v9193_v13 }
 0x41d   : > { %8327 = vmatmul.mubr.f32.gmra.mrb[6].mxu1 %v11470_v9 }
 0x41e   : > { %8329 = vmatprep.mubr.f32.mxu1 %v11473_v20  ;;  %9196 = vmatpush3.bf16.msra.mxu1 %v9193_v13  ;;  %v9209_v13 = vpack.c.bf16 %v4361_v51, %v4360_v50  ;;  %v4314_v50 = vld [vmem:[#allocation2 + $0x21] sm:$0xff]  ;;  %v4656_v51 = vld [vmem:[#allocation6 + $0x2a0] sm:$0xff] }
 0x41f   : > { %9198 = vmatprep.subr.bf16.mxu1 %v9197_v15 }
 0x421   : > { %8330 = vmatmul.mubr.f32.gmra.mrb[8].mxu1 %v11476_v12 }
 0x422   : > { %8332 = vmatprep.mubr.f32.mxu1 %v11479_v27  ;;  %9200 = vmatpush3.bf16.msra.mxu1 %v9197_v15  ;;  %v9213_v15 = vpack.c.bf16 %v4653_v43, %v4652_v58  ;;  %v11665_v58 = vld [vmem:[#allocation2 + $0x31] sm:$0xff] }
 0x423   : > { %9202 = vmatprep.subr.bf16.mxu1 %v9201_v40 }
 0x425   : > { %8333 = vmatmul.mubr.f32.gmra.mrb[10].mxu1 %v11482_v21 }
 0x426   : > { %8335 = vmatprep.mubr.f32.mxu1 %v11485_v56  ;;  %9204 = vmatpush3.bf16.msra.mxu1 %v9201_v40  ;;  %v4654_v40 = vld [vmem:[#allocation6 + $0x290] sm:$0xff] }
 0x427   : > { %9206 = vmatprep.subr.bf16.mxu1 %v9205_v41 }
 0x429   : > { %8336 = vmatmul.mubr.f32.gmra.mrb[12].mxu1 %v11488_v1 }
 0x42a   : > { %8338 = vmatprep.mubr.f32.mxu1 %v11491_v2  ;;  %9208 = vmatpush3.bf16.msra.mxu1 %v9205_v41  ;;  %v9217_v41 = vpack.c.bf16 %v4655_v35, %v4654_v40  ;;  %v11674_v35 = vld [vmem:[#allocation2 + $0x51] sm:$0xff] }
 0x42b   : > { %9210 = vmatprep.subr.bf16.mxu1 %v9209_v13  ;;  %12139 = vst [vmem:[#allocation45_spill] sm:$0xff] %v11674_v35 }
 0x42d   : > { %8339 = vmatmul.mubr.f32.gmra.mrb[14].mxu1 %v11494_v5 }
 0x42e   : > { %8341 = vmatprep.mubr.f32.mxu1 %v11497_v60  ;;  %9212 = vmatpush3.bf16.msra.mxu1 %v9209_v13  ;;  %v4657_v13 = vld [vmem:[#allocation6 + $0x2a8] sm:$0xff] }
 0x42f   : > { %9214 = vmatprep.subr.bf16.mxu1 %v9213_v15  ;;  %v9221_v43 = vpack.c.bf16 %v4657_v13, %v4656_v51  ;;  %v11680_v13 = vld [vmem:[#allocation2 + $0x69] sm:$0xff] }
 0x430   : > { %12141 = vst [vmem:[#allocation47_spill] sm:$0xff] %v11680_v13 }
 0x431   : > { %8342 = vmatmul.mubr.f32.gmra.mrb[16].mxu1 %v11500_v33 }
 0x432   : > { %8344 = vmatprep.mubr.f32.mxu1 %v11503_v34 }
 0x435   : > { %8345 = vmatmul.mubr.f32.gmra.mrb[18].mxu1 %v11506_v10 }
 0x436   : > { %8347 = vmatprep.mubr.f32.mxu1 %v11509_v62 }
 0x439   : > { %8348 = vmatmul.mubr.f32.gmra.mrb[20].mxu1 %v11512_v49 }
 0x43a   : > { %8350 = vmatprep.mubr.f32.mxu1 %v11515_v59 }
 0x43d   : > { %8351 = vmatmul.mubr.f32.gmra.mrb[22].mxu1 %v11518_v3 }
 0x43e   : > { %8353 = vmatprep.mubr.f32.mxu1 %v11521_v24 }
 0x441   : > { %8354 = vmatmul.mubr.f32.gmra.mrb[24].mxu1 %v11524_v28 }
 0x442   : > { %8356 = vmatprep.mubr.f32.mxu1 %v11527_v30 }
 0x445   : > { %8357 = vmatmul.mubr.f32.gmra.mrb[26].mxu1 %v11530_v38 }
 0x446   : > { %8359 = vmatprep.mubr.f32.mxu1 %v11533_v39  ;;  %v4659_v39 = vld [vmem:[#allocation6 + $0x2b8] sm:$0xff] }
 0x449   : > { %8360 = vmatmul.mubr.f32.gmra.mrb[28].mxu1 %v11536_v54  ;;  %v4658_v54 = vld [vmem:[#allocation6 + $0x2b0] sm:$0xff] }
 0x44a   : > { %8362 = vmatprep.mubr.f32.mxu1 %v11659_v61  ;;  %v11668_v61 = vld [vmem:[#allocation2 + $0x39] sm:$0xff]  ;;  %v9225_v40 = vpack.c.bf16 %v4659_v39, %v4658_v54 }
 0x44b   : > { %12137 = vst [vmem:[#allocation43_spill] sm:$0xff] %v11668_v61  ;;  %v11683_v39 = vld [vmem:[#allocation2 + $0x79] sm:$0xff] }
 0x44d   : > { %8363 = vmatmul.mubr.f32.gmra.mrb[30].mxu1 %v11662_v7  ;;  %v11671_v7 = vld [vmem:[#allocation2 + $0x49] sm:$0xff] }
 0x44e   : > { %8397 = vmatprep.mubr.f32.mxu1 %v4313_v42  ;;  %12138 = vst [vmem:[#allocation44_spill] sm:$0xff] %v11671_v7  ;;  %v4660_v42 = vld [vmem:[#allocation6 + $0x2c0] sm:$0xff] }
 0x451   : > { %8398 = vmatmul.mubr.f32.vlgmr.msra.gmra.mrb[0].mxu1 %v4314_v50  ;;  %v4661_v50 = vld [vmem:[#allocation6 + $0x2c8] sm:$0xff] }
 0x452   : > { %8400 = vmatprep.mubr.f32.mxu1 %v11665_v58  ;;  %9216 = vmatpush3.bf16.msra.mxu1 %v9213_v15  ;;  %v11677_v15 = vld [vmem:[#allocation2 + $0x61] sm:$0xff]  ;;  %v9229_v51 = vpack.c.bf16 %v4661_v50, %v4660_v42  ;;  %v11690_v42 = vld [vmem:[#allocation2 + $0x99] sm:$0xff] }
 0x453   : > { %9218 = vmatprep.subr.bf16.mxu1 %v9217_v41  ;;  %12140 = vst [vmem:[#allocation46_spill] sm:$0xff] %v11677_v15  ;;  %v4666_v50 = vld [vmem:[#allocation6 + $0x2f0] sm:$0xff] }
 0x455   : > { %8401 = vmatmul.mubr.f32.gmra.mrb[2].mxu1 %v11668_v61  ;;  %v4662_v61 = vld [vmem:[#allocation6 + $0x2d0] sm:$0xff] }
 0x456   : > { %8403 = vmatprep.mubr.f32.mxu1 %v11671_v7  ;;  %9220 = vmatpush3.bf16.msra.mxu1 %v9217_v41  ;;  %v4663_v7 = vld [vmem:[#allocation6 + $0x2d8] sm:$0xff] }
 0x457   : > { %9222 = vmatprep.subr.bf16.mxu1 %v9221_v43  ;;  %v9233_v54 = vpack.c.bf16 %v4663_v7, %v4662_v61  ;;  %v11686_v41 = vld [vmem:[#allocation2 + $0x81] sm:$0xff]  ;;  %v4959_v7 = vld [vmem:[#allocation6 + $0x300] sm:$0xff] }
 0x459   : > { %8404 = vmatmul.mubr.f32.gmra.mrb[4].mxu1 %v11674_v35  ;;  %v4664_v35 = vld [vmem:[#allocation6 + $0x2e0] sm:$0xff] }
 0x45a   : > { %8406 = vmatprep.mubr.f32.mxu1 %v11677_v15  ;;  %9224 = vmatpush3.bf16.msra.mxu1 %v9221_v43  ;;  %v4665_v15 = vld [vmem:[#allocation6 + $0x2e8] sm:$0xff] }
 0x45b   : > { %9226 = vmatprep.subr.bf16.mxu1 %v9225_v40  ;;  %v9237_v43 = vpack.c.bf16 %v4665_v15, %v4664_v35  ;;  %v4969_v15 = vld [vmem:[#allocation6 + $0x350] sm:$0xff] }
 0x45d   : > { %8407 = vmatmul.mubr.f32.gmra.mrb[6].mxu1 %v11680_v13  ;;  %v4667_v13 = vld [vmem:[#allocation6 + $0x2f8] sm:$0xff] }
 0x45e   : > { %8409 = vmatprep.mubr.f32.mxu1 %v11683_v39  ;;  %9228 = vmatpush3.bf16.msra.mxu1 %v9225_v40  ;;  %v9241_v61 = vpack.c.bf16 %v4667_v13, %v4666_v50  ;;  %v4960_v40 = vld [vmem:[#allocation6 + $0x308] sm:$0xff]  ;;  %v4971_v50 = vld [vmem:[#allocation6 + $0x360] sm:$0xff] }
 0x45f   : > { %9230 = vmatprep.subr.bf16.mxu1 %v9229_v51  ;;  %v12151_v13 = vld [vmem:[#allocation21_spill] sm:$0xff] }
 0x461   : > { %8410 = vmatmul.mubr.f32.gmra.mrb[8].mxu1 %v11686_v41 }
 0x462   : > { %8412 = vmatprep.mubr.f32.mxu1 %v11340_v8  ;;  %9232 = vmatpush3.bf16.msra.mxu1 %v9229_v51  ;;  %v9245_v8 = vpack.c.bf16 %v4960_v40, %v4959_v7  ;;  %v4970_v51 = vld [vmem:[#allocation6 + $0x358] sm:$0xff]  ;;  %v4973_v40 = vld [vmem:[#allocation6 + $0x370] sm:$0xff] }
 0x463   : > { %9234 = vmatprep.subr.bf16.mxu1 %v9233_v54 }
 0x465   : > { %8413 = vmatmul.mubr.f32.gmra.mrb[10].mxu1 %v11690_v42 }
 0x466   : > { %8415 = vmatprep.mubr.f32.mxu1 %v11348_v11  ;;  %9236 = vmatpush3.bf16.msra.mxu1 %v9233_v54  ;;  %v4961_v11 = vld [vmem:[#allocation6 + $0x310] sm:$0xff] }
 0x467   : > { %9238 = vmatprep.subr.bf16.mxu1 %v9237_v43  ;;  %v12152_v54 = vld [vmem:[#allocation22_spill] sm:$0xff] }
 0x469   : > { %8416 = vmatmul.mubr.f32.gmra.mrb[12].mxu1 %v11346_v52  ;;  %v12142_v52 = vmax.f32 %v11436_v6, 0.0  ;;  %v12149_v6 = vld [vmem:[#allocation19_spill] sm:$0xff] }
 0x46a   : > { %8418 = vmatprep.mubr.f32.mxu1 %v11358_v16  ;;  %9240 = vmatpush3.bf16.msra.mxu1 %v9237_v43  ;;  %v12143_v16 = vld [vmem:[#allocation12_spill] sm:$0xff]  ;;  %v9265_v43 = vpack.c.bf16 %v4970_v51, %v4969_v15  ;;  %v5267_v15 = vld [vmem:[#allocation6 + $0x390] sm:$0xff]  ;;  %v5268_v51 = vld [vmem:[#allocation6 + $0x398] sm:$0xff] }
 0x46b   : > { %9242 = vmatprep.subr.bf16.mxu1 %v9241_v61 }
 0x46d   : > { %8419 = vmatmul.mubr.f32.gmra.mrb[14].mxu1 %v11355_v19  ;;  %v4962_v19 = vld [vmem:[#allocation6 + $0x318] sm:$0xff] }
 0x46e   : > { %8421 = vmatprep.mubr.f32.mxu1 %v11368_v37  ;;  %9244 = vmatpush3.bf16.msra.mxu1 %v9241_v61  ;;  %v9249_v37 = vpack.c.bf16 %v4962_v19, %v4961_v11  ;;  %v4972_v61 = vld [vmem:[#allocation6 + $0x368] sm:$0xff]  ;;  %v5265_v19 = vld [vmem:[#allocation6 + $0x380] sm:$0xff] }
 0x46f   : > { %9246 = vmatprep.subr.bf16.mxu1 %v9245_v8  ;;  %v9269_v7 = vpack.c.bf16 %v4972_v61, %v4971_v50  ;;  %v5271_v61 = vld [vmem:[#allocation6 + $0x3b0] sm:$0xff] }
 0x471   : > { %8422 = vmatmul.mubr.f32.gmra.mrb[16].mxu1 %v11365_v32  ;;  %v12144_v32 = vmax.f32 %v12143_v16, 0.0  ;;  %v5266_v16 = vld [vmem:[#allocation6 + $0x388] sm:$0xff] }
 0x472   : > { %8424 = vmatprep.mubr.f32.mxu1 %v11378_v53  ;;  %v4964_v53 = vld [vmem:[#allocation6 + $0x328] sm:$0xff] }
 0x475   : > { %8425 = vmatmul.mubr.f32.gmra.mrb[18].mxu1 %v11375_v48  ;;  %v4963_v48 = vld [vmem:[#allocation6 + $0x320] sm:$0xff] }
 0x476   : > { %8427 = vmatprep.mubr.f32.mxu1 %v11388_v23  ;;  %v12146_v23 = vld [vmem:[#allocation16_spill] sm:$0xff] }
 0x479   : > { %8428 = vmatmul.mubr.f32.gmra.mrb[20].mxu1 %v11385_v0  ;;  %v12145_v0 = vld [vmem:[#allocation15_spill] sm:$0xff] }
 0x47a   : > { %8430 = vmatprep.mubr.f32.mxu1 %v11398_v26  ;;  %v4965_v26 = vld [vmem:[#allocation6 + $0x330] sm:$0xff] }
 0x47d   : > { %8431 = vmatmul.mubr.f32.gmra.mrb[22].mxu1 %v11395_v36  ;;  %v9253_v36 = vpack.c.bf16 %v4964_v53, %v4963_v48  ;;  %v12157_v48 = vld [vmem:[#allocation27_spill] sm:$0xff]  ;;  %v12159_v53 = vld [vmem:[#allocation29_spill] sm:$0xff] }
 0x47e   : > { %8433 = vmatprep.mubr.f32.mxu1 %v11408_v45  ;;  %v12147_v45 = vld [vmem:[#allocation17_spill] sm:$0xff] }
 0x481   : > { %8434 = vmatmul.mubr.f32.gmra.mrb[24].mxu1 %v11405_v17  ;;  %v4966_v17 = vld [vmem:[#allocation6 + $0x338] sm:$0xff] }
 0x482   : > { %8436 = vmatprep.mubr.f32.mxu1 %v11418_v55  ;;  %v9257_v55 = vpack.c.bf16 %v4966_v17, %v4965_v26  ;;  %v12163_v26 = vld [vmem:[#allocation33_spill] sm:$0xff]  ;;  %v12164_v17 = vld [vmem:[#allocation34_spill] sm:$0xff] }
 0x485   : > { %8437 = vmatmul.mubr.f32.gmra.mrb[26].mxu1 %v11415_v18  ;;  %v12148_v18 = vld [vmem:[#allocation18_spill] sm:$0xff] }
 0x486   : > { %8439 = vmatprep.mubr.f32.mxu1 %v11428_v4  ;;  %v4968_v4 = vld [vmem:[#allocation6 + $0x348] sm:$0xff] }
 0x489   : > { %8440 = vmatmul.mubr.f32.gmra.mrb[28].mxu1 %v11425_v22  ;;  %v4967_v22 = vld [vmem:[#allocation6 + $0x340] sm:$0xff] }
 0x48a   : > { %8442 = vmatprep.mubr.f32.mxu1 %v12142_v52  ;;  %v9261_v35 = vpack.c.bf16 %v4968_v4, %v4967_v22  ;;  %v12153_v52 = vld [vmem:[#allocation23_spill] sm:$0xff]  ;;  %v12168_v22 = vld [vmem:[#allocation38_spill] sm:$0xff] }
 0x48b   : > { %v12169_v4 = vld [vmem:[#allocation39_spill] sm:$0xff] }
 0x48d   : > { %8443 = vmatmul.mubr.f32.gmra.mrb[30].mxu1 %v12144_v32  ;;  %v12154_v32 = vld [vmem:[#allocation24_spill] sm:$0xff] }
 0x48e   : > { %8477 = vmatprep.mubr.f32.mxu1 %v11539_v46  ;;  %v12150_v46 = vld [vmem:[#allocation20_spill] sm:$0xff] }
 0x491   : > { %8478 = vmatmul.mubr.f32.vlgmr.msra.gmra.mrb[0].mxu1 %v12145_v0  ;;  %v12160_v0 = vld [vmem:[#allocation30_spill] sm:$0xff] }
 0x492   : > { %8480 = vmatprep.mubr.f32.mxu1 %v12146_v23  ;;  %9248 = vmatpush3.bf16.msra.mxu1 %v9245_v8  ;;  %v4974_v8 = vld [vmem:[#allocation6 + $0x378] sm:$0xff] }
 0x493   : > { %9250 = vmatprep.subr.bf16.mxu1 %v9249_v37  ;;  %v9273_v11 = vpack.c.bf16 %v4974_v8, %v4973_v40  ;;  %v12161_v23 = vld [vmem:[#allocation31_spill] sm:$0xff]  ;;  %v5274_v8 = vld [vmem:[#allocation6 + $0x3c8] sm:$0xff] }
 0x495   : > { %8481 = vmatmul.mubr.f32.gmra.mrb[2].mxu1 %v12147_v45  ;;  %v12165_v45 = vld [vmem:[#allocation35_spill] sm:$0xff] }
 0x496   : > { %8483 = vmatprep.mubr.f32.mxu1 %v12148_v18  ;;  %9252 = vmatpush3.bf16.msra.mxu1 %v9249_v37  ;;  %v12155_v37 = vld [vmem:[#allocation25_spill] sm:$0xff]  ;;  %v12166_v18 = vld [vmem:[#allocation36_spill] sm:$0xff] }
 0x497   : > { %9254 = vmatprep.subr.bf16.mxu1 %v9253_v36 }
 0x499   : > { %8484 = vmatmul.mubr.f32.gmra.mrb[4].mxu1 %v12149_v6  ;;  %v12170_v6 = vld [vmem:[#allocation40_spill] sm:$0xff] }
 0x49a   : > { %8486 = vmatprep.mubr.f32.mxu1 %v12150_v46  ;;  %9256 = vmatpush3.bf16.msra.mxu1 %v9253_v36  ;;  %v12162_v36 = vld [vmem:[#allocation32_spill] sm:$0xff]  ;;  %v11745_v46 = vld [vmem:[#allocation2 + $0x182] sm:$0xff] }
 0x49b   : > { %9258 = vmatprep.subr.bf16.mxu1 %v9257_v55 }
 0x49d   : > { %8487 = vmatmul.mubr.f32.gmra.mrb[6].mxu1 %v12151_v13  ;;  %v9281_v13 = vpack.c.bf16 %v5268_v51, %v5267_v15  ;;  %v5248_v15 = vld [vmem:[#allocation2 + $0xf1] sm:$0xff]  ;;  %v5249_v51 = vld [vmem:[#allocation2 + $0xf9] sm:$0xff] }
 0x49e   : > { %8489 = vmatprep.mubr.f32.mxu1 %v12152_v54  ;;  %9260 = vmatpush3.bf16.msra.mxu1 %v9257_v55  ;;  %v12167_v55 = vld [vmem:[#allocation37_spill] sm:$0xff]  ;;  %v5269_v54 = vld [vmem:[#allocation6 + $0x3a0] sm:$0xff] }
 0x49f   : > { %9262 = vmatprep.subr.bf16.mxu1 %v9261_v35 }
 0x4a1   : > { %8490 = vmatmul.mubr.f32.gmra.mrb[8].mxu1 %v11566_v31  ;;  %v9277_v31 = vpack.c.bf16 %v5266_v16, %v5265_v19  ;;  %v5280_v19 = vld [vmem:[#allocation6 + $0x3f8] sm:$0xff]  ;;  %v5572_v16 = vld [vmem:[#allocation6 + $0x408] sm:$0xff] }
 0x4a2   : > { %8492 = vmatprep.mubr.f32.mxu1 %v11569_v14  ;;  %9264 = vmatpush3.bf16.msra.mxu1 %v9261_v35  ;;  %v12156_v14 = vld [vmem:[#allocation26_spill] sm:$0xff]  ;;  %v11748_v35 = vld [vmem:[#allocation2 + $0x18a] sm:$0xff] }
 0x4a3   : > { %9266 = vmatprep.subr.bf16.mxu1 %v9265_v43 }
 0x4a5   : > { %8493 = vmatmul.mubr.f32.gmra.mrb[10].mxu1 %v11572_v47  ;;  %v12158_v47 = vld [vmem:[#allocation28_spill] sm:$0xff] }
 0x4a6   : > { %8495 = vmatprep.mubr.f32.mxu1 %v12153_v52  ;;  %9268 = vmatpush3.bf16.msra.mxu1 %v9265_v43  ;;  %v5270_v43 = vld [vmem:[#allocation6 + $0x3a8] sm:$0xff]  ;;  %v5276_v52 = vld [vmem:[#allocation6 + $0x3d8] sm:$0xff] }
 0x4a7   : > { %9270 = vmatprep.subr.bf16.mxu1 %v9269_v7  ;;  %v9285_v50 = vpack.c.bf16 %v5270_v43, %v5269_v54  ;;  %v5251_v54 = vld [vmem:[#allocation2 + $0x111] sm:$0xff]  ;;  %v5252_v43 = vld [vmem:[#allocation2 + $0x121] sm:$0xff] }
 0x4a9   : > { %8496 = vmatmul.mubr.f32.gmra.mrb[12].mxu1 %v12154_v32  ;;  %v12178_v32 = vld [vmem:[#allocation46_spill] sm:$0xff] }
 0x4aa   : > { %8498 = vmatprep.mubr.f32.mxu1 %v12155_v37  ;;  %9272 = vmatpush3.bf16.msra.mxu1 %v9269_v7  ;;  %v5272_v7 = vld [vmem:[#allocation6 + $0x3b8] sm:$0xff] }
 0x4ab   : > { %9274 = vmatprep.subr.bf16.mxu1 %v9273_v11  ;;  %v9289_v40 = vpack.c.bf16 %v5272_v7, %v5271_v61  ;;  %v5254_v61 = vld [vmem:[#allocation2 + $0x139] sm:$0xff]  ;;  %v5255_v7 = vld [vmem:[#allocation2 + $0x141] sm:$0xff] }
 0x4ad   : > { %8499 = vmatmul.mubr.f32.gmra.mrb[14].mxu1 %v12156_v14  ;;  %v12179_v14 = vld [vmem:[#allocation47_spill] sm:$0xff] }
 0x4ae   : > { %8501 = vmatprep.mubr.f32.mxu1 %v12157_v48  ;;  %9276 = vmatpush3.bf16.msra.mxu1 %v9273_v11  ;;  %v5278_v11 = vld [vmem:[#allocation6 + $0x3e8] sm:$0xff] }
 0x4af   : > { %9278 = vmatprep.subr.bf16.mxu1 %v9277_v31 }
 0x4b1   : > { %8502 = vmatmul.mubr.f32.gmra.mrb[16].mxu1 %v12158_v47  ;;  %v5581_v47 = vld [vmem:[#allocation6 + $0x450] sm:$0xff] }
 0x4b2   : > { %8504 = vmatprep.mubr.f32.mxu1 %v12159_v53  ;;  %v5582_v53 = vld [vmem:[#allocation6 + $0x458] sm:$0xff] }
 0x4b5   : > { %8505 = vmatmul.mubr.f32.gmra.mrb[18].mxu1 %v12160_v0  ;;  %v5240_v0 = vld [vmem:[#allocation2 + $0x91] sm:$0xff] }
 0x4b6   : > { %8507 = vmatprep.mubr.f32.mxu1 %v12161_v23  ;;  %v9329_v23 = vpack.c.bf16 %v5582_v53, %v5581_v47  ;;  %v11795_v47 = vld [vmem:[%s11953_s5] ss:$0 sm:$0xff] }
 0x4b9   : > { %8508 = vmatmul.mubr.f32.gmra.mrb[20].mxu1 %v12162_v36  ;;  %v5583_v36 = vld [vmem:[#allocation6 + $0x460] sm:$0xff] }
 0x4ba   : > { %8510 = vmatprep.mubr.f32.mxu1 %v12163_v26  ;;  %v5584_v26 = vld [vmem:[#allocation6 + $0x468] sm:$0xff] }
 0x4bd   : > { %8511 = vmatmul.mubr.f32.gmra.mrb[22].mxu1 %v12164_v17  ;;  %v5242_v17 = vld [vmem:[#allocation2 + $0xa9] sm:$0xff] }
 0x4be   : > { %8513 = vmatprep.mubr.f32.mxu1 %v12165_v45  ;;  %v5243_v45 = vld [vmem:[#allocation2 + $0xb1] sm:$0xff] }
 0x4c1   : > { %8514 = vmatmul.mubr.f32.gmra.mrb[24].mxu1 %v12166_v18  ;;  %v5585_v18 = vld [vmem:[#allocation6 + $0x470] sm:$0xff] }
 0x4c2   : > { %8516 = vmatprep.mubr.f32.mxu1 %v12167_v55  ;;  %v5586_v55 = vld [vmem:[#allocation6 + $0x478] sm:$0xff] }
 0x4c5   : > { %8517 = vmatmul.mubr.f32.gmra.mrb[26].mxu1 %v12168_v22  ;;  %v5244_v22 = vld [vmem:[#allocation2 + $0xc1] sm:$0xff] }
 0x4c6   : > { %8519 = vmatprep.mubr.f32.mxu1 %v12169_v4  ;;  %v5245_v4 = vld [vmem:[#allocation2 + $0xc9] sm:$0xff] }
 0x4c9   : > { %8520 = vmatmul.mubr.f32.gmra.mrb[28].mxu1 %v12170_v6  ;;  %v5246_v6 = vld [vmem:[#allocation2 + $0xd9] sm:$0xff] }
 0x4ca   : > { %8522 = vmatprep.mubr.f32.mxu1 %v11745_v46 }
 0x4cd   : > { %8523 = vmatmul.mubr.f32.gmra.mrb[30].mxu1 %v11748_v35 }
 0x4ce   : > { %8557 = vmatprep.mubr.f32.mxu1 %v11455_v25  ;;  %v5273_v25 = vld [vmem:[#allocation6 + $0x3c0] sm:$0xff] }
 0x4d1   : > { %8558 = vmatmul.mubr.f32.vlgmr.msra.gmra.mrb[0].mxu1 %v11458_v29  ;;  %v9293_v29 = vpack.c.bf16 %v5274_v8, %v5273_v25  ;;  %v5257_v25 = vld [vmem:[#allocation2 + $0x159] sm:$0xff]  ;;  %v5258_v8 = vld [vmem:[#allocation2 + $0x169] sm:$0xff] }
 0x4d2   : > { %8560 = vmatprep.mubr.f32.mxu1 %v11461_v57  ;;  %9280 = vmatpush3.bf16.msra.mxu1 %v9277_v31  ;;  %v5275_v57 = vld [vmem:[#allocation6 + $0x3d0] sm:$0xff]  ;;  %v5580_v31 = vld [vmem:[#allocation6 + $0x448] sm:$0xff] }
 0x4d3   : > { %9282 = vmatprep.subr.bf16.mxu1 %v9281_v13 }
 0x4d5   : > { %8561 = vmatmul.mubr.f32.gmra.mrb[2].mxu1 %v11464_v44  ;;  %v9297_v44 = vpack.c.bf16 %v5276_v52, %v5275_v57  ;;  %v5260_v57 = vld [vmem:[#allocation2 + $0x181] sm:$0xff]  ;;  %v5262_v52 = vld [vmem:[#allocation2 + $0x199] sm:$0xff] }
 0x4d6   : > { %8563 = vmatprep.mubr.f32.mxu1 %v11467_v63  ;;  %9284 = vmatpush3.bf16.msra.mxu1 %v9281_v13  ;;  %v5277_v63 = vld [vmem:[#allocation6 + $0x3e0] sm:$0xff] }
 0x4d7   : > { %9286 = vmatprep.subr.bf16.mxu1 %v9285_v50  ;;  %v5250_v13 = vld [vmem:[#allocation2 + $0x109] sm:$0xff] }
 0x4d9   : > { %8564 = vmatmul.mubr.f32.gmra.mrb[4].mxu1 %v11470_v9  ;;  %v9301_v9 = vpack.c.bf16 %v5278_v11, %v5277_v63  ;;  %v5263_v63 = vld [vmem:[#allocation2 + $0x1a1] sm:$0xff]  ;;  %v5538_v11 = vld [vmem:[#allocation2 + $0x32] sm:$0xff] }
 0x4da   : > { %8566 = vmatprep.mubr.f32.mxu1 %v11473_v20  ;;  %9288 = vmatpush3.bf16.msra.mxu1 %v9285_v50  ;;  %v5279_v20 = vld [vmem:[#allocation6 + $0x3f0] sm:$0xff]  ;;  %v5253_v50 = vld [vmem:[#allocation2 + $0x129] sm:$0xff] }
 0x4db   : > { %9290 = vmatprep.subr.bf16.mxu1 %v9289_v40 }
 0x4dd   : > { %8567 = vmatmul.mubr.f32.gmra.mrb[6].mxu1 %v11476_v12  ;;  %v9305_v12 = vpack.c.bf16 %v5280_v19, %v5279_v20  ;;  %v5540_v20 = vld [vmem:[#allocation2 + $0x4a] sm:$0xff]  ;;  %v5541_v19 = vld [vmem:[#allocation2 + $0x52] sm:$0xff] }
 0x4de   : > { %8569 = vmatprep.mubr.f32.mxu1 %v11479_v27  ;;  %9292 = vmatpush3.bf16.msra.mxu1 %v9289_v40  ;;  %v5571_v27 = vld [vmem:[#allocation6 + $0x400] sm:$0xff] }
 0x4df   : > { %9294 = vmatprep.subr.bf16.mxu1 %v9293_v29  ;;  %v5256_v40 = vld [vmem:[#allocation2 + $0x151] sm:$0xff] }
 0x4e1   : > { %8570 = vmatmul.mubr.f32.gmra.mrb[8].mxu1 %v11482_v21  ;;  %v9309_v21 = vpack.c.bf16 %v5572_v16, %v5571_v27  ;;  %v5543_v27 = vld [vmem:[#allocation2 + $0x6a] sm:$0xff]  ;;  %v5544_v16 = vld [vmem:[#allocation2 + $0x7a] sm:$0xff] }
 0x4e2   : > { %8572 = vmatprep.mubr.f32.mxu1 %v11485_v56  ;;  %9296 = vmatpush3.bf16.msra.mxu1 %v9293_v29  ;;  %v12171_v56 = vld [vmem:[#allocation13_spill] sm:$0xff] }
 0x4e3   : > { %9298 = vmatprep.subr.bf16.mxu1 %v9297_v44  ;;  %v5259_v29 = vld [vmem:[#allocation2 + $0x171] sm:$0xff] }
 0x4e5   : > { %8573 = vmatmul.mubr.f32.gmra.mrb[10].mxu1 %v11488_v1  ;;  %v12172_v1 = vld [vmem:[#allocation14_spill] sm:$0xff] }
 0x4e6   : > { %8575 = vmatprep.mubr.f32.mxu1 %v11491_v2  ;;  %9300 = vmatpush3.bf16.msra.mxu1 %v9297_v44  ;;  %v12173_v2 = vld [vmem:[#allocation41_spill] sm:$0xff]  ;;  %v5261_v44 = vld [vmem:[#allocation2 + $0x189] sm:$0xff] }
 0x4e7   : > { %9302 = vmatprep.subr.bf16.mxu1 %v9301_v9 }
 0x4e9   : > { %8576 = vmatmul.mubr.f32.gmra.mrb[12].mxu1 %v11494_v5  ;;  %v12174_v5 = vld [vmem:[#allocation42_spill] sm:$0xff] }
 0x4ea   : > { %8578 = vmatprep.mubr.f32.mxu1 %v11497_v60  ;;  %9304 = vmatpush3.bf16.msra.mxu1 %v9301_v9  ;;  %v9916_v60 = vld [vmem:[#allocation2] sm:$0xff] }
 0x4eb   : > { %9306 = vmatprep.subr.bf16.mxu1 %v9305_v12  ;;  %v5539_v9 = vld [vmem:[#allocation2 + $0x3a] sm:$0xff] }
 0x4ed   : > { %8579 = vmatmul.mubr.f32.gmra.mrb[14].mxu1 %v11500_v33  ;;  %v5573_v33 = vld [vmem:[#allocation6 + $0x410] sm:$0xff] }
 0x4ee   : > { %8581 = vmatprep.mubr.f32.mxu1 %v11503_v34  ;;  %9308 = vmatpush3.bf16.msra.mxu1 %v9305_v12  ;;  %v5574_v34 = vld [vmem:[#allocation6 + $0x418] sm:$0xff] }
 0x4ef   : > { %9310 = vmatprep.subr.bf16.mxu1 %v9309_v21  ;;  %v5542_v12 = vld [vmem:[#allocation2 + $0x62] sm:$0xff] }
 0x4f1   : > { %8582 = vmatmul.mubr.f32.gmra.mrb[16].mxu1 %v11506_v10  ;;  %v9313_v10 = vpack.c.bf16 %v5574_v34, %v5573_v33  ;;  %v5551_v33 = vld [vmem:[#allocation2 + $0xca] sm:$0xff]  ;;  %v5552_v34 = vld [vmem:[#allocation2 + $0xda] sm:$0xff] }
 0x4f2   : > { %8584 = vmatprep.mubr.f32.mxu1 %v11509_v62  ;;  %v5575_v62 = vld [vmem:[#allocation6 + $0x420] sm:$0xff] }
 0x4f5   : > { %8585 = vmatmul.mubr.f32.gmra.mrb[18].mxu1 %v11512_v49  ;;  %v5576_v49 = vld [vmem:[#allocation6 + $0x428] sm:$0xff] }
 0x4f6   : > { %8587 = vmatprep.mubr.f32.mxu1 %v11515_v59  ;;  %v12175_v59 = vld [vmem:[#allocation43_spill] sm:$0xff] }
 0x4f9   : > { %8588 = vmatmul.mubr.f32.gmra.mrb[20].mxu1 %v11518_v3  ;;  %v12176_v3 = vld [vmem:[#allocation44_spill] sm:$0xff] }
 0x4fa   : > { %8590 = vmatprep.mubr.f32.mxu1 %v11521_v24  ;;  %v9317_v24 = vpack.c.bf16 %v5576_v49, %v5575_v62  ;;  %v5554_v62 = vld [vmem:[#allocation2 + $0xf2] sm:$0xff]  ;;  %v5555_v49 = vld [vmem:[#allocation2 + $0xfa] sm:$0xff] }
 0x4fd   : > { %8591 = vmatmul.mubr.f32.gmra.mrb[22].mxu1 %v11524_v28  ;;  %v5577_v28 = vld [vmem:[#allocation6 + $0x430] sm:$0xff] }
 0x4fe   : > { %8593 = vmatprep.mubr.f32.mxu1 %v11527_v30  ;;  %v5578_v30 = vld [vmem:[#allocation6 + $0x438] sm:$0xff] }
 0x4ff   : > { %v9321_v37 = vpack.c.bf16 %v5578_v30, %v5577_v28  ;;  %v5559_v28 = vld [vmem:[#allocation2 + $0x12a] sm:$0xff]  ;;  %v5560_v30 = vld [vmem:[#allocation2 + $0x13a] sm:$0xff] }
 0x501   : > { %8594 = vmatmul.mubr.f32.gmra.mrb[24].mxu1 %v11530_v38  ;;  %v12177_v38 = vld [vmem:[#allocation45_spill] sm:$0xff] }
 0x502   : > { %8596 = vmatprep.mubr.f32.mxu1 %v12171_v56  ;;  %v5546_v56 = vld [vmem:[#allocation2 + $0x92] sm:$0xff] }
 0x505   : > { %8597 = vmatmul.mubr.f32.gmra.mrb[26].mxu1 %v12172_v1  ;;  %v5547_v1 = vld [vmem:[#allocation2 + $0x9a] sm:$0xff] }
 0x506   : > { %8599 = vmatprep.mubr.f32.mxu1 %v12173_v2  ;;  %v5548_v2 = vld [vmem:[#allocation2 + $0xaa] sm:$0xff] }
 0x509   : > { %8600 = vmatmul.mubr.f32.gmra.mrb[28].mxu1 %v12174_v5  ;;  %v5549_v5 = vld [vmem:[#allocation2 + $0xb2] sm:$0xff] }
 0x50a   : > { %8602 = vmatprep.mubr.f32.mxu1 %v9916_v60 }
 0x50d   : > { %8603 = vmatmul.mubr.f32.gmra.mrb[30].mxu1 %v9916_v60  ;;  %v5550_v60 = vld [vmem:[#allocation2 + $0xc2] sm:$0xff] }
 0x50e   : > { %8637 = vmatprep.mubr.f32.mxu1 %v11665_v58  ;;  %v5579_v58 = vld [vmem:[#allocation6 + $0x440] sm:$0xff] }
 0x50f   : > { %v9325_v48 = vpack.c.bf16 %v5580_v31, %v5579_v58  ;;  %v5564_v58 = vld [vmem:[#allocation2 + $0x16a] sm:$0xff]  ;;  %v5565_v31 = vld [vmem:[#allocation2 + $0x172] sm:$0xff] }
 0x511   : > { %8638 = vmatmul.mubr.f32.vlgmr.msra.gmra.mrb[0].mxu1 %v12175_v59  ;;  %v5556_v59 = vld [vmem:[#allocation2 + $0x10a] sm:$0xff] }
 0x512   : > { %8640 = vmatprep.mubr.f32.mxu1 %v12176_v3  ;;  %9312 = vmatpush3.bf16.msra.mxu1 %v9309_v21  ;;  %v5545_v21 = vld [vmem:[#allocation2 + $0x82] sm:$0xff]  ;;  %v5557_v3 = vld [vmem:[#allocation2 + $0x112] sm:$0xff] }
 0x513   : > { %9314 = vmatprep.subr.bf16.mxu1 %v9313_v10 }
 0x515   : > { %8641 = vmatmul.mubr.f32.gmra.mrb[2].mxu1 %v12177_v38  ;;  %v5561_v38 = vld [vmem:[#allocation2 + $0x142] sm:$0xff] }
 0x516   : > { %8643 = vmatprep.mubr.f32.mxu1 %v12178_v32  ;;  %9316 = vmatpush3.bf16.msra.mxu1 %v9313_v10  ;;  %v5553_v10 = vld [vmem:[#allocation2 + $0xe2] sm:$0xff]  ;;  %v5562_v32 = vld [vmem:[#allocation2 + $0x152] sm:$0xff] }
 0x517   : > { %9318 = vmatprep.subr.bf16.mxu1 %v9317_v24 }
 0x519   : > { %8644 = vmatmul.mubr.f32.gmra.mrb[4].mxu1 %v12179_v14  ;;  %v5568_v14 = vld [vmem:[#allocation2 + $0x19a] sm:$0xff] }
 0x51a   : > { %8646 = vmatprep.mubr.f32.mxu1 %v11683_v39  ;;  %9320 = vmatpush3.bf16.msra.mxu1 %v9317_v24  ;;  %v9333_v39 = vpack.c.bf16 %v5584_v26, %v5583_v36  ;;  %v5558_v24 = vld [vmem:[#allocation2 + $0x122] sm:$0xff] }
 0x51b   : > { %9322 = vmatprep.subr.bf16.mxu1 %v9321_v37 }
 0x51d   : > { %8647 = vmatmul.mubr.f32.gmra.mrb[6].mxu1 %v11686_v41  ;;  %v9337_v41 = vpack.c.bf16 %v5586_v55, %v5585_v18 }
 0x51e   : > { %8649 = vmatprep.mubr.f32.mxu1 %v5240_v0  ;;  %9324 = vmatpush3.bf16.msra.mxu1 %v9321_v37  ;;  %v5563_v37 = vld [vmem:[#allocation2 + $0x15a] sm:$0xff] }
 0x51f   : > { %9326 = vmatprep.subr.bf16.mxu1 %v9325_v48  ;;  %v5884_v0 = vld [vmem:[%s10241_s11 + $0x8] sm:$0xff] }
 0x521   : > { %8650 = vmatmul.mubr.f32.gmra.mrb[8].mxu1 %v11690_v42  ;;  %v5247_v42 = vld [vmem:[#allocation2 + $0xe1] sm:$0xff] }
 0x522   : > { %8652 = vmatprep.mubr.f32.mxu1 %v5242_v17  ;;  %9328 = vmatpush3.bf16.msra.mxu1 %v9325_v48  ;;  %v5569_v48 = vld [vmem:[#allocation2 + $0x1a2] sm:$0xff] }
 0x523   : > { %9330 = vmatprep.subr.bf16.mxu1 %v9329_v23 }
 0x525   : > { %8653 = vmatmul.mubr.f32.gmra.mrb[10].mxu1 %v5243_v45  ;;  %v5886_v45 = vld [vmem:[%s10241_s11 + $0x18] sm:$0xff] }
 0x526   : > { %8655 = vmatprep.mubr.f32.mxu1 %v5244_v22  ;;  %9332 = vmatpush3.bf16.msra.mxu1 %v9329_v23 }
 0x527   : > { %9334 = vmatprep.subr.bf16.mxu1 %v9333_v39 }
 0x529   : > { %8656 = vmatmul.mubr.f32.gmra.mrb[12].mxu1 %v5245_v4 }
 0x52a   : > { %8658 = vmatprep.mubr.f32.mxu1 %v5246_v6  ;;  %9336 = vmatpush3.bf16.msra.mxu1 %v9333_v39 }
 0x52b   : > { %9338 = vmatprep.subr.bf16.mxu1 %v9337_v41 }
 0x52d   : > { %8659 = vmatmul.mubr.f32.gmra.mrb[14].mxu1 %v5247_v42 }
 0x52e   : > { %8661 = vmatprep.mubr.f32.mxu1 %v5248_v15  ;;  %9340 = vmatpush3.bf16.msra.mxu1 %v9337_v41  ;;  %v5885_v41 = vld [vmem:[%s10241_s11 + $0x10] sm:$0xff] }
 0x531   : > { %8662 = vmatmul.mubr.f32.gmra.mrb[16].mxu1 %v5249_v51 }
 0x532   : > { %8664 = vmatprep.mubr.f32.mxu1 %v5250_v13  ;;  %v5888_v13 = vld [vmem:[%s10241_s11 + $0x28] sm:$0xff] }
 0x535   : > { %8665 = vmatmul.mubr.f32.gmra.mrb[18].mxu1 %v5251_v54 }
 0x536   : > { %8667 = vmatprep.mubr.f32.mxu1 %v5252_v43 }
 0x539   : > { %8668 = vmatmul.mubr.f32.gmra.mrb[20].mxu1 %v5253_v50 }
 0x53a   : > { %8670 = vmatprep.mubr.f32.mxu1 %v5254_v61  ;;  %v5887_v61 = vld [vmem:[%s10241_s11 + $0x20] sm:$0xff] }
 0x53d   : > { %8671 = vmatmul.mubr.f32.gmra.mrb[22].mxu1 %v5255_v7 }
 0x53e   : > { %8673 = vmatprep.mubr.f32.mxu1 %v5256_v40 }
 0x541   : > { %8674 = vmatmul.mubr.f32.gmra.mrb[24].mxu1 %v5257_v25 }
 0x542   : > { %8676 = vmatprep.mubr.f32.mxu1 %v5258_v8 }
 0x545   : > { %8677 = vmatmul.mubr.f32.gmra.mrb[26].mxu1 %v5259_v29 }
 0x546   : > { %8679 = vmatprep.mubr.f32.mxu1 %v5260_v57  ;;  %v5890_v57 = vld [vmem:[%s10241_s11 + $0x38] sm:$0xff] }
 0x549   : > { %8680 = vmatmul.mubr.f32.gmra.mrb[28].mxu1 %v5261_v44 }
 0x54a   : > { %8682 = vmatprep.mubr.f32.mxu1 %v5262_v52 }
 0x54d   : > { %8683 = vmatmul.mubr.f32.gmra.mrb[30].mxu1 %v5263_v63 }
 0x54e   : > { %8717 = vmatprep.mubr.f32.mxu1 %v5538_v11  ;;  %v5889_v11 = vld [vmem:[%s10241_s11 + $0x30] sm:$0xff] }
 0x551   : > { %8718 = vmatmul.mubr.f32.vlgmr.msra.gmra.mrb[0].mxu1 %v5539_v9 }
 0x552   : > { %8720 = vmatprep.mubr.f32.mxu1 %v5540_v20 }
 0x555   : > { %8721 = vmatmul.mubr.f32.gmra.mrb[2].mxu1 %v5541_v19 }
 0x556   : > { %8723 = vmatprep.mubr.f32.mxu1 %v5542_v12 }
 0x559   : > { %8724 = vmatmul.mubr.f32.gmra.mrb[4].mxu1 %v5543_v27 }
 0x55a   : > { %8726 = vmatprep.mubr.f32.mxu1 %v5544_v16  ;;  %v5892_v16 = vld [vmem:[%s10241_s11 + $0x48] sm:$0xff] }
 0x55d   : > { %8727 = vmatmul.mubr.f32.gmra.mrb[6].mxu1 %v5545_v21 }
 0x55e   : > { %8729 = vmatprep.mubr.f32.mxu1 %v5546_v56 }
 0x561   : > { %8730 = vmatmul.mubr.f32.gmra.mrb[8].mxu1 %v5547_v1 }
 0x562   : > { %8732 = vmatprep.mubr.f32.mxu1 %v5548_v2  ;;  %v5891_v2 = vld [vmem:[%s10241_s11 + $0x40] sm:$0xff] }
 0x565   : > { %8733 = vmatmul.mubr.f32.gmra.mrb[10].mxu1 %v5549_v5 }
 0x566   : > { %8735 = vmatprep.mubr.f32.mxu1 %v5550_v60 }
 0x569   : > { %8736 = vmatmul.mubr.f32.gmra.mrb[12].mxu1 %v5551_v33 }
 0x56a   : > { %8738 = vmatprep.mubr.f32.mxu1 %v5552_v34 }
 0x56d   : > { %8739 = vmatmul.mubr.f32.gmra.mrb[14].mxu1 %v5553_v10 }
 0x56e   : > { %8741 = vmatprep.mubr.f32.mxu1 %v5554_v62  ;;  %v5894_v62 = vld [vmem:[%s10241_s11 + $0x58] sm:$0xff] }
 0x571   : > { %8742 = vmatmul.mubr.f32.gmra.mrb[16].mxu1 %v5555_v49 }
 0x572   : > { %8744 = vmatprep.mubr.f32.mxu1 %v5556_v59 }
 0x575   : > { %8745 = vmatmul.mubr.f32.gmra.mrb[18].mxu1 %v5557_v3 }
 0x576   : > { %8747 = vmatprep.mubr.f32.mxu1 %v5558_v24  ;;  %v5893_v24 = vld [vmem:[%s10241_s11 + $0x50] sm:$0xff] }
 0x579   : > { %8748 = vmatmul.mubr.f32.gmra.mrb[20].mxu1 %v5559_v28 }
 0x57a   : > { %8750 = vmatprep.mubr.f32.mxu1 %v5560_v30 }
 0x57d   : > { %8751 = vmatmul.mubr.f32.gmra.mrb[22].mxu1 %v5561_v38 }
 0x57e   : > { %8753 = vmatprep.mubr.f32.mxu1 %v5562_v32 }
 0x581   : > { %8754 = vmatmul.mubr.f32.gmra.mrb[24].mxu1 %v5563_v37 }
 0x582   : > { %8756 = vmatprep.mubr.f32.mxu1 %v5564_v58  ;;  %v5896_v58 = vld [vmem:[%s10241_s11 + $0x68] sm:$0xff] }
 0x585   : > { %8757 = vmatmul.mubr.f32.gmra.mrb[26].mxu1 %v5565_v31 }
 0x586   : > { %8759 = vmatprep.mubr.f32.mxu1 %v11745_v46  ;;  %v5883_v46 = vld [vmem:[%s10241_s11] sm:$0xff] }
 0x589   : > { %8760 = vmatmul.mubr.f32.gmra.mrb[28].mxu1 %v11748_v35 }
 0x58a   : > { %8762 = vmatprep.mubr.f32.mxu1 %v5568_v14 }
 0x58d   : > { %8763 = vmatmul.mubr.f32.gmra.mrb[30].mxu1 %v5569_v48 }
 0x624   : > { %v8719_v53 = vpop.f32.mrb[0].mxu1 }
 0x625   : > { %v5852_v23 = vadd.f32 %v8719_v53, %v11795_v47  ;;  %v5653_v36 = vpop.f32.mrb[1].mxu1  ;;  %v5895_v53 = vld [vmem:[%s10241_s11 + $0x60] sm:$0xff] }
 0x626   : > { %v5851_v26 = vadd.f32 %v11795_v47, %v5653_v36 }
 0x627   : > { %v5916_v17 = vadd.f32 %v5884_v0, %v5852_v23 }
 0x628   : > { %v5915_v35 = vadd.f32 %v5883_v46, %v5851_v26  ;;  %v8722_v39 = vpop.f32.mrb[2].mxu1 }
 0x629   : > { %v5948_v18 = vmax.f32 %v5916_v17, 0.0  ;;  %v5854_v55 = vadd.f32 %v8722_v39, %v11795_v47  ;;  %v5663_v22 = vpop.f32.mrb[3].mxu1  ;;  %v5898_v17 = vld [vmem:[%s10241_s11 + $0x78] sm:$0xff] }
 0x62a   : > { %v5947_v4 = vmax.f32 %v5915_v35, 0.0  ;;  %v5853_v6 = vadd.f32 %v11795_v47, %v5663_v22 }
 0x62b   : > { %5980 = vst [vmem:[%s11807_s20 + $0x8] sm:$0xff] %v5948_v18  ;;  %v5918_v42 = vadd.f32 %v5886_v45, %v5854_v55  ;;  %v5897_v18 = vld [vmem:[%s10241_s11 + $0x70] sm:$0xff] }
 0x62c   : > { %5979 = vst [vmem:[%s11807_s20] sm:$0xff] %v5947_v4  ;;  %v5917_v15 = vadd.f32 %v5885_v41, %v5853_v6  ;;  %v8725_v51 = vpop.f32.mrb[4].mxu1 }
 0x62d   : > { %v5950_v54 = vmax.f32 %v5918_v42, 0.0  ;;  %v5856_v43 = vadd.f32 %v8725_v51, %v11795_v47  ;;  %v5673_v50 = vpop.f32.mrb[5].mxu1  ;;  %v5900_v42 = vld [vmem:[%s10241_s11 + $0x88] sm:$0xff] }
 0x62e   : > { %v5949_v7 = vmax.f32 %v5917_v15, 0.0  ;;  %v5855_v40 = vadd.f32 %v11795_v47, %v5673_v50 }
 0x62f   : > { %5982 = vst [vmem:[%s11807_s20 + $0x18] sm:$0xff] %v5950_v54  ;;  %v5920_v25 = vadd.f32 %v5888_v13, %v5856_v43  ;;  %v5899_v54 = vld [vmem:[%s10241_s11 + $0x80] sm:$0xff] }
 0x630   : > { %5981 = vst [vmem:[%s11807_s20 + $0x10] sm:$0xff] %v5949_v7  ;;  %v5919_v8 = vadd.f32 %v5887_v61, %v5855_v40  ;;  %v8728_v29 = vpop.f32.mrb[6].mxu1 }
 0x631   : > { %v5952_v52 = vmax.f32 %v5920_v25, 0.0  ;;  %v5858_v44 = vadd.f32 %v8728_v29, %v11795_v47  ;;  %v5683_v63 = vpop.f32.mrb[7].mxu1  ;;  %v5902_v25 = vld [vmem:[%s10241_s11 + $0x98] sm:$0xff] }
 0x632   : > { %v5951_v9 = vmax.f32 %v5919_v8, 0.0  ;;  %v5857_v20 = vadd.f32 %v11795_v47, %v5683_v63 }
 0x633   : > { %5984 = vst [vmem:[%s11807_s20 + $0x28] sm:$0xff] %v5952_v52  ;;  %v5922_v19 = vadd.f32 %v5890_v57, %v5858_v44  ;;  %v5901_v52 = vld [vmem:[%s10241_s11 + $0x90] sm:$0xff] }
 0x634   : > { %5983 = vst [vmem:[%s11807_s20 + $0x20] sm:$0xff] %v5951_v9  ;;  %v5921_v12 = vadd.f32 %v5889_v11, %v5857_v20  ;;  %v8731_v27 = vpop.f32.mrb[8].mxu1 }
 0x635   : > { %v5954_v21 = vmax.f32 %v5922_v19, 0.0  ;;  %v5860_v56 = vadd.f32 %v8731_v27, %v11795_v47  ;;  %v5693_v1 = vpop.f32.mrb[9].mxu1  ;;  %v5904_v19 = vld [vmem:[%s10241_s11 + $0xa8] sm:$0xff] }
 0x636   : > { %v5953_v5 = vmax.f32 %v5921_v12, 0.0  ;;  %v5859_v60 = vadd.f32 %v11795_v47, %v5693_v1 }
 0x637   : > { %5986 = vst [vmem:[%s11807_s20 + $0x38] sm:$0xff] %v5954_v21  ;;  %v5924_v33 = vadd.f32 %v5892_v16, %v5860_v56  ;;  %v5903_v21 = vld [vmem:[%s10241_s11 + $0xa0] sm:$0xff] }
 0x638   : > { %5985 = vst [vmem:[%s11807_s20 + $0x30] sm:$0xff] %v5953_v5  ;;  %v5923_v34 = vadd.f32 %v5891_v2, %v5859_v60  ;;  %v8734_v10 = vpop.f32.mrb[10].mxu1 }
 0x639   : > { %v5956_v49 = vmax.f32 %v5924_v33, 0.0  ;;  %v5862_v59 = vadd.f32 %v8734_v10, %v11795_v47  ;;  %v5703_v3 = vpop.f32.mrb[11].mxu1  ;;  %v5906_v33 = vld [vmem:[%s10241_s11 + $0xb8] sm:$0xff] }
 0x63a   : > { %v5955_v28 = vmax.f32 %v5923_v34, 0.0  ;;  %v5861_v30 = vadd.f32 %v11795_v47, %v5703_v3 }
 0x63b   : > { %5988 = vst [vmem:[%s11807_s20 + $0x48] sm:$0xff] %v5956_v49  ;;  %v5926_v38 = vadd.f32 %v5894_v62, %v5862_v59  ;;  %v5905_v49 = vld [vmem:[%s10241_s11 + $0xb0] sm:$0xff] }
 0x63c   : > { %5987 = vst [vmem:[%s11807_s20 + $0x40] sm:$0xff] %v5955_v28  ;;  %v5925_v32 = vadd.f32 %v5893_v24, %v5861_v30  ;;  %v8737_v37 = vpop.f32.mrb[12].mxu1 }
 0x63d   : > { %v5958_v31 = vmax.f32 %v5926_v38, 0.0  ;;  %v5864_v14 = vadd.f32 %v8737_v37, %v11795_v47  ;;  %v5713_v48 = vpop.f32.mrb[13].mxu1  ;;  %v5908_v38 = vld [vmem:[%s10241_s11 + $0xc8] sm:$0xff] }
 0x63e   : > { %v5957_v0 = vmax.f32 %v5925_v32, 0.0  ;;  %v5863_v23 = vadd.f32 %v11795_v47, %v5713_v48 }
 0x63f   : > { %5990 = vst [vmem:[%s11807_s20 + $0x58] sm:$0xff] %v5958_v31  ;;  %v5928_v36 = vadd.f32 %v5896_v58, %v5864_v14  ;;  %v5907_v31 = vld [vmem:[%s10241_s11 + $0xc0] sm:$0xff] }
 0x640   : > { %5989 = vst [vmem:[%s11807_s20 + $0x50] sm:$0xff] %v5957_v0  ;;  %v5927_v46 = vadd.f32 %v5895_v53, %v5863_v23  ;;  %v8740_v26 = vpop.f32.mrb[14].mxu1 }
 0x641   : > { %v5960_v35 = vmax.f32 %v5928_v36, 0.0  ;;  %v5866_v39 = vadd.f32 %v8740_v26, %v11795_v47  ;;  %v5723_v45 = vpop.f32.mrb[15].mxu1  ;;  %v5910_v36 = vld [vmem:[%s10241_s11 + $0xd8] sm:$0xff] }
 0x642   : > { %v5959_v55 = vmax.f32 %v5927_v46, 0.0  ;;  %v5865_v22 = vadd.f32 %v11795_v47, %v5723_v45 }
 0x643   : > { %5992 = vst [vmem:[%s11807_s20 + $0x68] sm:$0xff] %v5960_v35  ;;  %v5930_v41 = vadd.f32 %v5898_v17, %v5866_v39  ;;  %v5909_v35 = vld [vmem:[%s10241_s11 + $0xd0] sm:$0xff] }
 0x644   : > { %5991 = vst [vmem:[%s11807_s20 + $0x60] sm:$0xff] %v5959_v55  ;;  %v5929_v4 = vadd.f32 %v5897_v18, %v5865_v22  ;;  %v8743_v6 = vpop.f32.mrb[16].mxu1 }
 0x645   : > { %v5962_v15 = vmax.f32 %v5930_v41, 0.0  ;;  %v5868_v51 = vadd.f32 %v8743_v6, %v11795_v47  ;;  %v5733_v13 = vpop.f32.mrb[17].mxu1  ;;  %v5912_v41 = vld [vmem:[%s10241_s11 + $0xe8] sm:$0xff] }
 0x646   : > { %v5961_v43 = vmax.f32 %v5929_v4, 0.0  ;;  %v5867_v50 = vadd.f32 %v11795_v47, %v5733_v13 }
 0x647   : > { %5994 = vst [vmem:[%s11807_s20 + $0x78] sm:$0xff] %v5962_v15  ;;  %v5932_v61 = vadd.f32 %v5900_v42, %v5868_v51  ;;  %v5911_v15 = vld [vmem:[%s10241_s11 + $0xe0] sm:$0xff] }
 0x648   : > { %5993 = vst [vmem:[%s11807_s20 + $0x70] sm:$0xff] %v5961_v43  ;;  %v5931_v7 = vadd.f32 %v5899_v54, %v5867_v50  ;;  %v8746_v40 = vpop.f32.mrb[18].mxu1 }
 0x649   : > { %v5964_v8 = vmax.f32 %v5932_v61, 0.0  ;;  %v5870_v29 = vadd.f32 %v8746_v40, %v11795_v47  ;;  %v5743_v57 = vpop.f32.mrb[19].mxu1  ;;  %v5914_v61 = vld [vmem:[%s10241_s11 + $0xf8] sm:$0xff] }
 0x64a   : > { %v5963_v44 = vmax.f32 %v5931_v7, 0.0  ;;  %v5869_v63 = vadd.f32 %v11795_v47, %v5743_v57 }
 0x64b   : > { %5996 = vst [vmem:[%s11807_s20 + $0x88] sm:$0xff] %v5964_v8  ;;  %v5934_v11 = vadd.f32 %v5902_v25, %v5870_v29  ;;  %v5913_v8 = vld [vmem:[%s10241_s11 + $0xf0] sm:$0xff]  ;;  %s9975_s11 = scalar_lea.vmem %s11902_s18, 4096 }
 0x64c   : > { %5995 = vst [vmem:[%s11807_s20 + $0x80] sm:$0xff] %v5963_v44  ;;  %v5933_v9 = vadd.f32 %v5901_v52, %v5869_v63  ;;  %v8749_v20 = vpop.f32.mrb[20].mxu1  ;;  %p9976_p6 = scmp.ne.s32.totalorder %s11902_s18, %s9975_s11  ;;  %p9983_p3 = scmp.lt.s32.totalorder %s9981_s27, %s9975_s11 }
 0x64d   : > { %v5966_v12 = vmax.f32 %v5934_v11, 0.0  ;;  %v5872_v27 = vadd.f32 %v8749_v20, %v11795_v47  ;;  %v5753_v16 = vpop.f32.mrb[21].mxu1 }
 0x64e   : > { %v5965_v56 = vmax.f32 %v5933_v9, 0.0  ;;  %v5871_v1 = vadd.f32 %v11795_v47, %v5753_v16  ;;  %p9977_p8 = pnand %p9976_p6, %p10184_p12  ;;  %p9984_p7 = por %p9983_p3, %p9982_p13 }
 0x64f   : > { %5998 = vst [vmem:[%s11807_s20 + $0x98] sm:$0xff] %v5966_v12  ;;  %v5936_v2 = vadd.f32 %v5904_v19, %v5872_v27 }
 0x650   : > { %5997 = vst [vmem:[%s11807_s20 + $0x90] sm:$0xff] %v5965_v56  ;;  %v5935_v5 = vadd.f32 %v5903_v21, %v5871_v1  ;;  %v8752_v60 = vpop.f32.mrb[22].mxu1  ;;  %p9978_p10 = pneg %p9977_p8 }
 0x651   : > { %v5968_v34 = vmax.f32 %v5936_v2, 0.0  ;;  %v5874_v10 = vadd.f32 %v8752_v60, %v11795_v47  ;;  %v5763_v62 = vpop.f32.mrb[23].mxu1 }
 0x652   : > { %v5967_v59 = vmax.f32 %v5935_v5, 0.0  ;;  %v5873_v3 = vadd.f32 %v11795_v47, %v5763_v62  ;;  %p9985_p9 = pnand %p9984_p7, %p9978_p10 }
 0x653   : > { %6000 = vst [vmem:[%s11807_s20 + $0xa8] sm:$0xff] %v5968_v34  ;;  %v5938_v24 = vadd.f32 %v5906_v33, %v5874_v10 }
 0x654   : > { %5999 = vst [vmem:[%s11807_s20 + $0xa0] sm:$0xff] %v5967_v59  ;;  %v5937_v28 = vadd.f32 %v5905_v49, %v5873_v3  ;;  %v8755_v30 = vpop.f32.mrb[24].mxu1 }
 0x655   : > { %v5970_v32 = vmax.f32 %v5938_v24, 0.0  ;;  %v5876_v37 = vadd.f32 %v8755_v30, %v11795_v47  ;;  %v5773_v58 = vpop.f32.mrb[25].mxu1 }
 0x656   : > { %v5969_v14 = vmax.f32 %v5937_v28, 0.0  ;;  %v5875_v48 = vadd.f32 %v11795_v47, %v5773_v58 }
 0x657   : > { %6002 = vst [vmem:[%s11807_s20 + $0xb8] sm:$0xff] %v5970_v32  ;;  %v5940_v53 = vadd.f32 %v5908_v38, %v5876_v37 }
 0x658   : > { %6001 = vst [vmem:[%s11807_s20 + $0xb0] sm:$0xff] %v5969_v14  ;;  %v5939_v0 = vadd.f32 %v5907_v31, %v5875_v48  ;;  %v8758_v23 = vpop.f32.mrb[26].mxu1 }
 0x659   : > { %v5972_v46 = vmax.f32 %v5940_v53, 0.0  ;;  %v5878_v26 = vadd.f32 %v8758_v23, %v11795_v47  ;;  %v5783_v17 = vpop.f32.mrb[27].mxu1 }
 0x65a   : > { %v5971_v39 = vmax.f32 %v5939_v0, 0.0  ;;  %v5877_v45 = vadd.f32 %v11795_v47, %v5783_v17 }
 0x65b   : > { %6004 = vst [vmem:[%s11807_s20 + $0xc8] sm:$0xff] %v5972_v46  ;;  %v5942_v18 = vadd.f32 %v5910_v36, %v5878_v26 }
 0x65c   : > { %6003 = vst [vmem:[%s11807_s20 + $0xc0] sm:$0xff] %v5971_v39  ;;  %v5941_v55 = vadd.f32 %v5909_v35, %v5877_v45  ;;  %v8761_v22 = vpop.f32.mrb[28].mxu1 }
 0x65d   : > { %v5974_v4 = vmax.f32 %v5942_v18, 0.0  ;;  %v5880_v6 = vadd.f32 %v8761_v22, %v11795_v47  ;;  %v5793_v42 = vpop.f32.mrb[29].mxu1 }
 0x65e   : > { %v5973_v51 = vmax.f32 %v5941_v55, 0.0  ;;  %v5879_v13 = vadd.f32 %v11795_v47, %v5793_v42 }
 0x65f   : > { %6006 = vst [vmem:[%s11807_s20 + $0xd8] sm:$0xff] %v5974_v4  ;;  %v5944_v54 = vadd.f32 %v5912_v41, %v5880_v6 }
 0x660   : > { %6005 = vst [vmem:[%s11807_s20 + $0xd0] sm:$0xff] %v5973_v51  ;;  %v5943_v43 = vadd.f32 %v5911_v15, %v5879_v13  ;;  %v8764_v50 = vpop.f32.mrb[30].mxu1 }
 0x661   : > { %v5976_v7 = vmax.f32 %v5944_v54, 0.0  ;;  %v5882_v40 = vadd.f32 %v8764_v50, %v11795_v47  ;;  %v5803_v25 = vpop.f32.mrb[31].mxu1 }
 0x662   : > { %v5975_v29 = vmax.f32 %v5943_v43, 0.0  ;;  %v5881_v57 = vadd.f32 %v11795_v47, %v5803_v25 }
 0x663   : > { %6008 = vst [vmem:[%s11807_s20 + $0xe8] sm:$0xff] %v5976_v7  ;;  %v5946_v52 = vadd.f32 %v5914_v61, %v5882_v40 }
 0x664   : > { %6007 = vst [vmem:[%s11807_s20 + $0xe0] sm:$0xff] %v5975_v29  ;;  %v5945_v44 = vadd.f32 %v5913_v8, %v5881_v57 }
 0x665   : > { %v5978_v63 = vmax.f32 %v5946_v52, 0.0 }
 0x666   : > { %v5977_v11 = vmax.f32 %v5945_v44, 0.0 }
 0x667   : > { %6010 = vst [vmem:[%s11807_s20 + $0xf8] sm:$0xff] %v5978_v63 }
 0x668   : > { %6009 = vst [vmem:[%s11807_s20 + $0xf0] sm:$0xff] %v5977_v11 }
 0x669   : > { %9988 = shalt.err (!%p9985_p9)
}
 0x66a   : > { %s9989_s30 = scalar_lea.hbm %s11900_s26, 4096  ;;  %s9993_s16 = scalar_lea.hbm %s11954_s6, 8192 }
 0x66b   : > { %p9990_p1 = scmp.ne.s32.totalorder %s11900_s26, %s9989_s30  ;;  %p9994_p11 = scmp.lt.u32.totalorder %s11900_s26, %s11954_s6 }
 0x66c   : > { %p9995_p2 = scmp.lt.u32.totalorder %s9993_s16, %s9989_s30  ;;  %p9997_p6 = scmp.lt.u32.totalorder %s9989_s30, %s11900_s26 }
 0x66d   : > { %p9991_p0 = pnand %p9990_p1, %p10184_p12 }
 0x66e   : > { %p9996_p4 = por %p9995_p2, %p9994_p11 }
 0x66f   : > { %p9992_p5 = pneg %p9991_p0 }
 0x670   : > { %p9998_p8 = por %p9997_p6, %p9996_p4 }
 0x672   : > { %p9999_p10 = pnand %p9998_p8, %p9992_p5 }
 0x674   : > { %10002 = shalt.err (!%p9999_p10)
}
 0x675   : > { %s10053_s7 = smov 128   ;;  %s10054_s29 = smov 8  }
 0x676   : > { %9860 = dma.vmem_to_hbm [thread:$0]  (%p10184_p12), %s11902_s18, 4096, %s11900_s26, %s6012_s25, %s10053_s7, %s10053_s7, %s10054_s29  }
 0x677 PF: > { %s6040_s11 = sand.u32 1, %s10033_s21   ;;  %p12180_p13 = scmp.ne.s32.totalorder %s12030_s28, 0 }
 0x678   : > { %p12181_p3 = scmp.ge.s32.totalorder %s10045_s24, 2  ;;  %s6041_s19 = scalar_lea.sflag [#allocation5], %s6040_s11 }
 0x67a   : > { %p9871_p7 = pnand %p12181_p3, %p12180_p13 }
 0x67c   : > { %10028 = dma.done.wait (!%p9871_p7), %s6041_s19, 4096  }
 0x67d   : > { %10030 = vsyncadd (!%p9871_p7), %s6041_s19, 4294963200  ;;  %p20_p9 = scmp.ge.s32.totalorder %s10146_s9, 4   ;;  %s12182_s21 = smov %s10037_s22 }
 0x67e   : > { %s12183_s22 = smov %s10041_s23  ;;  %s12184_s23 = smov %s10180_s13 }
 0x67f   : > { %s12185_s24 = smov %s10146_s9  ;;  %22 = sbr.rel (!%p20_p9) target bundleno = 6 (0x6), region = 116 }
 0x686   :  { %6046 = vsyncpa [#allocation4], 1 }
 0x687   :  { %6048 = vsyncpa [#allocation4 + $0x1], 1 }
 0x688   :  { %6049 = vsyncpa [#allocation7], 1 }
 0x689   :  { %6050 = vsyncpa [#allocation5], 1 }
 0x68a   :  { %6052 = vsyncpa [#allocation5 + $0x1], 1 }

</bundles_post_ra>
